<compile_context>
chip_gen: v6e
topology: v6e:2x2x1
jax: 0.10.0
libtpu: 0.0.40
codegen_flags: <defaults>
</compile_context>

<pallas_src>
import functools

import jax
import jax.numpy as jnp
from jax import lax
from jax.experimental import pallas as pl
from jax.experimental.pallas import tpu as pltpu


def _bottleneck_kernel(W, Wp, TH, x_ref, mask_ref, w1_ref, b1_ref, w2_ref,
                       b2_ref, w3_ref, b3_ref, o_ref, h1s_ref):
    """One (batch, row-tile) step.

    x_ref   : ((H+2)*Wp, cin_p)  whole padded image, original dtype
    mask_ref: ((TH+2)*Wp, 1)     1.0 for real columns, 0.0 for pad columns
    w*_ref  : BN-scale-folded weights in compute dtype
    b*_ref  : (1, C) f32 biases
    o_ref   : (TH*Wp, Cout)      output rows of this tile (real channels only)
    h1s_ref : ((TH+2)*Wp, wd_p)  conv1 halo scratch, compute dtype
    """
    r = pl.program_id(1)
    n_r = pl.num_programs(1)
    THWp = TH * Wp
    wd = w1_ref.shape[1]
    wd2 = w2_ref.shape[2] // 3
    cdt = h1s_ref.dtype                       # compute / MXU dtype
    cout = o_ref.shape[-1]
    row0 = r * TH

    # ---- conv1 (1x1) + bn1 + relu: ONE matmul over the TH+2 halo rows --------
    xs = x_ref[pl.ds(pl.multiple_of(row0 * Wp, Wp), (TH + 2) * Wp), :]
    h1 = jnp.dot(xs.astype(cdt), w1_ref[...], preferred_element_type=jnp.float32)
    h1 = jnp.maximum(h1 + b1_ref[...], 0.0)
    # Zero the right-pad columns so they act as conv2's spatial zero padding.
    h1s_ref[...] = h1.astype(cdt) * mask_ref[...]

    # Out-of-image halo rows must be zero (the zero-padded x row picks up
    # relu(bn1 bias)); zero only at the image borders — no full-scratch memset.
    @pl.when(r == 0)
    def _top():
        h1s_ref[0:Wp, :] = jnp.zeros((Wp, wd), cdt)

    @pl.when(r == n_r - 1)
    def _bottom():
        h1s_ref[(TH + 1) * Wp:(TH + 2) * Wp, :] = jnp.zeros((Wp, wd), cdt)

    # ---- conv2 (3x3, stride 1, pad 1) + bn2 + relu ----------------------------
    # One matmul per ky (the three kx taps are concatenated along N in w2);
    # the +-1 column shifts are applied to the f32 partial sums with XLU rolls.
    # Row-boundary wrap values land either in zero pad columns (-> contribute 0)
    # or in discarded pad output columns, so no masking is needed here.
    acc = [None, None, None]
    for ky in range(3):
        lhs = h1s_ref[ky * Wp:ky * Wp + THWp, :]          # aligned ref slice
        p = jnp.dot(lhs, w2_ref[ky], preferred_element_type=jnp.float32)
        for kx in range(3):
            pk = p[:, kx * wd2:(kx + 1) * wd2]
            acc[kx] = pk if acc[kx] is None else acc[kx] + pk
    h2 = (pltpu.roll(acc[0], 1, axis=0)                   # left-neighbor tap
          + acc[1]
          + pltpu.roll(acc[2], THWp - 1, axis=0))         # right-neighbor (== -1)
    h2 = jnp.maximum(h2 + b2_ref[...], 0.0).astype(cdt)

    # ---- conv3 (1x1) + bn3 + residual add + relu ------------------------------
    h3 = jnp.dot(h2, w3_ref[...], preferred_element_type=jnp.float32) + b3_ref[...]
    ident = x_ref[pl.ds(pl.multiple_of((row0 + 1) * Wp, Wp), THWp), :]
    out = jnp.maximum(h3 + ident.astype(jnp.float32), 0.0)
    o_ref[...] = out[:, :cout].astype(o_ref.dtype)


def _round_up(x, m):
    return (x + m - 1) // m * m


def _vmem_limit_bytes():
    """Generation-aware VMEM limit: ~75% of per-core VMEM, capped at 100 MiB.
    v7x (64 MiB) -> 48 MiB; v5e/v6e (128 MiB) -> 96 MiB; unknown -> 48 MiB."""
    cap = None
    try:
        cap = getattr(pltpu.get_tpu_info(), "vmem_capacity_bytes", None)
    except Exception:
        cap = None
    if not cap:
        cap = 64 * 1024 * 1024
    return int(min(cap * 3 // 4, 100 * 1024 * 1024))


def _pick_block_rows(H, Wp, N, cin_p, wd_p, wd2_p, cout, x_isz, out_isz,
                     comp_isz, budget):
    """Largest divisor of H whose working set fits `budget`, preferring tile
    counts that keep >= 2 total grid steps (so a v7x megacore pair can split)."""
    fixed = 2 * (H + 2) * Wp * cin_p * x_isz                       # resident x (x2 buffers)
    fixed += 2 * comp_isz * (cin_p * wd_p + 9 * wd_p * wd2_p + wd2_p * cin_p)
    cmax = max(cin_p, wd_p, wd2_p)
    feasible = []
    for th in range(1, H + 1):
        if H % th:
            continue
        per = (th + 2) * Wp * wd_p * comp_isz                      # conv1 scratch
        per += 2 * th * Wp * cout * out_isz                        # out block (x2)
        per += (th + 2) * Wp * cmax * 4                            # conv1 f32 result
        per += 6 * th * Wp * cmax * 4                              # accs / h2 / h3 / identity
        if fixed + per <= budget:
            feasible.append(th)
    if not feasible:
        return 1
    pref = [th for th in feasible if N * (H // th) >= 2]
    return max(pref) if pref else max(feasible)


def bottleneck_pf_pallas_nhwc(x, params, *, block_rows=None,
                              compute_dtype=jnp.bfloat16, out_dtype=None):
    """x: (N, H, W, Cin) NHWC.  Returns (N, H, W, Cout) in out_dtype (default
    x.dtype).  params = (w1, s1, b1, w2, s2, b2, w3, s3, b3) with BN folded to
    per-channel scale/bias (inference mode)."""
    (w1, s1, b1, w2, s2, b2, w3, s3, b3) = params
    N, H, W, Cin = x.shape
    width, width2, Cout = w1.shape[1], w2.shape[3], w3.shape[1]

    # stride=1 / downsample=None path only: identity add needs Cout == Cin.
    assert Cout == Cin, "BottleneckPf Pallas kernel: downsample path not implemented"
    assert w1.shape == (Cin, width)
    assert w2.shape == (3, 3, width, width2)
    assert w3.shape == (width2, Cout)
    out_dtype = x.dtype if out_dtype is None else out_dtype

    LANE = 128
    cin_p = _round_up(Cin, LANE)
    wd_p = _round_up(width, LANE)
    wd2_p = _round_up(width2, LANE)
    cout_p = _round_up(Cout, LANE)              # == cin_p because Cout == Cin

    comp_isz = jnp.dtype(compute_dtype).itemsize
    assert comp_isz in (2, 4), "compute_dtype must be bf16/f16 or f32"
    col_align = 8 if comp_isz == 4 else 16      # keep sublane slices aligned
    Wp = _round_up(W + 1, col_align)            # >= 1 zero pad column on the right
    Hp = H + 2                                  # one zero pad row top & bottom

    f32 = jnp.float32
    # Fold BN scales into the conv weights (exact in f32); keep bias adds only.
    w1f = jnp.asarray(w1, f32) * jnp.asarray(s1, f32)[None, :]
    w2f = jnp.asarray(w2, f32) * jnp.asarray(s2, f32)[None, None, None, :]
    w3f = jnp.asarray(w3, f32) * jnp.asarray(s3, f32)[None, :]
    w1p = jnp.pad(w1f, ((0, cin_p - Cin), (0, wd_p - width))).astype(compute_dtype)
    w3p = jnp.pad(w3f, ((0, wd2_p - width2), (0, cout_p - Cout))).astype(compute_dtype)
    w2p = jnp.pad(w2f, ((0, 0), (0, 0), (0, wd_p - width),
                        (0, wd2_p - width2))).astype(compute_dtype)
    # Concatenate the three kx taps along the output axis -> one dot per ky.
    w2c = jnp.concatenate([w2p[:, 0], w2p[:, 1], w2p[:, 2]], axis=-1)

    def vec2d(v, c, cp):
        return jnp.pad(jnp.asarray(v, f32).reshape(1, c), ((0, 0), (0, cp - c)))

    b1p = vec2d(b1, width, wd_p)
    b2p = vec2d(b2, width2, wd2_p)
    b3p = vec2d(b3, Cout, cout_p)

    # x keeps its original dtype so the residual add is not pre-quantized; the
    # MXU cast happens in-kernel.  One zero row above/below + zero pad columns.
    xp = jnp.pad(x, ((0, 0), (1, 1), (0, Wp - W), (0, cin_p - Cin)))
    xp = xp.reshape(N, Hp * Wp, cin_p)
    x_isz = xp.dtype.itemsize
    out_isz = jnp.dtype(out_dtype).itemsize

    vmem_limit = _vmem_limit_bytes()
    if block_rows is None:
        block_rows = _pick_block_rows(H, Wp, N, cin_p, wd_p, wd2_p, Cout,
                                      x_isz, out_isz, comp_isz,
                                      budget=int(vmem_limit * 0.7))
    TH = block_rows
    # TODO(synk): H not divisible by block_rows would need a ragged last tile.
    assert 1 <= TH <= H and H % TH == 0
    n_r = H // TH
    THWp = TH * Wp

    # Column-validity mask (1 for real columns, 0 for pad columns); identical
    # for every row tile so it is built once in the wrapper, not per tile.
    colmask = ((jnp.arange((TH + 2) * Wp) % Wp) < W).astype(compute_dtype)
    colmask = colmask.reshape((TH + 2) * Wp, 1)

    # Advisory cost estimate with UNpadded (real) work.
    flops = 2 * N * H * W * (Cin * width + 9 * width * width2 + width2 * Cout)
    bytes_accessed = (x.size * x.dtype.itemsize
                      + (w1.size + w2.size + w3.size) * comp_isz
                      + N * H * W * Cout * out_isz)

    kernel = functools.partial(_bottleneck_kernel, W, Wp, TH)
    out = pl.pallas_call(
        kernel,
        out_shape=jax.ShapeDtypeStruct((N, H * Wp, Cout), out_dtype),
        grid_spec=pltpu.PrefetchScalarGridSpec(
            num_scalar_prefetch=0,
            grid=(N, n_r),
            in_specs=[
                # Whole padded image for one batch element, resident across the
                # row tiles (constant block index along r).
                pl.BlockSpec((None, Hp * Wp, cin_p), lambda n, r: (n, 0, 0)),
                pl.BlockSpec(((TH + 2) * Wp, 1), lambda n, r: (0, 0)),
                pl.BlockSpec((cin_p, wd_p), lambda n, r: (0, 0)),
                pl.BlockSpec((1, wd_p), lambda n, r: (0, 0)),
                pl.BlockSpec((3, wd_p, 3 * wd2_p), lambda n, r: (0, 0, 0)),
                pl.BlockSpec((1, wd2_p), lambda n, r: (0, 0)),
                pl.BlockSpec((wd2_p, cout_p), lambda n, r: (0, 0)),
                pl.BlockSpec((1, cout_p), lambda n, r: (0, 0)),
            ],
            out_specs=pl.BlockSpec((None, THWp, Cout), lambda n, r: (n, r, 0)),
            scratch_shapes=[pltpu.VMEM(((TH + 2) * Wp, wd_p), compute_dtype)],
        ),
        compiler_params=pltpu.CompilerParams(
            dimension_semantics=("parallel", "parallel"),
            vmem_limit_bytes=vmem_limit,
        ),
        cost_estimate=pl.CostEstimate(flops=int(flops), transcendentals=0,
                                      bytes_accessed=int(bytes_accessed)),
    )(xp, colmask, w1p, b1p, w2c, b2p, w3p, b3p)

    out = out.reshape(N, H, Wp, Cout)[:, :, :W, :]
    return out


def bottleneck_pf_pallas(x_nchw, params, *, block_rows=None,
                         compute_dtype=jnp.bfloat16, out_dtype=None):
    """PyTorch-layout entry point: x (N, Cin, H, W) -> (N, Cout, H, W).
    The NCHW<->NHWC transposes cost one extra HBM pass each; prefer *_nhwc when
    the surrounding model is already channels-last."""
    x = jnp.transpose(x_nchw, (0, 2, 3, 1))
    y = bottleneck_pf_pallas_nhwc(x, params, block_rows=block_rows,
                                  compute_dtype=compute_dtype,
                                  out_dtype=out_dtype)
    return jnp.transpose(y, (0, 3, 1, 2))


# ---------------------------------------------------------------------------
# Deterministic parameter construction (BottleneckPf.__init__, cfg=None path):
#   conv1: 1x1 (inplanes -> width),  bn1
#   conv2: 3x3 (width -> width, stride=1, pad=1), bn2
#   conv3: 1x1 (width -> planes*4), bn3
# BN folded to scale = gamma / sqrt(var + eps), bias = beta - mean * scale.
# Conv weights are stored pre-transposed for the NHWC matmuls:
#   w1 (Cin, width), w2 HWIO (3,3,width,width), w3 (width, Cout).
# ---------------------------------------------------------------------------
def make_params(key, inplanes, planes, base_width=64, groups=1):
    width = int(planes * (base_width / 64.0)) * groups
    cout = planes * 4
    eps = 1e-5
    ks = jax.random.split(key, 6)

    def bn_fold(k, c):
        kg, kb, km, kv = jax.random.split(k, 4)
        gamma = 1.0 + 0.1 * jax.random.normal(kg, (c,), jnp.float32)
        beta = 0.1 * jax.random.normal(kb, (c,), jnp.float32)
        mean = 0.1 * jax.random.normal(km, (c,), jnp.float32)
        var = jnp.abs(jax.random.normal(kv, (c,), jnp.float32)) + 0.5
        scale = gamma / jnp.sqrt(var + eps)
        bias = beta - mean * scale
        return scale, bias

    w1 = 0.2 * jax.random.normal(ks[0], (inplanes, width), jnp.float32)
    w2 = 0.2 * jax.random.normal(ks[1], (3, 3, width, width), jnp.float32)
    w3 = 0.2 * jax.random.normal(ks[2], (width, cout), jnp.float32)
    s1, b1 = bn_fold(ks[3], width)
    s2, b2 = bn_fold(ks[4], width)
    s3, b3 = bn_fold(ks[5], cout)
    return (w1, s1, b1, w2, s2, b2, w3, s3, b3)


def reference_forward(x_nchw, params):
    """Pure-JAX f32 reference (lax convs, NHWC) for numerical validation."""
    (w1, s1, b1, w2, s2, b2, w3, s3, b3) = params
    x = jnp.transpose(x_nchw, (0, 2, 3, 1))
    dn = ('NHWC', 'HWIO', 'NHWC')

    def conv(h, w, pad):
        return lax.conv_general_dilated(h, w, window_strides=(1, 1),
                                        padding=pad, dimension_numbers=dn)

    h = conv(x, w1.reshape(1, 1, *w1.shape), 'VALID')
    h = jnp.maximum(h * s1 + b1, 0.0)
    h = conv(h, w2, [(1, 1), (1, 1)])
    h = jnp.maximum(h * s2 + b2, 0.0)
    h = conv(h, w3.reshape(1, 1, *w3.shape), 'VALID')
    h = h * s3 + b3
    out = jnp.maximum(h + x, 0.0)
    return jnp.transpose(out, (0, 3, 1, 2))


if __name__ == "__main__":
    key = jax.random.PRNGKey(0)
    kx_, kp_ = jax.random.split(key)

    # Small shapes: inplanes = planes * expansion so the identity add needs no
    # downsample (downsample=None, stride=1 path of the module).
    N, planes, H, W = 2, 4, 16, 16
    inplanes = planes * 4                         # 16
    x = jax.random.normal(kx_, (N, inplanes, H, W), jnp.float32)
    params = make_params(kp_, inplanes, planes)

    # block_rows=8 -> 2 row tiles per image: exercises the halo / roll handling.
    run_bf16 = jax.jit(functools.partial(bottleneck_pf_pallas, block_rows=8))
    run_f32 = jax.jit(functools.partial(bottleneck_pf_pallas, block_rows=8,
                                        compute_dtype=jnp.float32))

    out_bf16 = jax.block_until_ready(run_bf16(x, params))
    out_f32 = jax.block_until_ready(run_f32(x, params))

    ref = reference_forward(x, params)
    assert out_bf16.shape == (N, planes * 4, H, W)
    assert jnp.allclose(out_f32, ref, atol=1e-3, rtol=1e-3), \
        f"f32 mismatch vs reference: {jnp.max(jnp.abs(out_f32 - ref))}"
    assert jnp.allclose(out_bf16, ref, atol=5e-2, rtol=5e-2), \
        f"bf16 mismatch vs reference: {jnp.max(jnp.abs(out_bf16 - ref))}"

    print("KERNEL_OK")
</pallas_src>

<mosaic_0001>
module attributes {stable_mosaic.version = 11 : i64} {
  func.func @_bottleneck_kernel(%arg0: i32, %arg1: i32, %arg2: memref<1x576x128xf32, #tpu.memory_space<vmem>>, %arg3: memref<320x1xbf16, #tpu.memory_space<vmem>>, %arg4: memref<128x128xbf16, #tpu.memory_space<vmem>>, %arg5: memref<1x128xf32, #tpu.memory_space<vmem>>, %arg6: memref<3x128x384xbf16, #tpu.memory_space<vmem>>, %arg7: memref<1x128xf32, #tpu.memory_space<vmem>>, %arg8: memref<128x128xbf16, #tpu.memory_space<vmem>>, %arg9: memref<1x128xf32, #tpu.memory_space<vmem>>, %arg10: memref<1x256x16xf32, #tpu.memory_space<vmem>>, %arg11: memref<320x128xbf16, #tpu.memory_space<vmem>>) attributes {dimension_semantics = [#tpu.dimension_semantics<parallel>, #tpu.dimension_semantics<parallel>], iteration_bounds = array<i64: 2, 2>, scalar_prefetch = 0 : i64, scratch_operands = 1 : i64, tpu.core_type = #tpu.core_type<tc>, window_params = [{transform_indices = @transform_0, window_bounds = array<i64: 1, 576, 128>}, {pipeline_mode = #tpu.pipeline_mode<synchronous>, transform_indices = @transform_1, window_bounds = array<i64: 320, 1>}, {pipeline_mode = #tpu.pipeline_mode<synchronous>, transform_indices = @transform_2, window_bounds = array<i64: 128, 128>}, {pipeline_mode = #tpu.pipeline_mode<synchronous>, transform_indices = @transform_3, window_bounds = array<i64: 1, 128>}, {pipeline_mode = #tpu.pipeline_mode<synchronous>, transform_indices = @transform_4, window_bounds = array<i64: 3, 128, 384>}, {pipeline_mode = #tpu.pipeline_mode<synchronous>, transform_indices = @transform_5, window_bounds = array<i64: 1, 128>}, {pipeline_mode = #tpu.pipeline_mode<synchronous>, transform_indices = @transform_6, window_bounds = array<i64: 128, 128>}, {pipeline_mode = #tpu.pipeline_mode<synchronous>, transform_indices = @transform_7, window_bounds = array<i64: 1, 128>}, {transform_indices = @transform_8, window_bounds = array<i64: 1, 256, 16>}]} {
    %c8_i32 = arith.constant 8 : i32
    %0 = arith.muli %arg1, %c8_i32 : i32
    %c32_i32 = arith.constant 32 : i32
    %1 = arith.muli %0, %c32_i32 : i32
    %2 = tpu.assume_multiple %1, 32 : i32
    %c0 = arith.constant 0 : index
    %3 = arith.index_cast %2 : i32 to index
    %c0_0 = arith.constant 0 : index
    %4 = vector.load %arg2[%c0, %3, %c0_0] : memref<1x576x128xf32, #tpu.memory_space<vmem>>, vector<1x320x128xf32>
    %5 = vector.shape_cast %4 : vector<1x320x128xf32> to vector<320x128xf32>
    %6 = arith.truncf %5 : vector<320x128xf32> to vector<320x128xbf16>
    %c0_1 = arith.constant 0 : index
    %c0_2 = arith.constant 0 : index
    %7 = vector.load %arg4[%c0_1, %c0_2] : memref<128x128xbf16, #tpu.memory_space<vmem>>, vector<128x128xbf16>
    %cst = arith.constant dense<0.000000e+00> : vector<320x128xf32>
    %8 = tpu.matmul %6, %7, %cst {dimension_numbers = #tpu.dot_dimension_numbers<[1], [0], [0], [1], [0, 0, 1, 1], [], []>} : vector<320x128xbf16>, vector<128x128xbf16>, vector<320x128xf32> -> vector<320x128xf32>
    %c0_3 = arith.constant 0 : index
    %c0_4 = arith.constant 0 : index
    %9 = vector.load %arg5[%c0_3, %c0_4] : memref<1x128xf32, #tpu.memory_space<vmem>>, vector<1x128xf32>
    %10 = vector.broadcast %9 : vector<1x128xf32> to vector<320x128xf32>
    %11 = arith.addf %8, %10 : vector<320x128xf32>
    %cst_5 = arith.constant 0.000000e+00 : f32
    %12 = vector.broadcast %cst_5 : f32 to vector<320x128xf32>
    %13 = arith.maximumf %11, %12 : vector<320x128xf32>
    %14 = arith.truncf %13 : vector<320x128xf32> to vector<320x128xbf16>
    %c0_6 = arith.constant 0 : index
    %c0_7 = arith.constant 0 : index
    %15 = vector.load %arg3[%c0_6, %c0_7] : memref<320x1xbf16, #tpu.memory_space<vmem>>, vector<320x1xbf16>
    %16 = vector.broadcast %15 : vector<320x1xbf16> to vector<320x128xbf16>
    %17 = arith.mulf %14, %16 : vector<320x128xbf16>
    %c0_8 = arith.constant 0 : index
    %c0_9 = arith.constant 0 : index
    %18 = vector.load %arg11[%c0_8, %c0_9] : memref<320x128xbf16, #tpu.memory_space<vmem>>, vector<320x128xbf16>
    tpu.vector_store %arg11[%c0_8, %c0_9], %17 {strides = array<i32>} : memref<320x128xbf16, #tpu.memory_space<vmem>>, vector<320x128xbf16>,
    %c0_i32 = arith.constant 0 : i32
    %19 = arith.cmpi eq, %arg1, %c0_i32 : i32
    %20 = arith.extui %19 : i1 to i32
    %c0_i32_10 = arith.constant 0 : i32
    %21 = arith.cmpi ne, %20, %c0_i32_10 : i32
    scf.if %21 {
      %cst_43 = arith.constant 0.000000e+00 : bf16
      %80 = vector.broadcast %cst_43 : bf16 to vector<32x128xbf16>
      %c0_44 = arith.constant 0 : index
      %c0_45 = arith.constant 0 : index
      %81 = vector.load %arg11[%c0_44, %c0_45] : memref<320x128xbf16, #tpu.memory_space<vmem>>, vector<32x128xbf16>
      tpu.vector_store %arg11[%c0_44, %c0_45], %80 {strides = array<i32>} : memref<320x128xbf16, #tpu.memory_space<vmem>>, vector<32x128xbf16>,
    } else {
    }
    %c1_i32 = arith.constant 1 : i32
    %22 = arith.cmpi eq, %arg1, %c1_i32 : i32
    %23 = arith.extui %22 : i1 to i32
    %c0_i32_11 = arith.constant 0 : i32
    %24 = arith.cmpi ne, %23, %c0_i32_11 : i32
    scf.if %24 {
      %cst_43 = arith.constant 0.000000e+00 : bf16
      %80 = vector.broadcast %cst_43 : bf16 to vector<32x128xbf16>
      %c288 = arith.constant 288 : index
      %c0_44 = arith.constant 0 : index
      %81 = vector.load %arg11[%c288, %c0_44] : memref<320x128xbf16, #tpu.memory_space<vmem>>, vector<32x128xbf16>
      tpu.vector_store %arg11[%c288, %c0_44], %80 {strides = array<i32>} : memref<320x128xbf16, #tpu.memory_space<vmem>>, vector<32x128xbf16>,
    } else {
    }
    %c0_12 = arith.constant 0 : index
    %c0_13 = arith.constant 0 : index
    %25 = vector.load %arg11[%c0_12, %c0_13] : memref<320x128xbf16, #tpu.memory_space<vmem>>, vector<256x128xbf16>
    %c0_14 = arith.constant 0 : index
    %c0_15 = arith.constant 0 : index
    %c0_16 = arith.constant 0 : index
    %26 = vector.load %arg6[%c0_14, %c0_15, %c0_16] : memref<3x128x384xbf16, #tpu.memory_space<vmem>>, vector<1x128x384xbf16>
    %27 = vector.shape_cast %26 : vector<1x128x384xbf16> to vector<128x384xbf16>
    %cst_17 = arith.constant dense<0.000000e+00> : vector<256x384xf32>
    %28 = tpu.matmul %25, %27, %cst_17 {dimension_numbers = #tpu.dot_dimension_numbers<[1], [0], [0], [1], [0, 0, 1, 1], [], []>} : vector<256x128xbf16>, vector<128x384xbf16>, vector<256x384xf32> -> vector<256x384xf32>
    %29 = vector.extract_strided_slice %28 {offsets = [0, 0], sizes = [256, 128], strides = [1, 1]} : vector<256x384xf32> to vector<256x128xf32>
    %30 = vector.extract_strided_slice %28 {offsets = [0, 128], sizes = [256, 128], strides = [1, 1]} : vector<256x384xf32> to vector<256x128xf32>
    %31 = vector.extract_strided_slice %28 {offsets = [0, 256], sizes = [256, 128], strides = [1, 1]} : vector<256x384xf32> to vector<256x128xf32>
    %c32 = arith.constant 32 : index
    %c0_18 = arith.constant 0 : index
    %32 = vector.load %arg11[%c32, %c0_18] : memref<320x128xbf16, #tpu.memory_space<vmem>>, vector<256x128xbf16>
    %c1 = arith.constant 1 : index
    %c0_19 = arith.constant 0 : index
    %c0_20 = arith.constant 0 : index
    %33 = vector.load %arg6[%c1, %c0_19, %c0_20] : memref<3x128x384xbf16, #tpu.memory_space<vmem>>, vector<1x128x384xbf16>
    %34 = vector.shape_cast %33 : vector<1x128x384xbf16> to vector<128x384xbf16>
    %cst_21 = arith.constant dense<0.000000e+00> : vector<256x384xf32>
    %35 = tpu.matmul %32, %34, %cst_21 {dimension_numbers = #tpu.dot_dimension_numbers<[1], [0], [0], [1], [0, 0, 1, 1], [], []>} : vector<256x128xbf16>, vector<128x384xbf16>, vector<256x384xf32> -> vector<256x384xf32>
    %36 = vector.extract_strided_slice %35 {offsets = [0, 0], sizes = [256, 128], strides = [1, 1]} : vector<256x384xf32> to vector<256x128xf32>
    %37 = arith.addf %29, %36 : vector<256x128xf32>
    %38 = vector.extract_strided_slice %35 {offsets = [0, 128], sizes = [256, 128], strides = [1, 1]} : vector<256x384xf32> to vector<256x128xf32>
    %39 = arith.addf %30, %38 : vector<256x128xf32>
    %40 = vector.extract_strided_slice %35 {offsets = [0, 256], sizes = [256, 128], strides = [1, 1]} : vector<256x384xf32> to vector<256x128xf32>
    %41 = arith.addf %31, %40 : vector<256x128xf32>
    %c64 = arith.constant 64 : index
    %c0_22 = arith.constant 0 : index
    %42 = vector.load %arg11[%c64, %c0_22] : memref<320x128xbf16, #tpu.memory_space<vmem>>, vector<256x128xbf16>
    %c2 = arith.constant 2 : index
    %c0_23 = arith.constant 0 : index
    %c0_24 = arith.constant 0 : index
    %43 = vector.load %arg6[%c2, %c0_23, %c0_24] : memref<3x128x384xbf16, #tpu.memory_space<vmem>>, vector<1x128x384xbf16>
    %44 = vector.shape_cast %43 : vector<1x128x384xbf16> to vector<128x384xbf16>
    %cst_25 = arith.constant dense<0.000000e+00> : vector<256x384xf32>
    %45 = tpu.matmul %42, %44, %cst_25 {dimension_numbers = #tpu.dot_dimension_numbers<[1], [0], [0], [1], [0, 0, 1, 1], [], []>} : vector<256x128xbf16>, vector<128x384xbf16>, vector<256x384xf32> -> vector<256x384xf32>
    %46 = vector.extract_strided_slice %45 {offsets = [0, 0], sizes = [256, 128], strides = [1, 1]} : vector<256x384xf32> to vector<256x128xf32>
    %47 = arith.addf %37, %46 : vector<256x128xf32>
    %48 = vector.extract_strided_slice %45 {offsets = [0, 128], sizes = [256, 128], strides = [1, 1]} : vector<256x384xf32> to vector<256x128xf32>
    %49 = arith.addf %39, %48 : vector<256x128xf32>
    %50 = vector.extract_strided_slice %45 {offsets = [0, 256], sizes = [256, 128], strides = [1, 1]} : vector<256x384xf32> to vector<256x128xf32>
    %51 = arith.addf %41, %50 : vector<256x128xf32>
    %c1_i32_26 = arith.constant 1 : i32
    %52 = tpu.dynamic_rotate %47 by %c1_i32_26 dim 0 : vector<256x128xf32>, i32 -> vector<256x128xf32>
    %53 = arith.addf %52, %49 : vector<256x128xf32>
    %c255_i32 = arith.constant 255 : i32
    %54 = tpu.dynamic_rotate %51 by %c255_i32 dim 0 : vector<256x128xf32>, i32 -> vector<256x128xf32>
    %55 = arith.addf %53, %54 : vector<256x128xf32>
    %c0_27 = arith.constant 0 : index
    %c0_28 = arith.constant 0 : index
    %56 = vector.load %arg7[%c0_27, %c0_28] : memref<1x128xf32, #tpu.memory_space<vmem>>, vector<1x128xf32>
    %57 = vector.broadcast %56 : vector<1x128xf32> to vector<256x128xf32>
    %58 = arith.addf %55, %57 : vector<256x128xf32>
    %cst_29 = arith.constant 0.000000e+00 : f32
    %59 = vector.broadcast %cst_29 : f32 to vector<256x128xf32>
    %60 = arith.maximumf %58, %59 : vector<256x128xf32>
    %61 = arith.truncf %60 : vector<256x128xf32> to vector<256x128xbf16>
    %c0_30 = arith.constant 0 : index
    %c0_31 = arith.constant 0 : index
    %62 = vector.load %arg8[%c0_30, %c0_31] : memref<128x128xbf16, #tpu.memory_space<vmem>>, vector<128x128xbf16>
    %cst_32 = arith.constant dense<0.000000e+00> : vector<256x128xf32>
    %63 = tpu.matmul %61, %62, %cst_32 {dimension_numbers = #tpu.dot_dimension_numbers<[1], [0], [0], [1], [0, 0, 1, 1], [], []>} : vector<256x128xbf16>, vector<128x128xbf16>, vector<256x128xf32> -> vector<256x128xf32>
    %c0_33 = arith.constant 0 : index
    %c0_34 = arith.constant 0 : index
    %64 = vector.load %arg9[%c0_33, %c0_34] : memref<1x128xf32, #tpu.memory_space<vmem>>, vector<1x128xf32>
    %65 = vector.broadcast %64 : vector<1x128xf32> to vector<256x128xf32>
    %66 = arith.addf %63, %65 : vector<256x128xf32>
    %c1_i32_35 = arith.constant 1 : i32
    %67 = arith.addi %0, %c1_i32_35 : i32
    %c32_i32_36 = arith.constant 32 : i32
    %68 = arith.muli %67, %c32_i32_36 : i32
    %69 = tpu.assume_multiple %68, 32 : i32
    %c0_37 = arith.constant 0 : index
    %70 = arith.index_cast %69 : i32 to index
    %c0_38 = arith.constant 0 : index
    %71 = vector.load %arg2[%c0_37, %70, %c0_38] : memref<1x576x128xf32, #tpu.memory_space<vmem>>, vector<1x256x128xf32>
    %72 = vector.shape_cast %71 : vector<1x256x128xf32> to vector<256x128xf32>
    %73 = arith.addf %66, %72 : vector<256x128xf32>
    %cst_39 = arith.constant 0.000000e+00 : f32
    %74 = vector.broadcast %cst_39 : f32 to vector<256x128xf32>
    %75 = arith.maximumf %73, %74 : vector<256x128xf32>
    %76 = vector.extract_strided_slice %75 {offsets = [0, 0], sizes = [256, 16], strides = [1, 1]} : vector<256x128xf32> to vector<256x16xf32>
    %c0_40 = arith.constant 0 : index
    %c0_41 = arith.constant 0 : index
    %c0_42 = arith.constant 0 : index
    %77 = vector.load %arg10[%c0_40, %c0_41, %c0_42] : memref<1x256x16xf32, #tpu.memory_space<vmem>>, vector<1x256x16xf32>
    %78 = vector.shape_cast %77 : vector<1x256x16xf32> to vector<256x16xf32>
    %79 = vector.shape_cast %76 : vector<256x16xf32> to vector<1x256x16xf32>
    tpu.vector_store %arg10[%c0_40, %c0_41, %c0_42], %79 {strides = array<i32>} : memref<1x256x16xf32, #tpu.memory_space<vmem>>, vector<1x256x16xf32>,
    return
  }
  func.func @transform_0(%arg0: i32, %arg1: i32) -> (i32, i32, i32) {
    %c0_i32 = arith.constant 0 : i32
    %c0_i32_0 = arith.constant 0 : i32
    %c0_i32_1 = arith.constant 0 : i32
    return %arg0, %c0_i32, %c0_i32_0 : i32, i32, i32
  }
  func.func @transform_1(%arg0: i32, %arg1: i32) -> (i32, i32) {
    %c0_i32 = arith.constant 0 : i32
    %c0_i32_0 = arith.constant 0 : i32
    %c0_i32_1 = arith.constant 0 : i32
    return %c0_i32, %c0_i32_0 : i32, i32
  }
  func.func @transform_2(%arg0: i32, %arg1: i32) -> (i32, i32) {
    %c0_i32 = arith.constant 0 : i32
    %c0_i32_0 = arith.constant 0 : i32
    %c0_i32_1 = arith.constant 0 : i32
    return %c0_i32, %c0_i32_0 : i32, i32
  }
  func.func @transform_3(%arg0: i32, %arg1: i32) -> (i32, i32) {
    %c0_i32 = arith.constant 0 : i32
    %c0_i32_0 = arith.constant 0 : i32
    %c0_i32_1 = arith.constant 0 : i32
    return %c0_i32, %c0_i32_0 : i32, i32
  }
  func.func @transform_4(%arg0: i32, %arg1: i32) -> (i32, i32, i32) {
    %c0_i32 = arith.constant 0 : i32
    %c0_i32_0 = arith.constant 0 : i32
    %c0_i32_1 = arith.constant 0 : i32
    %c0_i32_2 = arith.constant 0 : i32
    return %c0_i32, %c0_i32_0, %c0_i32_1 : i32, i32, i32
  }
  func.func @transform_5(%arg0: i32, %arg1: i32) -> (i32, i32) {
    %c0_i32 = arith.constant 0 : i32
    %c0_i32_0 = arith.constant 0 : i32
    %c0_i32_1 = arith.constant 0 : i32
    return %c0_i32, %c0_i32_0 : i32, i32
  }
  func.func @transform_6(%arg0: i32, %arg1: i32) -> (i32, i32) {
    %c0_i32 = arith.constant 0 : i32
    %c0_i32_0 = arith.constant 0 : i32
    %c0_i32_1 = arith.constant 0 : i32
    return %c0_i32, %c0_i32_0 : i32, i32
  }
  func.func @transform_7(%arg0: i32, %arg1: i32) -> (i32, i32) {
    %c0_i32 = arith.constant 0 : i32
    %c0_i32_0 = arith.constant 0 : i32
    %c0_i32_1 = arith.constant 0 : i32
    return %c0_i32, %c0_i32_0 : i32, i32
  }
  func.func @transform_8(%arg0: i32, %arg1: i32) -> (i32, i32, i32) {
    %c0_i32 = arith.constant 0 : i32
    %c0_i32_0 = arith.constant 0 : i32
    return %arg0, %arg1, %c0_i32 : i32, i32, i32
  }
}

</mosaic_0001>

<bundles_post_ra>
// kernel: bottleneck_pf_pallas.1
= control target key start
LH: loop header
LB: loop body
LE: loop exit
PB: predicated region body
PF: predicated region fallthrough
CT: control target
= control target key end

     0   :  { %s5426_s27 = smov 0   ;;  %s5428_s28 = smov 0   ;;  %s7172_s0 = inlined_call_operand.vmem [shape: f32[2,576,128], index: 0, kind: input, shape index: {}]   ;;  %s7173_s1 = inlined_call_operand.vmem [shape: bf16[320,1], index: 1, kind: input, shape index: {}]   ;;  %s7174_s2 = inlined_call_operand.vmem [shape: bf16[128,128], index: 2, kind: input, shape index: {}]   ;;  %s7175_s3 = inlined_call_operand.vmem [shape: f32[1,128], index: 3, kind: input, shape index: {}]   ;;  %s7176_s4 = inlined_call_operand.vmem [shape: bf16[3,128,384], index: 4, kind: input, shape index: {}]   ;;  %s7177_s5 = inlined_call_operand.vmem [shape: f32[1,128], index: 5, kind: input, shape index: {}]   ;;  %s7178_s6 = inlined_call_operand.vmem [shape: bf16[128,128], index: 6, kind: input, shape index: {}]   ;;  %s7179_s7 = inlined_call_operand.vmem [shape: f32[1,128], index: 7, kind: input, shape index: {}]   ;;  %s7180_s8 = inlined_call_operand.vmem [shape: f32[2,512,16], index: 8, kind: output, shape index: {}]  }
   0x1   :  { %s5430_s29 = smov 0   ;;  %s5432_s30 = smov 0  }
   0x2   :  { %s5434_s9 = smov 0  }
   0x3 LB: > { %s27_s10 = sadd.s32 1, %s5367_s29  ;;  %s30_s11 = sadd.s32 1, %s5371_s30  ;;  %s5375_s9 = sphi %s5434_s9, %s18_s9   ;;  %s5371_s30 = sphi %s5432_s30, %s7311_s30   ;;  %s5367_s29 = sphi %s5430_s29, %s7310_s29   ;;  %s5363_s28 = sphi %s5428_s28, %s7309_s28   ;;  %s5359_s27 = sphi %s5426_s27, %s7308_s27  }
   0x4   : > { %p28_p0 = scmp.ge.s32.totalorder %s27_s10, 2  ;;  %p4434_p1 = scmp.ge.s32.totalorder %s5375_s9, 1 }
   0x5   : > { %p276_p2 = scmp.lt.s32.totalorder %s5375_s9, 5 }
   0x6   : > { %s7313_s10 = smov (%p28_p0, %s27_s10), 0  ;;  %s7315_s11 = smov (!%p28_p0, %s30_s11), %s5371_s30 }
   0x7   : > { %p277_p3 = pnand %p4434_p1, %p276_p2  ;;  %p32_p4 = scmp.ge.s32.totalorder %s7315_s11, 2 }
   0x9   : > { %s7317_s11 = smov (%p32_p4, %s7315_s11), 0  ;;  %280 = sbr.rel (%p277_p3) target bundleno = 1121 (0x461), region = 52 }
   0xe   : > { %v5177_v0 = vld [vmem:[%s7174_s2 + $0x38] sm:$0xff]   ;;  %v5178_v1 = vld [vmem:[%s7174_s2 + $0x30] sm:$0xff]   ;;  %v5377_v2 = vmov 0   ;;  %p314_p5 = scmp.lt.s32.totalorder %s5363_s28, 1  ;;  %s4436_s16 = sshll.u32 %s5359_s27, 5  ;;  %v5179_v3 = vld [vmem:[%s7174_s2 + $0x28] sm:$0xff]  }
   0xf   : > { %5176 = vset.pattern.permute.xlu1 %v5377_v2  ;;  %5175 = vset.pattern.permute.xlu0 %v5377_v2  ;;  %p322_p6 = scmp.lt.s32.totalorder %s4436_s16, 63  ;;  %v5180_v4 = vld [vmem:[%s7174_s2 + $0x20] sm:$0xff]   ;;  %v719_v5 = vld [vmem:[%s7173_s1 + $0x8] sm:$0xf]  ;;  %s4439_s17 = sshll.u32 %s5359_s27, 8  ;;  %v5181_v12 = vld [vmem:[%s7174_s2 + $0x18] sm:$0xff]  }
  0x10   : > { %4866 = vmatprep.subr.bf16.mxu0 %v5177_v0  ;;  %s7319_s28 = smov (!%p314_p5, %s5363_s28), 1  ;;  %v717_v6 = vld [vmem:[%s7173_s1] sm:$0xf]  ;;  %783 = vperm.xlu1 %5176, %v719_v5   ;;  %v720_v9 = vld [vmem:[%s7173_s1 + $0xc] sm:$0xf]  ;;  %v5182_v15 = vld [vmem:[%s7174_s2 + $0x10] sm:$0xff]  }
  0x11   : > { %4867 = vmatpush3.bf16.msra.mxu0 %v5177_v0  ;;  %s5130_s19 = smul.u32 576, %s7319_s28  ;;  %s7321_s16 = smov (!%p322_p6, %s4436_s16), 63  ;;  %759 = vperm.xlu0 %5175, %v717_v6   ;;  %v718_v11 = vld [vmem:[%s7173_s1 + $0x4] sm:$0xf]  ;;  %v722_v13 = vld [vmem:[%s7173_s1 + $0x14] sm:$0xf] }
  0x12   : > { %4868 = vmatprep.subr.bf16.mxu0 %v5178_v1  ;;  %s4437_s23 = sshll.u32 %s7319_s28, 6  ;;  %v721_v14 = vld [vmem:[%s7173_s1 + $0x10] sm:$0xf]  ;;  %v724_v16 = vld [vmem:[%s7173_s1 + $0x1c] sm:$0xf]  ;;  %v5183_v18 = vld [vmem:[%s7174_s2 + $0x8] sm:$0xff]  }
  0x13   : > { %s318_s22 = scalar_lea.vmem %s7172_s0, %s5130_s19  ;;  %s325_s15 = sadd.s32 %s4437_s23, %s7321_s16  ;;  %v723_v17 = vld [vmem:[%s7173_s1 + $0x18] sm:$0xf]  ;;  %v726_v19 = vld [vmem:[%s7173_s1 + $0x24] sm:$0xf]  ;;  %v725_v20 = vld [vmem:[%s7173_s1 + $0x20] sm:$0xf] }
  0x14   : > { %s4438_s18 = sshll.u32 %s325_s15, 3  ;;  %s5483_s19 = scalar_lea.vmem %s318_s22, %s4439_s17  ;;  %795 = vperm.xlu1 %5176, %v720_v9   ;;  %v5184_v21 = vld [vmem:[%s7174_s2] sm:$0xff]   ;;  %v728_v22 = vld [vmem:[%s7173_s1 + $0x2c] sm:$0xf]  ;;  %v727_v25 = vld [vmem:[%s7173_s1 + $0x28] sm:$0xf] }
  0x15   : > { %4869 = vmatpush3.bf16.msra.mxu0 %v5178_v1  ;;  %s5488_s21 = scalar_lea.vmem %s7180_s8, %s4438_s18  ;;  %v333_v7 = vld [vmem:[%s5483_s19] sm:$0xff]  ;;  %v334_v8 = vld [vmem:[%s5483_s19 + $0x8] sm:$0xff]  ;;  %771 = vperm.xlu0 %5175, %v718_v11   ;;  %v335_v23 = vld [vmem:[%s5483_s19 + $0x10] sm:$0xff]  ;;  %p4509_p7 = scmp.ne.s32.totalorder %s5359_s27, 0 }
  0x16   : > { %4870 = vmatprep.subr.bf16.mxu0 %v5179_v3  ;;  %v373_v10 = vpack.c.bf16 %v334_v8, %v333_v7  ;;  %v336_v24 = vld [vmem:[%s5483_s19 + $0x18] sm:$0xff]  ;;  %v337_v26 = vld [vmem:[%s5483_s19 + $0x20] sm:$0xff]  ;;  %v338_v27 = vld [vmem:[%s5483_s19 + $0x28] sm:$0xff] }
  0x17   : > { %v374_v28 = vpack.c.bf16 %v336_v24, %v335_v23  ;;  %v730_v29 = vld [vmem:[%s7173_s1 + $0x34] sm:$0xf]  ;;  %v375_v30 = vpack.c.bf16 %v338_v27, %v337_v26  ;;  %v729_v31 = vld [vmem:[%s7173_s1 + $0x30] sm:$0xf]  ;;  %v732_v32 = vld [vmem:[%s7173_s1 + $0x3c] sm:$0xf] }
  0x18   : > { %4882 = vmatprep.mubr.bf16.mxu0 %v373_v10  ;;  %819 = vperm.xlu1 %5176, %v722_v13   ;;  %v339_v33 = vld [vmem:[%s5483_s19 + $0x30] sm:$0xff]  ;;  %v340_v34 = vld [vmem:[%s5483_s19 + $0x38] sm:$0xff]  ;;  %v341_v36 = vld [vmem:[%s5483_s19 + $0x40] sm:$0xff] }
  0x19   : > { %4871 = vmatpush3.bf16.msra.mxu0 %v5179_v3  ;;  %807 = vperm.xlu0 %5175, %v721_v14   ;;  %v731_v35 = vld [vmem:[%s7173_s1 + $0x38] sm:$0xf]  ;;  %v342_v37 = vld [vmem:[%s5483_s19 + $0x48] sm:$0xff]  ;;  %v376_v38 = vpack.c.bf16 %v340_v34, %v339_v33  ;;  %v734_v39 = vld [vmem:[%s7173_s1 + $0x44] sm:$0xf] }
  0x1a   : > { %4872 = vmatprep.subr.bf16.mxu0 %v5180_v4  ;;  %v377_v40 = vpack.c.bf16 %v342_v37, %v341_v36  ;;  %v733_v41 = vld [vmem:[%s7173_s1 + $0x40] sm:$0xf]  ;;  %v736_v42 = vld [vmem:[%s7173_s1 + $0x4c] sm:$0xf]  ;;  %v343_v43 = vld [vmem:[%s5483_s19 + $0x50] sm:$0xff] }
  0x1b   : > { %v344_v44 = vld [vmem:[%s5483_s19 + $0x58] sm:$0xff]  ;;  %v735_v45 = vld [vmem:[%s7173_s1 + $0x48] sm:$0xf]  ;;  %v345_v46 = vld [vmem:[%s5483_s19 + $0x60] sm:$0xff] }
  0x1c   : > { %843 = vperm.xlu1 %5176, %v724_v16   ;;  %v346_v47 = vld [vmem:[%s5483_s19 + $0x68] sm:$0xff]  ;;  %v378_v48 = vpack.c.bf16 %v344_v44, %v343_v43  ;;  %v738_v49 = vld [vmem:[%s7173_s1 + $0x54] sm:$0xf]  ;;  %v737_v51 = vld [vmem:[%s7173_s1 + $0x50] sm:$0xf] }
  0x1d   : > { %4873 = vmatpush3.bf16.msra.mxu0 %v5180_v4  ;;  %831 = vperm.xlu0 %5175, %v723_v17   ;;  %v379_v50 = vpack.c.bf16 %v346_v47, %v345_v46  ;;  %v740_v52 = vld [vmem:[%s7173_s1 + $0x5c] sm:$0xf]  ;;  %v347_v53 = vld [vmem:[%s5483_s19 + $0x70] sm:$0xff]  ;;  %v739_v55 = vld [vmem:[%s7173_s1 + $0x58] sm:$0xf] }
  0x1e   : > { %4874 = vmatprep.subr.bf16.mxu0 %v5181_v12  ;;  %v348_v54 = vld [vmem:[%s5483_s19 + $0x78] sm:$0xff]  ;;  %v349_v56 = vld [vmem:[%s5483_s19 + $0x80] sm:$0xff]  ;;  %v350_v57 = vld [vmem:[%s5483_s19 + $0x88] sm:$0xff] }
  0x1f   : > { %v380_v58 = vpack.c.bf16 %v348_v54, %v347_v53  ;;  %v742_v59 = vld [vmem:[%s7173_s1 + $0x64] sm:$0xf]  ;;  %v381_v60 = vpack.c.bf16 %v350_v57, %v349_v56  ;;  %v741_v61 = vld [vmem:[%s7173_s1 + $0x60] sm:$0xf]  ;;  %v744_v62 = vld [vmem:[%s7173_s1 + $0x6c] sm:$0xf] }
  0x20   : > { %867 = vperm.xlu1 %5176, %v726_v19   ;;  %v351_v63 = vld [vmem:[%s5483_s19 + $0x90] sm:$0xff]  ;;  %v352_v0 = vld [vmem:[%s5483_s19 + $0x98] sm:$0xff]  ;;  %v743_v1 = vld [vmem:[%s7173_s1 + $0x68] sm:$0xf] }
  0x21   : > { %4875 = vmatpush3.bf16.msra.mxu0 %v5181_v12  ;;  %855 = vperm.xlu0 %5175, %v725_v20   ;;  %v353_v3 = vld [vmem:[%s5483_s19 + $0xa0] sm:$0xff]  ;;  %v354_v4 = vld [vmem:[%s5483_s19 + $0xa8] sm:$0xff]  ;;  %v382_v5 = vpack.c.bf16 %v352_v0, %v351_v63  ;;  %v746_v6 = vld [vmem:[%s7173_s1 + $0x74] sm:$0xf] }
  0x22   : > { %4876 = vmatprep.subr.bf16.mxu0 %v5182_v15  ;;  %v383_v7 = vpack.c.bf16 %v354_v4, %v353_v3  ;;  %v745_v8 = vld [vmem:[%s7173_s1 + $0x70] sm:$0xf]  ;;  %v748_v9 = vld [vmem:[%s7173_s1 + $0x7c] sm:$0xf]  ;;  %v747_v12 = vld [vmem:[%s7173_s1 + $0x78] sm:$0xf] }
  0x23   : > { %v355_v10 = vld [vmem:[%s5483_s19 + $0xb0] sm:$0xff]  ;;  %v356_v11 = vld [vmem:[%s5483_s19 + $0xb8] sm:$0xff]  ;;  %v357_v13 = vld [vmem:[%s5483_s19 + $0xc0] sm:$0xff] }
  0x24   : > { %891 = vperm.xlu1 %5176, %v728_v22   ;;  %v358_v14 = vld [vmem:[%s5483_s19 + $0xc8] sm:$0xff]  ;;  %v750_v16 = vld [vmem:[%s7173_s1 + $0x84] sm:$0xf]  ;;  %v359_v20 = vld [vmem:[%s5483_s19 + $0xd0] sm:$0xff] }
  0x25   : > { %4877 = vmatpush3.bf16.msra.mxu0 %v5182_v15  ;;  %879 = vperm.xlu0 %5175, %v727_v25   ;;  %v384_v15 = vpack.c.bf16 %v356_v11, %v355_v10  ;;  %v385_v17 = vpack.c.bf16 %v358_v14, %v357_v13  ;;  %v752_v19 = vld [vmem:[%s7173_s1 + $0x8c] sm:$0xf]  ;;  %v751_v22 = vld [vmem:[%s7173_s1 + $0x88] sm:$0xf]  ;;  %v361_v23 = vld [vmem:[%s5483_s19 + $0xe0] sm:$0xff] }
  0x26   : > { %4878 = vmatprep.subr.bf16.mxu0 %v5183_v18  ;;  %v362_v24 = vld [vmem:[%s5483_s19 + $0xe8] sm:$0xff]  ;;  %v754_v26 = vld [vmem:[%s7173_s1 + $0x94] sm:$0xf]  ;;  %v365_v33 = vld [vmem:[%s5483_s19 + $0x100] sm:$0xff] }
  0x27   : > { %v387_v27 = vpack.c.bf16 %v362_v24, %v361_v23  ;;  %v366_v34 = vld [vmem:[%s5483_s19 + $0x108] sm:$0xff]  ;;  %v367_v37 = vld [vmem:[%s5483_s19 + $0x110] sm:$0xff]  ;;  %v372_v44 = vld [vmem:[%s5483_s19 + $0x138] sm:$0xff] }
  0x28   : > { %915 = vperm.xlu1 %5176, %v730_v29   ;;  %v756_v29 = vld [vmem:[%s7173_s1 + $0x9c] sm:$0xf]  ;;  %v389_v36 = vpack.c.bf16 %v366_v34, %v365_v33  ;;  %v371_v43 = vld [vmem:[%s5483_s19 + $0x130] sm:$0xff]  ;;  %v5681_v3 = vld [vmem:[%s7175_s3] ss:$0 sm:$0xff] }
  0x29   : > { %4879 = vmatpush3.bf16.msra.mxu0 %v5183_v18  ;;  %903 = vperm.xlu0 %5175, %v729_v31   ;;  %v749_v18 = vld [vmem:[%s7173_s1 + $0x80] sm:$0xf]  ;;  %v364_v31 = vld [vmem:[%s5483_s19 + $0xf8] sm:$0xff] }
  0x2a   : > { %4880 = vmatprep.subr.bf16.mxu0 %v5184_v21 }
  0x2c   : > { %939 = vperm.xlu1 %5176, %v732_v32   ;;  %v755_v32 = vld [vmem:[%s7173_s1 + $0x98] sm:$0xf] }
  0x2d   : > { %4881 = vmatpush3.bf16.msra.mxu0 %v5184_v21  ;;  %927 = vperm.xlu0 %5175, %v731_v35   ;;  %v360_v21 = vld [vmem:[%s5483_s19 + $0xd8] sm:$0xff] }
  0x2e   : > { %v386_v25 = vpack.c.bf16 %v360_v21, %v359_v20 }
  0x30   : > { %4883 = vmatmul.mubr.bf16.vlgmr.msra.gmra.mxu0 %v374_v28  ;;  %963 = vperm.xlu1 %5176, %v734_v39   ;;  %v753_v28 = vld [vmem:[%s7173_s1 + $0x90] sm:$0xf]  ;;  %v369_v39 = vld [vmem:[%s5483_s19 + $0x120] sm:$0xff] }
  0x31   : > { %4886 = vmatprep.mubr.bf16.mxu0 %v375_v30  ;;  %951 = vperm.xlu0 %5175, %v733_v41   ;;  %v363_v30 = vld [vmem:[%s5483_s19 + $0xf0] sm:$0xff] }
  0x32   : > { %v388_v35 = vpack.c.bf16 %v364_v31, %v363_v30 }
  0x34   : > { %987 = vperm.xlu1 %5176, %v736_v42  }
  0x35   : > { %975 = vperm.xlu0 %5175, %v735_v45   ;;  %v392_v45 = vpack.c.bf16 %v372_v44, %v371_v43 }
  0x38   : > { %4887 = vmatmul.mubr.bf16.gmra.mxu0 %v376_v38  ;;  %1011 = vperm.xlu1 %5176, %v738_v49   ;;  %v368_v38 = vld [vmem:[%s5483_s19 + $0x118] sm:$0xff] }
  0x39   : > { %4890 = vmatprep.mubr.bf16.mxu0 %v377_v40  ;;  %999 = vperm.xlu0 %5175, %v737_v51   ;;  %v370_v40 = vld [vmem:[%s5483_s19 + $0x128] sm:$0xff]  ;;  %v390_v41 = vpack.c.bf16 %v368_v38, %v367_v37 }
  0x3a   : > { %v391_v42 = vpack.c.bf16 %v370_v40, %v369_v39 }
  0x3c   : > { %1035 = vperm.xlu1 %5176, %v740_v52  }
  0x3d   : > { %1023 = vperm.xlu0 %5175, %v739_v55  }
  0x40   : > { %4891 = vmatmul.mubr.bf16.gmra.mxu0 %v378_v48  ;;  %1059 = vperm.xlu1 %5176, %v742_v59  }
  0x41   : > { %4894 = vmatprep.mubr.bf16.mxu0 %v379_v50  ;;  %1047 = vperm.xlu0 %5175, %v741_v61  }
  0x44   : > { %1083 = vperm.xlu1 %5176, %v744_v62  }
  0x45   : > { %1071 = vperm.xlu0 %5175, %v743_v1  }
  0x48   : > { %4895 = vmatmul.mubr.bf16.gmra.mxu0 %v380_v58  ;;  %1107 = vperm.xlu1 %5176, %v746_v6   ;;  %v5378_v58 = vmov 839922192  }
  0x49   : > { %4898 = vmatprep.mubr.bf16.mxu0 %v381_v60  ;;  %1095 = vperm.xlu0 %5175, %v745_v8   ;;  %v763_v59 = vunpack.c.l.s4 %v5378_v58  ;;  %v765_v60 = vlaneseq }
  0x4b   : > { %v764_v61 = vunpack.c.0.s8 %v763_v59  ;;  %v5672_v62 = vshrl.u32 %v765_v60, 7 }
  0x4c   : > { %1131 = vperm.xlu1 %5176, %v748_v9  }
  0x4d   : > { %1119 = vperm.xlu0 %5175, %v747_v12   ;;  %v5684_v4 = vsub.s32 %v764_v61, %v5672_v62 }
  0x50   : > { %4899 = vmatmul.mubr.bf16.gmra.mxu0 %v382_v5  ;;  %1155 = vperm.xlu1 %5176, %v750_v16  }
  0x51   : > { %4902 = vmatprep.mubr.bf16.mxu0 %v383_v7  ;;  %1143 = vperm.xlu0 %5175, %v749_v18  }
  0x54   : > { %1179 = vperm.xlu1 %5176, %v752_v19  }
  0x55   : > { %1167 = vperm.xlu0 %5175, %v751_v22  }
  0x58   : > { %4903 = vmatmul.mubr.bf16.gmra.mxu0 %v384_v15  ;;  %1203 = vperm.xlu1 %5176, %v754_v26  }
  0x59   : > { %4906 = vmatprep.mubr.bf16.mxu0 %v385_v17  ;;  %1191 = vperm.xlu0 %5175, %v753_v28  }
  0x5c   : > { %1227 = vperm.xlu1 %5176, %v756_v29  }
  0x5d   : > { %1215 = vperm.xlu0 %5175, %v755_v32  }
  0x60   : > { %4907 = vmatmul.mubr.bf16.gmra.mxu0 %v386_v25 }
  0x61   : > { %4910 = vmatprep.mubr.bf16.mxu0 %v387_v27 }
  0x68   : > { %4911 = vmatmul.mubr.bf16.gmra.mxu0 %v388_v35 }
  0x69   : > { %4914 = vmatprep.mubr.bf16.mxu0 %v389_v36 }
  0x70   : > { %4915 = vmatmul.mubr.bf16.gmra.mxu0 %v390_v41 }
  0x71   : > { %4918 = vmatprep.mubr.bf16.mxu0 %v391_v42 }
  0x78   : > { %4919 = vmatmul.mubr.bf16.gmra.mxu0 %v392_v45 }
  0x8b   : > { %v784_v46 = vpop.permute.xlu1 %783 }
  0x8c   : > { %v760_v47 = vpop.permute.xlu0 %759  ;;  %v792_v10 = vrot.slane %v784_v46, %v5684_v4 }
  0x8d   : > { %v768_v14 = vrot.slane %v760_v47, %v5684_v4 }
  0x8f   : > { %v796_v48 = vpop.permute.xlu1 %795 }
  0x90   : > { %v772_v49 = vpop.permute.xlu0 %771  ;;  %v804_v11 = vrot.slane %v796_v48, %v5684_v4 }
  0x91   : > { %v780_v16 = vrot.slane %v772_v49, %v5684_v4 }
  0x92   : > { %v4450_v21 = vcombine.low %v792_v10, %v804_v11 }
  0x93   : > { %v5656_v50 = vpop.permute.xlu1 %819  ;;  %v4449_v28 = vcombine.low %v768_v14, %v780_v16 }
  0x94   : > { %v5658_v51 = vpop.permute.xlu0 %807  ;;  %v828_v37 = vrot.slane %v5656_v50, %v5684_v4 }
  0x95   : > { %v816_v42 = vrot.slane %v5658_v51, %v5684_v4 }
  0x97   : > { %v5660_v52 = vpop.permute.xlu1 %843  ;;  %v4451_v61 = vcombine.low %v816_v42, %v828_v37 }
  0x98   : > { %v5662_v53 = vpop.permute.xlu0 %831  ;;  %v852_v38 = vrot.slane %v5660_v52, %v5684_v4 }
  0x99   : > { %v840_v39 = vrot.slane %v5662_v53, %v5684_v4 }
  0x9b   : > { %v5664_v54 = vpop.permute.xlu1 %867  ;;  %v4452_v58 = vcombine.low %v840_v39, %v852_v38 }
  0x9c   : > { %v5666_v55 = vpop.permute.xlu0 %855 }
  0x9f   : > { %v5668_v56 = vpop.permute.xlu1 %891 }
  0xa0   : > { %v5670_v57 = vpop.permute.xlu0 %879 }
  0xa1   : > { %v888_v11 = vrot.slane %v5670_v57, %v5684_v4 }
  0xa3   : > { %v5674_v63 = vpop.permute.xlu1 %915 }
  0xa4   : > { %v5676_v0 = vpop.permute.xlu0 %903 }
  0xa7   : > { %v5686_v6 = vpop.permute.xlu1 %939 }
  0xa8   : > { %v5688_v7 = vpop.permute.xlu0 %927  ;;  %v948_v42 = vrot.slane %v5686_v6, %v5684_v4 }
  0xab   : > { %v5698_v22 = vpop.permute.xlu1 %963 }
  0xac   : > { %v5700_v23 = vpop.permute.xlu0 %951 }
  0xaf   : > { %v5713_v43 = vpop.permute.xlu1 %987 }
  0xb0   : > { %v5715_v44 = vpop.permute.xlu0 %975 }
  0xf0   : > { %v4884_v1 = vpop.f32.mrf.mxu0 }
  0xf1   : > { %v507_v8 = vadd.f32 %v4884_v1, %v5681_v3 }
  0xf2   : > { %v498_v5 = vpop.f32.mrf.mxu0 }
  0xf3   : > { %v499_v12 = vadd.f32 %v5681_v3, %v498_v5  ;;  %v659_v17 = vmax.f32 %v507_v8, 0.0  ;;  %v876_v5 = vrot.slane %v5664_v54, %v5684_v4  ;;  %v900_v8 = vrot.slane %v5668_v56, %v5684_v4 }
  0xf4   : > { %v4885_v9 = vpop.f32.mrf.mxu0  ;;  %v864_v54 = vrot.slane %v5666_v55, %v5684_v4 }
  0xf5   : > { %v510_v13 = vadd.f32 %v4885_v9, %v5681_v3  ;;  %v657_v24 = vmax.f32 %v499_v12, 0.0  ;;  %v5725_v12 = vpop.permute.xlu1 %1011 }
  0xf6   : > { %v501_v15 = vpop.f32.mrf.mxu0  ;;  %v4453_v55 = vcombine.low %v864_v54, %v876_v5 }
  0xf7   : > { %v660_v18 = vmax.f32 %v510_v13, 0.0  ;;  %v502_v19 = vadd.f32 %v5681_v3, %v501_v15  ;;  %v5727_v13 = vpop.permute.xlu0 %999 }
  0xf8   : > { %v4888_v20 = vpop.f32.mrf.mxu0 }
  0xf9   : > { %v698_v25 = vpack.c.bf16 %v660_v18, %v659_v17  ;;  %v658_v26 = vmax.f32 %v502_v19, 0.0  ;;  %v523_v31 = vadd.f32 %v4888_v20, %v5681_v3 }
  0xfa   : > { %v514_v27 = vpop.f32.mrf.mxu0 }
  0xfb   : > { %v1358_v29 = vmul.bf16 %v4450_v21, %v698_v25  ;;  %v697_v30 = vpack.c.bf16 %v658_v26, %v657_v24  ;;  %v515_v36 = vadd.f32 %v5681_v3, %v514_v27  ;;  %v663_v48 = vmax.f32 %v523_v31, 0.0  ;;  %v5734_v31 = vpop.permute.xlu1 %1035 }
  0xfc   : > { %v4889_v32 = vpop.f32.mrf.mxu0  ;;  %v4454_v26 = vcombine.low %v888_v11, %v900_v8 }
  0xfd   : > { %v4471_v33 = vcombine.low %v1358_v29, %v1358_v29  ;;  %v4472_v34 = vcombine.high %v1358_v29, %v1358_v29  ;;  %v1357_v35 = vmul.bf16 %v4449_v28, %v697_v30  ;;  %v526_v40 = vadd.f32 %v4889_v32, %v5681_v3  ;;  %v5736_v32 = vpop.permute.xlu0 %1023 }
  0xfe   : > { %v517_v41 = vpop.f32.mrf.mxu0  ;;  %v661_v52 = vmax.f32 %v515_v36, 0.0 }
  0xff   : > { %1519 = vst [vmem:[#allocation2 + $0x8] sm:$0xf] %v4471_v33  ;;  %1520 = vst [vmem:[#allocation2 + $0xc] sm:$0xf] %v4472_v34  ;;  %v4469_v45 = vcombine.low %v1357_v35, %v1357_v35  ;;  %v4470_v46 = vcombine.high %v1357_v35, %v1357_v35  ;;  %v518_v47 = vadd.f32 %v5681_v3, %v517_v41  ;;  %v664_v49 = vmax.f32 %v526_v40, 0.0 }
 0x100   : > { %v4892_v50 = vpop.f32.mrf.mxu0  ;;  %v924_v41 = vrot.slane %v5674_v63, %v5684_v4 }
 0x101   : > { %1517 = vst [vmem:[#allocation2] sm:$0xf] %v4469_v45  ;;  %1518 = vst [vmem:[#allocation2 + $0x4] sm:$0xf] %v4470_v46  ;;  %v662_v53 = vmax.f32 %v518_v47, 0.0  ;;  %v700_v59 = vpack.c.bf16 %v664_v49, %v663_v48  ;;  %v539_v51 = vadd.f32 %v4892_v50, %v5681_v3  ;;  %v936_v45 = vrot.slane %v5688_v7, %v5684_v4  ;;  %v5752_v6 = vpop.permute.xlu0 %1047 }
 0x102   : > { %v530_v60 = vpop.f32.mrf.mxu0  ;;  %v912_v48 = vrot.slane %v5676_v0, %v5684_v4 }
 0x103   : > { %v699_v1 = vpack.c.bf16 %v662_v53, %v661_v52  ;;  %v1360_v9 = vmul.bf16 %v4452_v58, %v700_v59  ;;  %v531_v15 = vadd.f32 %v5681_v3, %v530_v60  ;;  %v667_v56 = vmax.f32 %v539_v51, 0.0  ;;  %v5750_v59 = vpop.permute.xlu1 %1059 }
 0x104   : > { %v4893_v10 = vpop.f32.mrf.mxu0  ;;  %v4456_v60 = vcombine.low %v936_v45, %v948_v42  ;;  %v4455_v5 = vcombine.low %v912_v48, %v924_v41  ;;  %v1020_v45 = vrot.slane %v5725_v12, %v5684_v4 }
 0x105   : > { %v1359_v14 = vmul.bf16 %v4451_v61, %v699_v1  ;;  %v542_v16 = vadd.f32 %v4893_v10, %v5681_v3  ;;  %v4475_v17 = vcombine.low %v1360_v9, %v1360_v9  ;;  %v4476_v18 = vcombine.high %v1360_v9, %v1360_v9 }
 0x106   : > { %v533_v19 = vpop.f32.mrf.mxu0  ;;  %v665_v27 = vmax.f32 %v531_v15, 0.0  ;;  %v972_v9 = vrot.slane %v5698_v22, %v5684_v4  ;;  %v996_v10 = vrot.slane %v5713_v43, %v5684_v4  ;;  %v984_v15 = vrot.slane %v5715_v44, %v5684_v4  ;;  %v5767_v43 = vpop.permute.xlu0 %1071 }
 0x107   : > { %v4473_v20 = vcombine.low %v1359_v14, %v1359_v14  ;;  %v4474_v21 = vcombine.high %v1359_v14, %v1359_v14  ;;  %v668_v24 = vmax.f32 %v542_v16, 0.0  ;;  %v534_v57 = vadd.f32 %v5681_v3, %v533_v19  ;;  %1523 = vst [vmem:[#allocation2 + $0x18] sm:$0xf] %v4475_v17  ;;  %1524 = vst [vmem:[#allocation2 + $0x1c] sm:$0xf] %v4476_v18 }
 0x108   : > { %v4896_v25 = vpop.f32.mrf.mxu0  ;;  %v960_v18 = vrot.slane %v5700_v23, %v5684_v4 }
 0x109   : > { %1521 = vst [vmem:[#allocation2 + $0x10] sm:$0xf] %v4473_v20  ;;  %1522 = vst [vmem:[#allocation2 + $0x14] sm:$0xf] %v4474_v21  ;;  %v702_v28 = vpack.c.bf16 %v668_v24, %v667_v56  ;;  %v666_v29 = vmax.f32 %v534_v57, 0.0  ;;  %v555_v35 = vadd.f32 %v4896_v25, %v5681_v3  ;;  %v5765_v21 = vpop.permute.xlu1 %1083 }
 0x10a   : > { %v546_v30 = vpop.f32.mrf.mxu0 }
 0x10b   : > { %v1362_v33 = vmul.bf16 %v4454_v26, %v702_v28  ;;  %v701_v34 = vpack.c.bf16 %v666_v29, %v665_v27  ;;  %v547_v40 = vadd.f32 %v5681_v3, %v546_v30  ;;  %v671_v53 = vmax.f32 %v555_v35, 0.0 }
 0x10c   : > { %v4897_v36 = vpop.f32.mrf.mxu0  ;;  %v4458_v27 = vcombine.low %v984_v15, %v996_v10  ;;  %v1092_v10 = vrot.slane %v5765_v21, %v5684_v4  ;;  %v1080_v15 = vrot.slane %v5767_v43, %v5684_v4 }
 0x10d   : > { %v4479_v37 = vcombine.low %v1362_v33, %v1362_v33  ;;  %v4480_v38 = vcombine.high %v1362_v33, %v1362_v33  ;;  %v1361_v39 = vmul.bf16 %v4453_v55, %v701_v34  ;;  %v558_v46 = vadd.f32 %v4897_v36, %v5681_v3 }
 0x10e   : > { %v549_v47 = vpop.f32.mrf.mxu0  ;;  %v669_v7 = vmax.f32 %v547_v40, 0.0  ;;  %v4457_v55 = vcombine.low %v960_v18, %v972_v9  ;;  %v1068_v9 = vrot.slane %v5750_v59, %v5684_v4  ;;  %v1056_v18 = vrot.slane %v5752_v6, %v5684_v4 }
 0x10f   : > { %1527 = vst [vmem:[#allocation2 + $0x28] sm:$0xf] %v4479_v37  ;;  %1528 = vst [vmem:[#allocation2 + $0x2c] sm:$0xf] %v4480_v38  ;;  %v4477_v49 = vcombine.low %v1361_v39, %v1361_v39  ;;  %v4478_v50 = vcombine.high %v1361_v39, %v1361_v39  ;;  %v550_v52 = vadd.f32 %v5681_v3, %v549_v47  ;;  %v672_v63 = vmax.f32 %v558_v46, 0.0  ;;  %v5771_v37 = vpop.permute.xlu1 %1107  ;;  %v5773_v38 = vpop.permute.xlu0 %1095 }
 0x110   : > { %v4900_v58 = vpop.f32.mrf.mxu0  ;;  %v1044_v46 = vrot.slane %v5734_v31, %v5684_v4  ;;  %v1032_v47 = vrot.slane %v5736_v32, %v5684_v4 }
 0x111   : > { %1525 = vst [vmem:[#allocation2 + $0x20] sm:$0xf] %v4477_v49  ;;  %1526 = vst [vmem:[#allocation2 + $0x24] sm:$0xf] %v4478_v50  ;;  %v670_v51 = vmax.f32 %v550_v52, 0.0  ;;  %v704_v61 = vpack.c.bf16 %v672_v63, %v671_v53  ;;  %v571_v0 = vadd.f32 %v4900_v58, %v5681_v3  ;;  %v1008_v50 = vrot.slane %v5727_v13, %v5684_v4 }
 0x112   : > { %v562_v1 = vpop.f32.mrf.mxu0  ;;  %v4460_v32 = vcombine.low %v1032_v47, %v1044_v46 }
 0x113   : > { %v703_v8 = vpack.c.bf16 %v670_v51, %v669_v7  ;;  %v1364_v11 = vmul.bf16 %v4456_v60, %v704_v61  ;;  %v563_v54 = vadd.f32 %v5681_v3, %v562_v1  ;;  %v675_v20 = vmax.f32 %v571_v0, 0.0  ;;  %v1132_v13 = vpop.permute.xlu1 %1131 }
 0x114   : > { %v4901_v14 = vpop.f32.mrf.mxu0  ;;  %v4459_v1 = vcombine.low %v1008_v50, %v1020_v45 }
 0x115   : > { %v1363_v16 = vmul.bf16 %v4455_v5, %v703_v8  ;;  %v574_v17 = vadd.f32 %v4901_v14, %v5681_v3  ;;  %v4483_v56 = vcombine.low %v1364_v11, %v1364_v11  ;;  %v4484_v19 = vcombine.high %v1364_v11, %v1364_v11  ;;  %v1120_v5 = vpop.permute.xlu0 %1119 }
 0x116   : > { %v565_v22 = vpop.f32.mrf.mxu0  ;;  %v673_v23 = vmax.f32 %v563_v54, 0.0  ;;  %v1128_v45 = vrot.slane %v1120_v5, %v5684_v4 }
 0x117   : > { %v4481_v24 = vcombine.low %v1363_v16, %v1363_v16  ;;  %v4482_v57 = vcombine.high %v1363_v16, %v1363_v16  ;;  %v676_v25 = vmax.f32 %v574_v17, 0.0  ;;  %v566_v44 = vadd.f32 %v5681_v3, %v565_v22  ;;  %1531 = vst [vmem:[#allocation2 + $0x38] sm:$0xf] %v4483_v56  ;;  %1532 = vst [vmem:[#allocation2 + $0x3c] sm:$0xf] %v4484_v19 }
 0x118   : > { %v4904_v26 = vpop.f32.mrf.mxu0 }
 0x119   : > { %1529 = vst [vmem:[#allocation2 + $0x30] sm:$0xf] %v4481_v24  ;;  %1530 = vst [vmem:[#allocation2 + $0x34] sm:$0xf] %v4482_v57  ;;  %v706_v28 = vpack.c.bf16 %v676_v25, %v675_v20  ;;  %v674_v29 = vmax.f32 %v566_v44, 0.0  ;;  %v587_v35 = vadd.f32 %v4904_v26, %v5681_v3  ;;  %v4462_v25 = vcombine.low %v1080_v15, %v1092_v10  ;;  %v5798_v44 = vpop.permute.xlu1 %1155  ;;  %v5800_v26 = vpop.permute.xlu0 %1143 }
 0x11a   : > { %v578_v30 = vpop.f32.mrf.mxu0 }
 0x11b   : > { %v1366_v33 = vmul.bf16 %v4458_v27, %v706_v28  ;;  %v705_v34 = vpack.c.bf16 %v674_v29, %v673_v23  ;;  %v579_v42 = vadd.f32 %v5681_v3, %v578_v30  ;;  %v679_v58 = vmax.f32 %v587_v35, 0.0 }
 0x11c   : > { %v4905_v36 = vpop.f32.mrf.mxu0  ;;  %v4461_v29 = vcombine.low %v1056_v18, %v1068_v9 }
 0x11d   : > { %v4487_v39 = vcombine.low %v1366_v33, %v1366_v33  ;;  %v4488_v40 = vcombine.high %v1366_v33, %v1366_v33  ;;  %v1365_v41 = vmul.bf16 %v4457_v55, %v705_v34  ;;  %v590_v48 = vadd.f32 %v4905_v36, %v5681_v3  ;;  %v1168_v50 = vpop.permute.xlu0 %1167 }
 0x11e   : > { %v581_v49 = vpop.f32.mrf.mxu0  ;;  %v677_v31 = vmax.f32 %v579_v42, 0.0  ;;  %v1140_v42 = vrot.slane %v1132_v13, %v5684_v4  ;;  %v1176_v9 = vrot.slane %v1168_v50, %v5684_v4 }
 0x11f   : > { %1535 = vst [vmem:[#allocation2 + $0x48] sm:$0xf] %v4487_v39  ;;  %1536 = vst [vmem:[#allocation2 + $0x4c] sm:$0xf] %v4488_v40  ;;  %v4485_v52 = vcombine.low %v1365_v41, %v1365_v41  ;;  %v4486_v53 = vcombine.high %v1365_v41, %v1365_v41  ;;  %v582_v63 = vadd.f32 %v5681_v3, %v581_v49  ;;  %v680_v12 = vmax.f32 %v590_v48, 0.0  ;;  %v1180_v49 = vpop.permute.xlu1 %1179 }
 0x120   : > { %v4908_v7 = vpop.f32.mrf.mxu0  ;;  %v1116_v41 = vrot.slane %v5771_v37, %v5684_v4  ;;  %v1104_v48 = vrot.slane %v5773_v38, %v5684_v4  ;;  %v1188_v13 = vrot.slane %v1180_v49, %v5684_v4 }
 0x121   : > { %1533 = vst [vmem:[#allocation2 + $0x40] sm:$0xf] %v4485_v52  ;;  %1534 = vst [vmem:[#allocation2 + $0x44] sm:$0xf] %v4486_v53  ;;  %v678_v51 = vmax.f32 %v582_v63, 0.0  ;;  %v708_v60 = vpack.c.bf16 %v680_v12, %v679_v58  ;;  %v603_v61 = vadd.f32 %v4908_v7, %v5681_v3 }
 0x122   : > { %v594_v0 = vpop.f32.mrf.mxu0 }
 0x123   : > { %v707_v8 = vpack.c.bf16 %v678_v51, %v677_v31  ;;  %v1368_v11 = vmul.bf16 %v4460_v32, %v708_v60  ;;  %v595_v54 = vadd.f32 %v5681_v3, %v594_v0  ;;  %v683_v20 = vmax.f32 %v603_v61, 0.0  ;;  %v1204_v10 = vpop.permute.xlu1 %1203 }
 0x124   : > { %v4909_v14 = vpop.f32.mrf.mxu0  ;;  %v4464_v51 = vcombine.low %v1128_v45, %v1140_v42  ;;  %v4463_v61 = vcombine.low %v1104_v48, %v1116_v41 }
 0x125   : > { %v1367_v16 = vmul.bf16 %v4459_v1, %v707_v8  ;;  %v606_v17 = vadd.f32 %v4909_v14, %v5681_v3  ;;  %v4491_v56 = vcombine.low %v1368_v11, %v1368_v11  ;;  %v4492_v19 = vcombine.high %v1368_v11, %v1368_v11  ;;  %v1192_v11 = vpop.permute.xlu0 %1191 }
 0x126   : > { %v597_v59 = vpop.f32.mrf.mxu0  ;;  %v681_v6 = vmax.f32 %v595_v54, 0.0  ;;  %v1164_v1 = vrot.slane %v5798_v44, %v5684_v4  ;;  %v1152_v54 = vrot.slane %v5800_v26, %v5684_v4 }
 0x127   : > { %v4489_v22 = vcombine.low %v1367_v16, %v1367_v16  ;;  %v4490_v24 = vcombine.high %v1367_v16, %v1367_v16  ;;  %v684_v21 = vmax.f32 %v606_v17, 0.0  ;;  %v598_v57 = vadd.f32 %v5681_v3, %v597_v59  ;;  %1539 = vst [vmem:[#allocation2 + $0x58] sm:$0xf] %v4491_v56  ;;  %1540 = vst [vmem:[#allocation2 + $0x5c] sm:$0xf] %v4492_v19 }
 0x128   : > { %v4912_v43 = vpop.f32.mrf.mxu0  ;;  %v4465_v26 = vcombine.low %v1152_v54, %v1164_v1 }
 0x129   : > { %1537 = vst [vmem:[#allocation2 + $0x50] sm:$0xf] %v4489_v22  ;;  %1538 = vst [vmem:[#allocation2 + $0x54] sm:$0xf] %v4490_v24  ;;  %v710_v27 = vpack.c.bf16 %v684_v21, %v683_v20  ;;  %v682_v23 = vmax.f32 %v598_v57, 0.0  ;;  %v619_v33 = vadd.f32 %v4912_v43, %v5681_v3  ;;  %v4466_v57 = vcombine.low %v1176_v9, %v1188_v13 }
 0x12a   : > { %v610_v28 = vpop.f32.mrf.mxu0 }
 0x12b   : > { %v1370_v30 = vmul.bf16 %v4462_v25, %v710_v27  ;;  %v709_v55 = vpack.c.bf16 %v682_v23, %v681_v6  ;;  %v611_v40 = vadd.f32 %v5681_v3, %v610_v28  ;;  %v687_v58 = vmax.f32 %v619_v33, 0.0  ;;  %v1228_v27 = vpop.permute.xlu1 %1227  ;;  %v1216_v23 = vpop.permute.xlu0 %1215 }
 0x12c   : > { %v4913_v34 = vpop.f32.mrf.mxu0  ;;  %v1224_v41 = vrot.slane %v1216_v23, %v5684_v4 }
 0x12d   : > { %v4495_v35 = vcombine.low %v1370_v30, %v1370_v30  ;;  %v4496_v36 = vcombine.high %v1370_v30, %v1370_v30  ;;  %v1369_v39 = vmul.bf16 %v4461_v29, %v709_v55  ;;  %v622_v46 = vadd.f32 %v4913_v34, %v5681_v3 }
 0x12e   : > { %v613_v47 = vpop.f32.mrf.mxu0  ;;  %v685_v7 = vmax.f32 %v611_v40, 0.0  ;;  %v1236_v40 = vrot.slane %v1228_v27, %v5684_v4 }
 0x12f   : > { %1543 = vst [vmem:[#allocation2 + $0x68] sm:$0xf] %v4495_v35  ;;  %1544 = vst [vmem:[#allocation2 + $0x6c] sm:$0xf] %v4496_v36  ;;  %v4493_v52 = vcombine.low %v1369_v39, %v1369_v39  ;;  %v4494_v53 = vcombine.high %v1369_v39, %v1369_v39  ;;  %v614_v63 = vadd.f32 %v5681_v3, %v613_v47  ;;  %v688_v37 = vmax.f32 %v622_v46, 0.0 }
 0x130   : > { %v4916_v12 = vpop.f32.mrf.mxu0  ;;  %v1212_v39 = vrot.slane %v1204_v10, %v5684_v4  ;;  %v1200_v46 = vrot.slane %v1192_v11, %v5684_v4 }
 0x131   : > { %1541 = vst [vmem:[#allocation2 + $0x60] sm:$0xf] %v4493_v52  ;;  %1542 = vst [vmem:[#allocation2 + $0x64] sm:$0xf] %v4494_v53  ;;  %v686_v31 = vmax.f32 %v614_v63, 0.0  ;;  %v712_v32 = vpack.c.bf16 %v688_v37, %v687_v58  ;;  %v635_v60 = vadd.f32 %v4916_v12, %v5681_v3  ;;  %v4468_v58 = vcombine.low %v1224_v41, %v1236_v40 }
 0x132   : > { %v626_v38 = vpop.f32.mrf.mxu0  ;;  %v4467_v12 = vcombine.low %v1200_v46, %v1212_v39 }
 0x133   : > { %v711_v0 = vpack.c.bf16 %v686_v31, %v685_v7  ;;  %v1372_v5 = vmul.bf16 %v4464_v51, %v712_v32  ;;  %v627_v15 = vadd.f32 %v5681_v3, %v626_v38  ;;  %v691_v56 = vmax.f32 %v635_v60, 0.0 }
 0x134   : > { %v4917_v8 = vpop.f32.mrf.mxu0 }
 0x135   : > { %v1371_v14 = vmul.bf16 %v4463_v61, %v711_v0  ;;  %v638_v16 = vadd.f32 %v4917_v8, %v5681_v3  ;;  %v4499_v17 = vcombine.low %v1372_v5, %v1372_v5  ;;  %v4500_v18 = vcombine.high %v1372_v5, %v1372_v5 }
 0x136   : > { %v629_v19 = vpop.f32.mrf.mxu0  ;;  %v689_v43 = vmax.f32 %v627_v15, 0.0 }
 0x137   : > { %v4497_v20 = vcombine.low %v1371_v14, %v1371_v14  ;;  %v4498_v59 = vcombine.high %v1371_v14, %v1371_v14  ;;  %v692_v22 = vmax.f32 %v638_v16, 0.0  ;;  %v630_v24 = vadd.f32 %v5681_v3, %v629_v19  ;;  %1547 = vst [vmem:[#allocation2 + $0x78] sm:$0xf] %v4499_v17  ;;  %1548 = vst [vmem:[#allocation2 + $0x7c] sm:$0xf] %v4500_v18 }
 0x138   : > { %v4920_v21 = vpop.f32.mrf.mxu0 }
 0x139   : > { %1545 = vst [vmem:[#allocation2 + $0x70] sm:$0xf] %v4497_v20  ;;  %1546 = vst [vmem:[#allocation2 + $0x74] sm:$0xf] %v4498_v59  ;;  %v714_v25 = vpack.c.bf16 %v692_v22, %v691_v56  ;;  %v690_v44 = vmax.f32 %v630_v24, 0.0  ;;  %v651_v30 = vadd.f32 %v4920_v21, %v5681_v3 }
 0x13a   : > { %v642_v6 = vpop.f32.mrf.mxu0 }
 0x13b   : > { %v1374_v28 = vmul.bf16 %v4466_v57, %v714_v25  ;;  %v713_v29 = vpack.c.bf16 %v690_v44, %v689_v43  ;;  %v643_v36 = vadd.f32 %v5681_v3, %v642_v6  ;;  %v695_v50 = vmax.f32 %v651_v30, 0.0 }
 0x13c   : > { %v4921_v55 = vpop.f32.mrf.mxu0 }
 0x13d   : > { %v4503_v33 = vcombine.low %v1374_v28, %v1374_v28  ;;  %v4504_v34 = vcombine.high %v1374_v28, %v1374_v28  ;;  %v1373_v35 = vmul.bf16 %v4465_v26, %v713_v29  ;;  %v654_v42 = vadd.f32 %v4921_v55, %v5681_v3 }
 0x13e   : > { %v645_v45 = vpop.f32.mrf.mxu0  ;;  %v693_v53 = vmax.f32 %v643_v36, 0.0 }
 0x13f   : > { %1551 = vst [vmem:[#allocation2 + $0x88] sm:$0xf] %v4503_v33  ;;  %1552 = vst [vmem:[#allocation2 + $0x8c] sm:$0xf] %v4504_v34  ;;  %v4501_v47 = vcombine.low %v1373_v35, %v1373_v35  ;;  %v4502_v48 = vcombine.high %v1373_v35, %v1373_v35  ;;  %v646_v49 = vadd.f32 %v5681_v3, %v645_v45  ;;  %v696_v52 = vmax.f32 %v654_v42, 0.0 }
 0x141   : > { %1549 = vst [vmem:[#allocation2 + $0x80] sm:$0xf] %v4501_v47  ;;  %1550 = vst [vmem:[#allocation2 + $0x84] sm:$0xf] %v4502_v48  ;;  %v694_v63 = vmax.f32 %v646_v49, 0.0  ;;  %v716_v37 = vpack.c.bf16 %v696_v52, %v695_v50 }
 0x143   : > { %v715_v7 = vpack.c.bf16 %v694_v63, %v693_v53  ;;  %v1376_v31 = vmul.bf16 %v4468_v58, %v716_v37 }
 0x145   : > { %v1375_v51 = vmul.bf16 %v4467_v12, %v715_v7  ;;  %v4507_v32 = vcombine.low %v1376_v31, %v1376_v31  ;;  %v4508_v4 = vcombine.high %v1376_v31, %v1376_v31  ;;  %1560 = sbr.rel (%p4509_p7) target bundleno = 333 (0x14d), region = 56 }
 0x147   : > { %v4505_v60 = vcombine.low %v1375_v51, %v1375_v51  ;;  %v4506_v38 = vcombine.high %v1375_v51, %v1375_v51  ;;  %1555 = vst [vmem:[#allocation2 + $0x98] sm:$0xf] %v4507_v32  ;;  %1556 = vst [vmem:[#allocation2 + $0x9c] sm:$0xf] %v4508_v4 }
 0x149   : > { %1553 = vst [vmem:[#allocation2 + $0x90] sm:$0xf] %v4505_v60  ;;  %1554 = vst [vmem:[#allocation2 + $0x94] sm:$0xf] %v4506_v38 }
 0x14a   : > { %v5379_v3 = vmov 0  }
 0x14b   : > { %1561 = vst [vmem:[#allocation2] sm:$0xf] %v5379_v3  ;;  %1562 = vst [vmem:[#allocation2 + $0x4] sm:$0xf] %v5379_v3 }
 0x14c   : > { %1563 = vst [vmem:[#allocation2 + $0x8] sm:$0xf] %v5379_v3  ;;  %1564 = vst [vmem:[#allocation2 + $0xc] sm:$0xf] %v5379_v3 }
 0x14d PF: > { %p4510_p8 = scmp.ne.s32.totalorder %s5359_s27, 1 }
 0x14f   : > { %1568 = sbr.rel (%p4510_p8) target bundleno = 343 (0x157), region = 60 }
 0x154   : > { %v5380_v61 = vmov 0  }
 0x155   : > { %1569 = vst [vmem:[#allocation2 + $0x90] sm:$0xf] %v5380_v61  ;;  %1570 = vst [vmem:[#allocation2 + $0x94] sm:$0xf] %v5380_v61 }
 0x156   : > { %1571 = vst [vmem:[#allocation2 + $0x98] sm:$0xf] %v5380_v61  ;;  %1572 = vst [vmem:[#allocation2 + $0x9c] sm:$0xf] %v5380_v61 }
 0x157 PF: > { %v5185_v0 = vld [vmem:[%s7176_s4 + $0xac] ss:$12 sps:$4 sm:$0xff]   ;;  %1893 = vmatprep.mubr.bf16.mxu1 %v5377_v2  ;;  %v5187_v1 = vld [vmem:[%s7176_s4 + $0xb0] ss:$12 sps:$4 sm:$0xff]   ;;  %v5188_v13 = vld [vmem:[%s7176_s4 + $0xa8] ss:$12 sps:$4 sm:$0xff]  }
 0x158   : > { %1861 = vmatprep.subr.bf16.mxu1 %v5185_v0  ;;  %4922 = vmatprep.subr.bf16.mxu0 %v5187_v1  ;;  %v5189_v5 = vld [vmem:[%s7176_s4 + $0x94] ss:$12 sps:$4 sm:$0xff]   ;;  %v5191_v8 = vld [vmem:[%s7176_s4 + $0x98] ss:$12 sps:$4 sm:$0xff]   ;;  %v5192_v9 = vld [vmem:[%s7176_s4 + $0x90] ss:$12 sps:$4 sm:$0xff]  }
 0x159   : > { %1862 = vmatpush1.bf16.msra.mxu1 %v5188_v13  ;;  %4923 = vmatpush3.bf16.msra.mxu0 %v5187_v1  ;;  %v5193_v10 = vld [vmem:[%s7176_s4 + $0x7c] ss:$12 sps:$4 sm:$0xff]   ;;  %v5195_v11 = vld [vmem:[%s7176_s4 + $0x80] ss:$12 sps:$4 sm:$0xff]   ;;  %v5196_v14 = vld [vmem:[%s7176_s4 + $0x78] ss:$12 sps:$4 sm:$0xff]  }
 0x15a   : > { %1863 = vmatprep.subr.bf16.mxu1 %v5189_v5  ;;  %4924 = vmatprep.subr.bf16.mxu0 %v5191_v8  ;;  %v5197_v15 = vld [vmem:[%s7176_s4 + $0x64] ss:$12 sps:$4 sm:$0xff]   ;;  %v5199_v16 = vld [vmem:[%s7176_s4 + $0x68] ss:$12 sps:$4 sm:$0xff]   ;;  %v5200_v54 = vld [vmem:[%s7176_s4 + $0x60] ss:$12 sps:$4 sm:$0xff]  }
 0x15b   : > { %v5201_v17 = vld [vmem:[%s7176_s4 + $0x4c] ss:$12 sps:$4 sm:$0xff]   ;;  %v5203_v18 = vld [vmem:[%s7176_s4 + $0x50] ss:$12 sps:$4 sm:$0xff]   ;;  %v5204_v56 = vld [vmem:[%s7176_s4 + $0x48] ss:$12 sps:$4 sm:$0xff]  }
 0x15c   : > { %v5205_v19 = vld [vmem:[%s7176_s4 + $0x34] ss:$12 sps:$4 sm:$0xff]   ;;  %v5207_v20 = vld [vmem:[%s7176_s4 + $0x38] ss:$12 sps:$4 sm:$0xff]   ;;  %v5208_v59 = vld [vmem:[%s7176_s4 + $0x30] ss:$12 sps:$4 sm:$0xff]  }
 0x15d   : > { %1864 = vmatpush1.bf16.msra.mxu1 %v5192_v9  ;;  %4925 = vmatpush3.bf16.msra.mxu0 %v5191_v8  ;;  %v5217_v22 = vld [vmem:[#allocation2] sm:$0xff]   ;;  %v5209_v24 = vld [vmem:[%s7176_s4 + $0x1c] ss:$12 sps:$4 sm:$0xff]   ;;  %v5225_v26 = vld [vmem:[%s7176_s4 + $0x16c] ss:$12 sps:$4 sm:$0xff]   ;;  %vm3727_vm0 = vcmp.lt.s32.totalorder %v5672_v62, 1 }
 0x15e   : > { %1865 = vmatprep.subr.bf16.mxu1 %v5193_v10  ;;  %4926 = vmatprep.subr.bf16.mxu0 %v5195_v11  ;;  %v5211_v21 = vld [vmem:[%s7176_s4 + $0x20] ss:$12 sps:$4 sm:$0xff]   ;;  %v5212_v57 = vld [vmem:[%s7176_s4 + $0x18] ss:$12 sps:$4 sm:$0xff]   ;;  %v5215_v25 = vld [vmem:[%s7176_s4 + $0x8] ss:$12 sps:$4 sm:$0xff]  }
 0x15f   : > { %4938 = vmatprep.mubr.bf16.mxu0 %v5217_v22  ;;  %v5213_v43 = vld [vmem:[%s7176_s4 + $0x4] ss:$12 sps:$4 sm:$0xff]   ;;  %v5216_v44 = vld [vmem:[%s7176_s4] ss:$12 sps:$4 sm:$0xff]   ;;  %v5223_v29 = vld [vmem:[%s7176_s4 + $0x168] ss:$12 sps:$4 sm:$0xff]  }
 0x160   : > { %v5219_v6 = vld [vmem:[%s7176_s4 + $0x170] ss:$12 sps:$4 sm:$0xff]   ;;  %v5218_v27 = vld [vmem:[#allocation2 + $0x8] sm:$0xff]   ;;  %v5222_v28 = vld [vmem:[%s7176_s4 + $0x158] ss:$12 sps:$4 sm:$0xff]   ;;  %vm3824_vm1 = vcmp.lt.s32.totalorder %v5672_v62, 7 }
 0x161   : > { %1866 = vmatpush1.bf16.msra.mxu1 %v5196_v14  ;;  %4927 = vmatpush3.bf16.msra.mxu0 %v5195_v11  ;;  %v5220_v23 = vld [vmem:[#allocation2 + $0x10] sm:$0xff]   ;;  %v5228_v55 = vld [vmem:[%s7176_s4 + $0x140] ss:$12 sps:$4 sm:$0xff]   ;;  %v5221_v34 = vld [vmem:[#allocation2 + $0x18] sm:$0xff]   ;;  %vm4307_vm2 = vcmask 130048  }
 0x162   : > { %1867 = vmatprep.subr.bf16.mxu1 %v5197_v15  ;;  %4928 = vmatprep.subr.bf16.mxu0 %v5199_v16  ;;  %v5234_v30 = vld [vmem:[%s7176_s4 + $0x154] ss:$12 sps:$4 sm:$0xff]   ;;  %v5232_v33 = vld [vmem:[%s7176_s4 + $0x150] ss:$12 sps:$4 sm:$0xff]   ;;  %v5241_v40 = vld [vmem:[%s7176_s4 + $0x138] ss:$12 sps:$4 sm:$0xff]  }
 0x163   : > { %v5226_v35 = vld [vmem:[#allocation2 + $0x20] sm:$0xff]   ;;  %v5231_v36 = vld [vmem:[%s7176_s4 + $0x128] ss:$12 sps:$4 sm:$0xff]   ;;  %v5237_v42 = vld [vmem:[%s7176_s4 + $0x110] ss:$12 sps:$4 sm:$0xff]  }
 0x164   : > { %v5243_v39 = vld [vmem:[%s7176_s4 + $0x13c] ss:$12 sps:$4 sm:$0xff]   ;;  %v5250_v45 = vld [vmem:[%s7176_s4 + $0x120] ss:$12 sps:$4 sm:$0xff]   ;;  %v5252_v46 = vld [vmem:[%s7176_s4 + $0x124] ss:$12 sps:$4 sm:$0xff]  }
 0x165   : > { %1868 = vmatpush1.bf16.msra.mxu1 %v5200_v54  ;;  %4929 = vmatpush3.bf16.msra.mxu0 %v5199_v16  ;;  %v5227_v41 = vld [vmem:[#allocation2 + $0x28] sm:$0xff]   ;;  %v5229_v47 = vld [vmem:[#allocation2 + $0x30] sm:$0xff]   ;;  %v5240_v48 = vld [vmem:[%s7176_s4 + $0xf8] ss:$12 sps:$4 sm:$0xff]  }
 0x166   : > { %1869 = vmatprep.subr.bf16.mxu1 %v5201_v17  ;;  %4930 = vmatprep.subr.bf16.mxu0 %v5203_v18  ;;  %v5230_v49 = vld [vmem:[#allocation2 + $0x38] sm:$0xff]   ;;  %v5246_v50 = vld [vmem:[%s7176_s4 + $0xe0] ss:$12 sps:$4 sm:$0xff]   ;;  %v5263_v52 = vld [vmem:[%s7176_s4 + $0x108] ss:$12 sps:$4 sm:$0xff]  }
 0x167   : > { %v5265_v53 = vld [vmem:[%s7176_s4 + $0x10c] ss:$12 sps:$4 sm:$0xff]   ;;  %v5235_v63 = vld [vmem:[#allocation2 + $0x40] sm:$0xff]   ;;  %v5249_v58 = vld [vmem:[%s7176_s4 + $0xc8] ss:$12 sps:$4 sm:$0xff]  }
 0x168   : > { %v5236_v37 = vld [vmem:[#allocation2 + $0x48] sm:$0xff]   ;;  %v5276_v7 = vld [vmem:[%s7176_s4 + $0xf0] ss:$12 sps:$4 sm:$0xff]   ;;  %v5278_v31 = vld [vmem:[%s7176_s4 + $0xf4] ss:$12 sps:$4 sm:$0xff]  }
 0x169   : > { %1870 = vmatpush1.bf16.msra.mxu1 %v5204_v56  ;;  %4931 = vmatpush3.bf16.msra.mxu0 %v5203_v18  ;;  %v5257_v12 = vld [vmem:[%s7176_s4 + $0x22c] ss:$12 sps:$4 sm:$0xff]   ;;  %v5972_v51 = vld [vmem:[#allocation2 + $0x50] sm:$0xff]   ;;  %v5291_v60 = vld [vmem:[%s7176_s4 + $0xdc] ss:$12 sps:$4 sm:$0xff]  }
 0x16a   : > { %1871 = vmatprep.subr.bf16.mxu1 %v5205_v19  ;;  %4932 = vmatprep.subr.bf16.mxu0 %v5207_v20  ;;  %v5976_v32 = vld [vmem:[#allocation2 + $0x58] sm:$0xff]   ;;  %v5984_v38 = vld [vmem:[#allocation2 + $0x60] sm:$0xff]   ;;  %v5989_v3 = vld [vmem:[#allocation2 + $0x68] sm:$0xff]  }
 0x16b   : > { %v5289_v4 = vld [vmem:[%s7176_s4 + $0xd8] ss:$12 sps:$4 sm:$0xff]   ;;  %v5302_v61 = vld [vmem:[%s7176_s4 + $0xc0] ss:$12 sps:$4 sm:$0xff]   ;;  %v5997_v1 = vld [vmem:[#allocation2 + $0x70] sm:$0xff]  }
 0x16c   : > { %v5304_v0 = vld [vmem:[%s7176_s4 + $0xc4] ss:$12 sps:$4 sm:$0xff]   ;;  %v6008_v5 = vld [vmem:[#allocation2 + $0x78] sm:$0xff]   ;;  %v5255_v10 = vld [vmem:[%s7176_s4 + $0x228] ss:$12 sps:$4 sm:$0xff]  }
 0x16d   : > { %1872 = vmatpush1.bf16.msra.mxu1 %v5208_v59  ;;  %4933 = vmatpush3.bf16.msra.mxu0 %v5207_v20  ;;  %v6002_v13 = vld [vmem:[%s7176_s4 + $0x230] ss:$12 sps:$4 sm:$0xff]   ;;  %v6020_v11 = vld [vmem:[#allocation2 + $0x20] sm:$0xff]   ;;  %v6034_v54 = vld [vmem:[#allocation2 + $0x28] sm:$0xff]  }
 0x16e   : > { %1873 = vmatprep.subr.bf16.mxu1 %v5209_v24  ;;  %4934 = vmatprep.subr.bf16.mxu0 %v5211_v21  ;;  %v6010_v8 = vld [vmem:[#allocation2 + $0x10] sm:$0xff]   ;;  %v6015_v9 = vld [vmem:[#allocation2 + $0x18] sm:$0xff]   ;;  %v5273_v19 = vld [vmem:[%s7176_s4 + $0x1e0] ss:$12 sps:$4 sm:$0xff]  }
 0x16f   : > { %v5262_v14 = vld [vmem:[%s7176_s4 + $0x214] ss:$12 sps:$4 sm:$0xff]   ;;  %v5260_v15 = vld [vmem:[%s7176_s4 + $0x210] ss:$12 sps:$4 sm:$0xff]   ;;  %v5268_v18 = vld [vmem:[%s7176_s4 + $0x1f8] ss:$12 sps:$4 sm:$0xff]  }
 0x170   : > { %v5270_v16 = vld [vmem:[%s7176_s4 + $0x1fc] ss:$12 sps:$4 sm:$0xff]   ;;  %v6036_v17 = vld [vmem:[#allocation2 + $0x30] sm:$0xff]   ;;  %v5283_v20 = vld [vmem:[%s7176_s4 + $0x1cc] ss:$12 sps:$4 sm:$0xff]  }
 0x171   : > { %1874 = vmatpush1.bf16.msra.mxu1 %v5212_v57  ;;  %4935 = vmatpush3.bf16.msra.mxu0 %v5211_v21  ;;  %v5275_v56 = vld [vmem:[%s7176_s4 + $0x1e4] ss:$12 sps:$4 sm:$0xff]   ;;  %v6053_v59 = vld [vmem:[#allocation2 + $0x38] sm:$0xff]   ;;  %v5281_v24 = vld [vmem:[%s7176_s4 + $0x1c8] ss:$12 sps:$4 sm:$0xff]  }
 0x172   : > { %1875 = vmatprep.subr.bf16.mxu1 %v5213_v43  ;;  %4936 = vmatprep.subr.bf16.mxu0 %v5215_v25  ;;  %v5288_v21 = vld [vmem:[%s7176_s4 + $0x1b4] ss:$12 sps:$4 sm:$0xff]   ;;  %v5286_v57 = vld [vmem:[%s7176_s4 + $0x1b0] ss:$12 sps:$4 sm:$0xff]  }
 0x173   : > { %v5296_v43 = vld [vmem:[%s7176_s4 + $0x19c] ss:$12 sps:$4 sm:$0xff]  }
 0x175   : > { %1876 = vmatpush1.bf16.msra.mxu1 %v5216_v44  ;;  %4937 = vmatpush3.bf16.msra.mxu0 %v5215_v25  ;;  %v6073_v25 = vld [vmem:[#allocation2 + $0x48] sm:$0xff]   ;;  %v6075_v44 = vld [vmem:[#allocation2 + $0x50] sm:$0xff]  }
 0x176   : > { %4970 = vmatprep.subr.bf16.mxu0 %v5219_v6  ;;  %2504 = vmatprep.subr.bf16.mxu1 %v5225_v26  ;;  %v5301_v26 = vld [vmem:[%s7176_s4 + $0x184] ss:$12 sps:$4 sm:$0xff]  }
 0x178   : > { %1894 = vmatmul.mubr.bf16.vlgmr.msra.gmra.mxu1 %v5217_v22  ;;  %4939 = vmatmul.mubr.bf16.vlgmr.msra.gmra.mxu0 %v5218_v27  ;;  %v6055_v22 = vld [vmem:[#allocation2 + $0x40] sm:$0xff]  }
 0x179   : > { %4971 = vmatpush3.bf16.msra.mxu0 %v5219_v6  ;;  %1903 = vmatprep.mubr.bf16.mxu1 %v5377_v2  ;;  %v5294_v6 = vld [vmem:[%s7176_s4 + $0x198] ss:$12 sps:$4 sm:$0xff]  }
 0x17a   : > { %4942 = vmatprep.mubr.bf16.mxu0 %v5220_v23  ;;  %4972 = vmatprep.subr.bf16.mxu0 %v5222_v28 }
 0x17b   : > { %2505 = vmatpush1.bf16.msra.mxu1 %v5223_v29  ;;  %v6099_v29 = vld [vmem:[#allocation2 + $0x68] sm:$0xff]  }
 0x17c   : > { %2506 = vmatprep.subr.bf16.mxu1 %v5234_v30  ;;  %v6101_v30 = vld [vmem:[#allocation2 + $0x70] sm:$0xff]  }
 0x17d   : > { %4973 = vmatpush3.bf16.msra.mxu0 %v5222_v28  ;;  %v6092_v28 = vld [vmem:[#allocation2 + $0x60] sm:$0xff]  }
 0x17e   : > { %4974 = vmatprep.subr.bf16.mxu0 %v5228_v55 }
 0x17f   : > { %2507 = vmatpush1.bf16.msra.mxu1 %v5232_v33  ;;  %v6109_v33 = vld [vmem:[#allocation2 + $0x80] sm:$0xff]  }
 0x180   : > { %1904 = vmatmul.mubr.bf16.gmra.mxu1 %v5218_v27  ;;  %4943 = vmatmul.mubr.bf16.gmra.mxu0 %v5221_v34  ;;  %v5299_v27 = vld [vmem:[%s7176_s4 + $0x180] ss:$12 sps:$4 sm:$0xff]  }
 0x181   : > { %1913 = vmatprep.mubr.bf16.mxu1 %v5377_v2  ;;  %4946 = vmatprep.mubr.bf16.mxu0 %v5226_v35 }
 0x182   : > { %4975 = vmatpush3.bf16.msra.mxu0 %v5228_v55  ;;  %2508 = vmatprep.subr.bf16.mxu1 %v5243_v39  ;;  %v6107_v55 = vld [vmem:[#allocation2 + $0x78] sm:$0xff]   ;;  %v5312_v39 = vld [vmem:[%s7176_s4 + $0x200] ss:$12 sps:$4 sm:$0xff]  }
 0x183   : > { %4976 = vmatprep.subr.bf16.mxu0 %v5231_v36  ;;  %2509 = vmatpush1.bf16.msra.mxu1 %v5241_v40  ;;  %v6135_v40 = vld [vmem:[#allocation2 + $0x28] sm:$0xff]  }
 0x184   : > { %2510 = vmatprep.subr.bf16.mxu1 %v5252_v46  ;;  %v5321_v46 = vld [vmem:[%s7176_s4 + $0x1b8] ss:$12 sps:$4 sm:$0xff]  }
 0x186   : > { %4977 = vmatpush3.bf16.msra.mxu0 %v5231_v36  ;;  %v5309_v36 = vld [vmem:[%s7176_s4 + $0x218] ss:$12 sps:$4 sm:$0xff]  }
 0x187   : > { %4978 = vmatprep.subr.bf16.mxu0 %v5237_v42  ;;  %2511 = vmatpush1.bf16.msra.mxu1 %v5250_v45  ;;  %v6147_v45 = vld [vmem:[#allocation2 + $0x30] sm:$0xff]  }
 0x188   : > { %1914 = vmatmul.mubr.bf16.gmra.mxu1 %v5220_v23  ;;  %4947 = vmatmul.mubr.bf16.gmra.mxu0 %v5227_v41  ;;  %v6090_v23 = vld [vmem:[#allocation2 + $0x58] sm:$0xff]  }
 0x189   : > { %1923 = vmatprep.mubr.bf16.mxu1 %v5377_v2  ;;  %4950 = vmatprep.mubr.bf16.mxu0 %v5229_v47 }
 0x18a   : > { %4979 = vmatpush3.bf16.msra.mxu0 %v5237_v42  ;;  %2512 = vmatprep.subr.bf16.mxu1 %v5265_v53  ;;  %v5318_v42 = vld [vmem:[%s7176_s4 + $0x1d0] ss:$12 sps:$4 sm:$0xff]  }
 0x18b   : > { %4980 = vmatprep.subr.bf16.mxu0 %v5240_v48  ;;  %2513 = vmatpush1.bf16.msra.mxu1 %v5263_v52  ;;  %v6174_v52 = vld [vmem:[#allocation2 + $0x48] sm:$0xff]   ;;  %v6180_v53 = vld [vmem:[#allocation2 + $0x50] sm:$0xff]  }
 0x18c   : > { %2514 = vmatprep.subr.bf16.mxu1 %v5278_v31 }
 0x18e   : > { %4981 = vmatpush3.bf16.msra.mxu0 %v5240_v48  ;;  %v6159_v48 = vld [vmem:[#allocation2 + $0x38] sm:$0xff]  }
 0x18f   : > { %4982 = vmatprep.subr.bf16.mxu0 %v5246_v50  ;;  %2515 = vmatpush1.bf16.msra.mxu1 %v5276_v7 }
 0x190   : > { %1924 = vmatmul.mubr.bf16.gmra.mxu1 %v5221_v34  ;;  %4951 = vmatmul.mubr.bf16.gmra.mxu0 %v5230_v49  ;;  %v6115_v34 = vld [vmem:[#allocation2 + $0x88] sm:$0xff]  }
 0x191   : > { %1933 = vmatprep.mubr.bf16.mxu1 %v5377_v2  ;;  %4954 = vmatprep.mubr.bf16.mxu0 %v5235_v63 }
 0x192   : > { %4983 = vmatpush3.bf16.msra.mxu0 %v5246_v50  ;;  %2516 = vmatprep.subr.bf16.mxu1 %v5291_v60  ;;  %v6168_v50 = vld [vmem:[#allocation2 + $0x40] sm:$0xff]  }
 0x193   : > { %4984 = vmatprep.subr.bf16.mxu0 %v5249_v58  ;;  %2517 = vmatpush1.bf16.msra.mxu1 %v5289_v4  ;;  %v6210_v4 = vld [vmem:[#allocation2 + $0x68] sm:$0xff]  }
 0x194   : > { %2518 = vmatprep.subr.bf16.mxu1 %v5304_v0 }
 0x196   : > { %4985 = vmatpush3.bf16.msra.mxu0 %v5249_v58  ;;  %v6192_v58 = vld [vmem:[#allocation2 + $0x60] sm:$0xff]  }
 0x197   : > { %3243 = vmatprep.subr.bf16.mxu0 %v5257_v12  ;;  %2519 = vmatpush1.bf16.msra.mxu1 %v5302_v61 }
 0x198   : > { %1934 = vmatmul.mubr.bf16.gmra.mxu1 %v5226_v35  ;;  %4955 = vmatmul.mubr.bf16.gmra.mxu0 %v5236_v37  ;;  %v6121_v35 = vld [vmem:[#allocation2 + $0x20] sm:$0xff]  }
 0x199   : > { %1943 = vmatprep.mubr.bf16.mxu1 %v5377_v2  ;;  %4958 = vmatprep.mubr.bf16.mxu0 %v5972_v51 }
 0x19a   : > { %5114 = vmatprep.subr.bf16.mxu1 %v6002_v13 }
 0x1a0   : > { %1944 = vmatmul.mubr.bf16.gmra.mxu1 %v5227_v41  ;;  %4959 = vmatmul.mubr.bf16.gmra.mxu0 %v5976_v32  ;;  %v5315_v41 = vld [vmem:[%s7176_s4 + $0x1e8] ss:$12 sps:$4 sm:$0xff]  }
 0x1a1   : > { %1953 = vmatprep.mubr.bf16.mxu1 %v5377_v2  ;;  %4962 = vmatprep.mubr.bf16.mxu0 %v5984_v38 }
 0x1a8   : > { %1954 = vmatmul.mubr.bf16.gmra.mxu1 %v5229_v47  ;;  %4963 = vmatmul.mubr.bf16.gmra.mxu0 %v5989_v3  ;;  %v5324_v47 = vld [vmem:[%s7176_s4 + $0x1a0] ss:$12 sps:$4 sm:$0xff]  }
 0x1a9   : > { %1963 = vmatprep.mubr.bf16.mxu1 %v5377_v2  ;;  %4966 = vmatprep.mubr.bf16.mxu0 %v5997_v1 }
 0x1b0   : > { %1964 = vmatmul.mubr.bf16.gmra.mxu1 %v5230_v49  ;;  %4967 = vmatmul.mubr.bf16.gmra.mxu0 %v6008_v5  ;;  %v5327_v49 = vld [vmem:[%s7176_s4 + $0x188] ss:$12 sps:$4 sm:$0xff]  }
 0x1b1   : > { %1973 = vmatprep.mubr.bf16.mxu1 %v5377_v2  ;;  %4986 = vmatprep.mubr.bf16.mxu0 %v6010_v8 }
 0x1b8   : > { %1974 = vmatmul.mubr.bf16.gmra.mxu1 %v5235_v63  ;;  %4987 = vmatmul.mubr.bf16.vlgmr.msra.gmra.mxu0 %v6015_v9  ;;  %v6186_v63 = vld [vmem:[#allocation2 + $0x58] sm:$0xff]  }
 0x1b9   : > { %3244 = vmatpush1.bf16.msra.mxu0 %v5255_v10  ;;  %1983 = vmatprep.mubr.bf16.mxu1 %v5377_v2 }
 0x1ba   : > { %4990 = vmatprep.mubr.bf16.mxu0 %v6020_v11  ;;  %3245 = vmatprep.subr.bf16.mxu0 %v5262_v14 }
 0x1bd   : > { %3246 = vmatpush1.bf16.msra.mxu0 %v5260_v15 }
 0x1be   : > { %3247 = vmatprep.subr.bf16.mxu0 %v5270_v16 }
 0x1c0   : > { %1984 = vmatmul.mubr.bf16.gmra.mxu1 %v5236_v37  ;;  %4991 = vmatmul.mubr.bf16.gmra.mxu0 %v6034_v54 }
 0x1c1   : > { %1993 = vmatprep.mubr.bf16.mxu1 %v5377_v2  ;;  %4994 = vmatprep.mubr.bf16.mxu0 %v6036_v17 }
 0x1c2   : > { %3248 = vmatpush1.bf16.msra.mxu0 %v5268_v18  ;;  %v6254_v18 = vld [vmem:[#allocation2 + $0x78] sm:$0xff]  }
 0x1c3   : > { %3249 = vmatprep.subr.bf16.mxu0 %v5275_v56 }
 0x1c6   : > { %3250 = vmatpush1.bf16.msra.mxu0 %v5273_v19 }
 0x1c7   : > { %3251 = vmatprep.subr.bf16.mxu0 %v5283_v20 }
 0x1c8   : > { %1994 = vmatmul.mubr.bf16.gmra.mxu1 %v5972_v51  ;;  %4995 = vmatmul.mubr.bf16.gmra.mxu0 %v6053_v59 }
 0x1c9   : > { %2003 = vmatprep.mubr.bf16.mxu1 %v5377_v2  ;;  %4998 = vmatprep.mubr.bf16.mxu0 %v6055_v22 }
 0x1ca   : > { %3252 = vmatpush1.bf16.msra.mxu0 %v5281_v24 }
 0x1cb   : > { %3253 = vmatprep.subr.bf16.mxu0 %v5288_v21 }
 0x1ce   : > { %3254 = vmatpush1.bf16.msra.mxu0 %v5286_v57 }
 0x1cf   : > { %3255 = vmatprep.subr.bf16.mxu0 %v5296_v43  ;;  %v6276_v43 = vld [vmem:[#allocation2 + $0x80] sm:$0xff]  }
 0x1d0   : > { %2004 = vmatmul.mubr.bf16.gmra.mxu1 %v5976_v32  ;;  %4999 = vmatmul.mubr.bf16.gmra.mxu0 %v6073_v25 }
 0x1d1   : > { %2013 = vmatprep.mubr.bf16.mxu1 %v5377_v2  ;;  %5002 = vmatprep.mubr.bf16.mxu0 %v6075_v44 }
 0x1d2   : > { %3256 = vmatpush1.bf16.msra.mxu0 %v5294_v6 }
 0x1d3   : > { %3257 = vmatprep.subr.bf16.mxu0 %v5301_v26 }
 0x1d6   : > { %3258 = vmatpush1.bf16.msra.mxu0 %v5299_v27 }
 0x1d7   : > { %5018 = vmatprep.subr.bf16.mxu0 %v6002_v13 }
 0x1d8   : > { %2014 = vmatmul.mubr.bf16.gmra.mxu1 %v5984_v38  ;;  %5003 = vmatmul.mubr.bf16.gmra.mxu0 %v6090_v23 }
 0x1d9   : > { %2023 = vmatprep.mubr.bf16.mxu1 %v5377_v2  ;;  %5006 = vmatprep.mubr.bf16.mxu0 %v6092_v28 }
 0x1e0   : > { %2024 = vmatmul.mubr.bf16.gmra.mxu1 %v5989_v3  ;;  %5007 = vmatmul.mubr.bf16.gmra.mxu0 %v6099_v29 }
 0x1e1   : > { %2033 = vmatprep.mubr.bf16.mxu1 %v5377_v2  ;;  %5010 = vmatprep.mubr.bf16.mxu0 %v6101_v30 }
 0x1e8   : > { %2034 = vmatmul.mubr.bf16.gmra.mxu1 %v5997_v1  ;;  %5011 = vmatmul.mubr.bf16.gmra.mxu0 %v6107_v55 }
 0x1e9   : > { %2043 = vmatprep.mubr.bf16.mxu1 %v5377_v2  ;;  %5014 = vmatprep.mubr.bf16.mxu0 %v6109_v33 }
 0x1f0   : > { %2044 = vmatmul.mubr.bf16.gmra.mxu1 %v6008_v5  ;;  %5015 = vmatmul.mubr.bf16.gmra.mxu0 %v6115_v34 }
 0x1f1   : > { %2536 = vmatprep.mubr.bf16.mxu1 %v5377_v2  ;;  %3275 = vmatprep.mubr.bf16.mxu0 %v5377_v2 }
 0x1f8   : > { %2537 = vmatmul.mubr.bf16.vlgmr.msra.gmra.mxu1 %v6010_v8  ;;  %3276 = vmatmul.mubr.bf16.vlgmr.msra.gmra.mxu0 %v6121_v35  ;;  %v6232_v8 = vld [vmem:[#allocation2 + $0x70] sm:$0xff]  }
 0x1f9   : > { %5019 = vmatpush3.bf16.msra.mxu0 %v6002_v13  ;;  %2546 = vmatprep.mubr.bf16.mxu1 %v5377_v2 }
 0x1fa   : > { %3285 = vmatprep.mubr.bf16.mxu0 %v5377_v2  ;;  %5020 = vmatprep.subr.bf16.mxu0 %v5309_v36 }
 0x1fb   : > { %5122 = vmatpush3.bf16.msra.mxu1 %v6002_v13 }
 0x1fc   : > { %5115 = vmatprep.subr.bf16.mxu1 %v5309_v36 }
 0x1fd   : > { %5021 = vmatpush3.bf16.msra.mxu0 %v5309_v36 }
 0x1fe   : > { %5022 = vmatprep.subr.bf16.mxu0 %v5312_v39 }
 0x1ff   : > { %5123 = vmatpush3.bf16.msra.mxu1 %v5309_v36  ;;  %v6298_v36 = vld [vmem:[#allocation2 + $0x88] sm:$0xff]  }
 0x200   : > { %2547 = vmatmul.mubr.bf16.gmra.mxu1 %v6015_v9  ;;  %3286 = vmatmul.mubr.bf16.gmra.mxu0 %v6135_v40 }
 0x201   : > { %2556 = vmatprep.mubr.bf16.mxu1 %v5377_v2  ;;  %3295 = vmatprep.mubr.bf16.mxu0 %v5377_v2 }
 0x202   : > { %5023 = vmatpush3.bf16.msra.mxu0 %v5312_v39  ;;  %5116 = vmatprep.subr.bf16.mxu1 %v5312_v39 }
 0x203   : > { %5024 = vmatprep.subr.bf16.mxu0 %v5315_v41  ;;  %5124 = vmatpush3.bf16.msra.mxu1 %v5312_v39 }
 0x204   : > { %5117 = vmatprep.subr.bf16.mxu1 %v5315_v41 }
 0x206   : > { %5025 = vmatpush3.bf16.msra.mxu0 %v5315_v41 }
 0x207   : > { %5026 = vmatprep.subr.bf16.mxu0 %v5318_v42  ;;  %5125 = vmatpush3.bf16.msra.mxu1 %v5315_v41 }
 0x208   : > { %2557 = vmatmul.mubr.bf16.gmra.mxu1 %v6020_v11  ;;  %3296 = vmatmul.mubr.bf16.gmra.mxu0 %v6147_v45 }
 0x209   : > { %2566 = vmatprep.mubr.bf16.mxu1 %v5377_v2  ;;  %3305 = vmatprep.mubr.bf16.mxu0 %v5377_v2 }
 0x20a   : > { %5027 = vmatpush3.bf16.msra.mxu0 %v5318_v42  ;;  %5118 = vmatprep.subr.bf16.mxu1 %v5318_v42 }
 0x20b   : > { %5028 = vmatprep.subr.bf16.mxu0 %v5321_v46  ;;  %5126 = vmatpush3.bf16.msra.mxu1 %v5318_v42 }
 0x20c   : > { %5119 = vmatprep.subr.bf16.mxu1 %v5321_v46 }
 0x20e   : > { %5029 = vmatpush3.bf16.msra.mxu0 %v5321_v46 }
 0x20f   : > { %5030 = vmatprep.subr.bf16.mxu0 %v5324_v47  ;;  %5127 = vmatpush3.bf16.msra.mxu1 %v5321_v46 }
 0x210   : > { %2567 = vmatmul.mubr.bf16.gmra.mxu1 %v6034_v54  ;;  %3306 = vmatmul.mubr.bf16.gmra.mxu0 %v6159_v48 }
 0x211   : > { %2576 = vmatprep.mubr.bf16.mxu1 %v5377_v2  ;;  %3315 = vmatprep.mubr.bf16.mxu0 %v5377_v2 }
 0x212   : > { %5031 = vmatpush3.bf16.msra.mxu0 %v5324_v47  ;;  %5120 = vmatprep.subr.bf16.mxu1 %v5324_v47 }
 0x213   : > { %5032 = vmatprep.subr.bf16.mxu0 %v5327_v49  ;;  %5128 = vmatpush3.bf16.msra.mxu1 %v5324_v47 }
 0x214   : > { %5121 = vmatprep.subr.bf16.mxu1 %v5327_v49 }
 0x216   : > { %5033 = vmatpush3.bf16.msra.mxu0 %v5327_v49 }
 0x217   : > { %5129 = vmatpush3.bf16.msra.mxu1 %v5327_v49 }
 0x218   : > { %2577 = vmatmul.mubr.bf16.gmra.mxu1 %v6036_v17  ;;  %3316 = vmatmul.mubr.bf16.gmra.mxu0 %v6168_v50 }
 0x219   : > { %2586 = vmatprep.mubr.bf16.mxu1 %v5377_v2  ;;  %3325 = vmatprep.mubr.bf16.mxu0 %v5377_v2 }
 0x220   : > { %2587 = vmatmul.mubr.bf16.gmra.mxu1 %v6053_v59  ;;  %3326 = vmatmul.mubr.bf16.gmra.mxu0 %v6174_v52 }
 0x221   : > { %2596 = vmatprep.mubr.bf16.mxu1 %v5377_v2  ;;  %3335 = vmatprep.mubr.bf16.mxu0 %v5377_v2 }
 0x228   : > { %2597 = vmatmul.mubr.bf16.gmra.mxu1 %v6055_v22  ;;  %3336 = vmatmul.mubr.bf16.gmra.mxu0 %v6180_v53 }
 0x229   : > { %2606 = vmatprep.mubr.bf16.mxu1 %v5377_v2  ;;  %3345 = vmatprep.mubr.bf16.mxu0 %v5377_v2 }
 0x230   : > { %2607 = vmatmul.mubr.bf16.gmra.mxu1 %v6073_v25  ;;  %3346 = vmatmul.mubr.bf16.gmra.mxu0 %v6186_v63 }
 0x231   : > { %2616 = vmatprep.mubr.bf16.mxu1 %v5377_v2  ;;  %3355 = vmatprep.mubr.bf16.mxu0 %v5377_v2 }
 0x238   : > { %v6194_v37 = vpop.f32.mrf.mxu1  ;;  %v6196_v12 = vpop.f32.mrf.mxu0  ;;  %2617 = vmatmul.mubr.bf16.gmra.mxu1 %v6075_v44  ;;  %3356 = vmatmul.mubr.bf16.gmra.mxu0 %v6192_v58 }
 0x239   : > { %2626 = vmatprep.mubr.bf16.mxu1 %v5377_v2  ;;  %3365 = vmatprep.mubr.bf16.mxu0 %v5377_v2 }
 0x23a   : > { %v6202_v7 = vpop.f32.mrf.mxu1  ;;  %v6204_v31 = vpop.f32.mrf.mxu0 }
 0x23c   : > { %v6206_v51 = vpop.f32.mrf.mxu1  ;;  %v6208_v32 = vpop.f32.mrf.mxu0 }
 0x23e   : > { %v6212_v60 = vpop.f32.mrf.mxu1  ;;  %v6214_v38 = vpop.f32.mrf.mxu0 }
 0x240   : > { %v6216_v3 = vpop.f32.mrf.mxu1  ;;  %v6218_v61 = vpop.f32.mrf.mxu0  ;;  %2627 = vmatmul.mubr.bf16.gmra.mxu1 %v6090_v23  ;;  %3366 = vmatmul.mubr.bf16.gmra.mxu0 %v6210_v4 }
 0x241   : > { %2636 = vmatprep.mubr.bf16.mxu1 %v5377_v2  ;;  %3375 = vmatprep.mubr.bf16.mxu0 %v5377_v2 }
 0x242   : > { %v6224_v0 = vpop.f32.mrf.mxu1  ;;  %v6226_v1 = vpop.f32.mrf.mxu0 }
 0x244   : > { %v6228_v13 = vpop.f32.mrf.mxu1  ;;  %v6230_v5 = vpop.f32.mrf.mxu0 }
 0x246   : > { %v6234_v9 = vpop.f32.mrf.mxu1  ;;  %v6236_v10 = vpop.f32.mrf.mxu0 }
 0x248   : > { %v6238_v11 = vpop.f32.mrf.mxu1  ;;  %v6240_v14 = vpop.f32.mrf.mxu0  ;;  %2637 = vmatmul.mubr.bf16.gmra.mxu1 %v6092_v28  ;;  %3376 = vmatmul.mubr.bf16.gmra.mxu0 %v6232_v8 }
 0x249   : > { %2646 = vmatprep.mubr.bf16.mxu1 %v5377_v2  ;;  %3385 = vmatprep.mubr.bf16.mxu0 %v5377_v2 }
 0x24a   : > { %v6246_v15 = vpop.f32.mrf.mxu1  ;;  %v6248_v16 = vpop.f32.mrf.mxu0 }
 0x24c   : > { %v6250_v54 = vpop.f32.mrf.mxu1  ;;  %v6252_v17 = vpop.f32.mrf.mxu0 }
 0x24d   : > { %7182 = vst [vmem:[#allocation3_spill] sm:$0xff] %v6250_v54 }
 0x24e   : > { %v6256_v56 = vpop.f32.mrf.mxu1  ;;  %v6258_v19 = vpop.f32.mrf.mxu0 }
 0x24f   : > { %7183 = vst [vmem:[#allocation4_spill] sm:$0xff] %v6256_v56 }
 0x250   : > { %v6260_v20 = vpop.f32.mrf.mxu1  ;;  %v6262_v59 = vpop.f32.mrf.mxu0  ;;  %2647 = vmatmul.mubr.bf16.gmra.mxu1 %v6099_v29  ;;  %3386 = vmatmul.mubr.bf16.gmra.mxu0 %v6254_v18 }
 0x251   : > { %7184 = vst [vmem:[#allocation5_spill] sm:$0xff] %v6260_v20  ;;  %2656 = vmatprep.mubr.bf16.mxu1 %v5377_v2  ;;  %3395 = vmatprep.mubr.bf16.mxu0 %v5377_v2 }
 0x252   : > { %v6268_v22 = vpop.f32.mrf.mxu1  ;;  %v6270_v24 = vpop.f32.mrf.mxu0 }
 0x253   : > { %7185 = vst [vmem:[#allocation6_spill] sm:$0xff] %v6268_v22 }
 0x254   : > { %v6272_v21 = vpop.f32.mrf.mxu1  ;;  %v6274_v57 = vpop.f32.mrf.mxu0 }
 0x255   : > { %7186 = vst [vmem:[#allocation7_spill] sm:$0xff] %v6272_v21  ;;  %v6342_v21 = vld [vmem:[#allocation2 + $0x98] sm:$0xff]  }
 0x256   : > { %v6278_v25 = vpop.f32.mrf.mxu1  ;;  %v6280_v44 = vpop.f32.mrf.mxu0 }
 0x257   : > { %7187 = vst [vmem:[#allocation8_spill] sm:$0xff] %v6278_v25 }
 0x258   : > { %v6282_v6 = vpop.f32.mrf.mxu1  ;;  %v6284_v26 = vpop.f32.mrf.mxu0  ;;  %2657 = vmatmul.mubr.bf16.gmra.mxu1 %v6101_v30  ;;  %3396 = vmatmul.mubr.bf16.gmra.mxu0 %v6276_v43 }
 0x259   : > { %7188 = vst [vmem:[#allocation9_spill] sm:$0xff] %v6282_v6  ;;  %2666 = vmatprep.mubr.bf16.mxu1 %v5377_v2  ;;  %3405 = vmatprep.mubr.bf16.mxu0 %v5377_v2 }
 0x25a   : > { %v6290_v27 = vpop.f32.mrf.mxu1  ;;  %v6292_v23 = vpop.f32.mrf.mxu0 }
 0x25b   : > { %7189 = vst [vmem:[#allocation10_spill] sm:$0xff] %v6290_v27 }
 0x25c   : > { %v6294_v28 = vpop.f32.mrf.mxu1  ;;  %v6296_v29 = vpop.f32.mrf.mxu0 }
 0x25d   : > { %7190 = vst [vmem:[#allocation11_spill] sm:$0xff] %v6294_v28  ;;  %v6320_v28 = vld [vmem:[#allocation2 + $0x90] sm:$0xff]  }
 0x25e   : > { %v6300_v39 = vpop.f32.mrf.mxu1  ;;  %v6302_v41 = vpop.f32.mrf.mxu0 }
 0x25f   : > { %7191 = vst [vmem:[#allocation12_spill] sm:$0xff] %v6300_v39 }
 0x260   : > { %v6304_v30 = vpop.f32.mrf.mxu1  ;;  %v6306_v42 = vpop.f32.mrf.mxu0  ;;  %2667 = vmatmul.mubr.bf16.gmra.mxu1 %v6107_v55  ;;  %3406 = vmatmul.mubr.bf16.gmra.mxu0 %v6298_v36 }
 0x261   : > { %7192 = vst [vmem:[#allocation13_spill] sm:$0xff] %v6304_v30  ;;  %2676 = vmatprep.mubr.bf16.mxu1 %v5377_v2  ;;  %3415 = vmatprep.mubr.bf16.mxu0 %v5377_v2 }
 0x262   : > { %v6312_v46 = vpop.f32.mrf.mxu1  ;;  %v6314_v47 = vpop.f32.mrf.mxu0 }
 0x263   : > { %7193 = vst [vmem:[#allocation14_spill] sm:$0xff] %v6312_v46 }
 0x264   : > { %v6316_v49 = vpop.f32.mrf.mxu1  ;;  %v6318_v39 = vpop.f32.mrf.mxu0 }
 0x265   : > { %7194 = vst [vmem:[#allocation15_spill] sm:$0xff] %v6316_v49 }
 0x266   : > { %v6322_v30 = vpop.f32.mrf.mxu1  ;;  %v6324_v27 = vpop.f32.mrf.mxu0 }
 0x267   : > { %7195 = vst [vmem:[#allocation16_spill] sm:$0xff] %v6322_v30 }
 0x268   : > { %v6326_v55 = vpop.f32.mrf.mxu1  ;;  %v6328_v6 = vpop.f32.mrf.mxu0  ;;  %2677 = vmatmul.mubr.bf16.gmra.mxu1 %v6109_v33  ;;  %3416 = vmatmul.mubr.bf16.gmra.mxu0 %v6320_v28 }
 0x269   : > { %7196 = vst [vmem:[#allocation17_spill] sm:$0xff] %v6326_v55  ;;  %2686 = vmatprep.mubr.bf16.mxu1 %v5377_v2  ;;  %3425 = vmatprep.mubr.bf16.mxu0 %v5377_v2 }
 0x26a   : > { %v6334_v49 = vpop.f32.mrf.mxu1  ;;  %v6336_v46 = vpop.f32.mrf.mxu0 }
 0x26b   : > { %7197 = vst [vmem:[#allocation18_spill] sm:$0xff] %v6334_v49 }
 0x26c   : > { %v6338_v25 = vpop.f32.mrf.mxu1  ;;  %v6340_v30 = vpop.f32.mrf.mxu0 }
 0x26d   : > { %7198 = vst [vmem:[#allocation19_spill] sm:$0xff] %v6338_v25 }
 0x26e   : > { %v6344_v55 = vpop.f32.mrf.mxu1  ;;  %v6346_v22 = vpop.f32.mrf.mxu0 }
 0x26f   : > { %7199 = vst [vmem:[#allocation20_spill] sm:$0xff] %v6344_v55 }
 0x270   : > { %v6348_v33 = vpop.f32.mrf.mxu1  ;;  %v6350_v20 = vpop.f32.mrf.mxu0  ;;  %2687 = vmatmul.mubr.bf16.gmra.mxu1 %v6115_v34  ;;  %3426 = vmatmul.mubr.bf16.gmra.mxu0 %v6342_v21 }
 0x271   : > { %7200 = vst [vmem:[#allocation21_spill] sm:$0xff] %v6348_v33  ;;  %5034 = vmatprep.mubr.bf16.mxu0 %v6121_v35  ;;  %5046 = vmatprep.mubr.bf16.mxu1 %v6180_v53 }
 0x272   : > { %v6356_v2 = vpop.f32.mrf.mxu1  ;;  %v6358_v25 = vpop.f32.mrf.mxu0 }
 0x273   : > { %7201 = vst [vmem:[#allocation22_spill] sm:$0xff] %v6356_v2 }
 0x274   : > { %v6360_v49 = vpop.f32.mrf.mxu1  ;;  %v6362_v55 = vpop.f32.mrf.mxu0 }
 0x275   : > { %7202 = vst [vmem:[#allocation23_spill] sm:$0xff] %v6360_v49 }
 0x276   : > { %v6364_v56 = vpop.f32.mrf.mxu1  ;;  %v6366_v33 = vpop.f32.mrf.mxu0 }
 0x277   : > { %7203 = vst [vmem:[#allocation24_spill] sm:$0xff] %v6364_v56 }
 0x278   : > { %v6368_v54 = vpop.f32.mrf.mxu1  ;;  %v4988_v34 = vpop.f32.mrf.mxu0  ;;  %5035 = vmatmul.mubr.bf16.vlgmr.msra.gmra.mxu0 %v6135_v40  ;;  %5047 = vmatmul.mubr.bf16.vlgmr.msra.gmra.mxu1 %v6186_v63 }
 0x279   : > { %7204 = vst [vmem:[#allocation25_spill] sm:$0xff] %v6368_v54  ;;  %v6373_v35 = vadd.f32 %v4988_v34, %v6196_v12  ;;  %5038 = vmatprep.mubr.bf16.mxu0 %v6147_v45  ;;  %5050 = vmatprep.mubr.bf16.mxu1 %v6192_v58 }
 0x27a   : > { %v6377_v53 = vpop.f32.mrf.mxu1  ;;  %v2731_v49 = vpop.f32.mrf.mxu0 }
 0x27b   : > { %v6380_v56 = vadd.f32 %v2731_v49, %v6204_v31 }
 0x27c   : > { %v6382_v2 = vpop.f32.mrf.mxu1  ;;  %v4989_v54 = vpop.f32.mrf.mxu0 }
 0x27d   : > { %v6385_v40 = vadd.f32 %v4989_v54, %v6208_v32 }
 0x27e   : > { %v6387_v63 = vpop.f32.mrf.mxu1  ;;  %v2734_v12 = vpop.f32.mrf.mxu0 }
 0x27f   : > { %v6390_v34 = vadd.f32 %v2734_v12, %v6214_v38 }
 0x280   : > { %v6392_v45 = vpop.f32.mrf.mxu1  ;;  %v4992_v58 = vpop.f32.mrf.mxu0  ;;  %5039 = vmatmul.mubr.bf16.gmra.mxu0 %v6159_v48  ;;  %5051 = vmatmul.mubr.bf16.gmra.mxu1 %v6210_v4 }
 0x281   : > { %7205 = vst [vmem:[#allocation26_spill] sm:$0xff] %v6390_v34  ;;  %v6397_v31 = vadd.f32 %v4992_v58, %v6218_v61  ;;  %5042 = vmatprep.mubr.bf16.mxu0 %v6168_v50  ;;  %5054 = vmatprep.mubr.bf16.mxu1 %v6232_v8 }
 0x282   : > { %v6401_v32 = vpop.f32.mrf.mxu1  ;;  %v2747_v54 = vpop.f32.mrf.mxu0 }
 0x283   : > { %7206 = vst [vmem:[#allocation27_spill] sm:$0xff] %v6397_v31  ;;  %v6404_v38 = vadd.f32 %v2747_v54, %v6226_v1 }
 0x284   : > { %v6406_v49 = vpop.f32.mrf.mxu1  ;;  %v4993_v12 = vpop.f32.mrf.mxu0 }
 0x285   : > { %7207 = vst [vmem:[#allocation28_spill] sm:$0xff] %v6404_v38  ;;  %v6409_v48 = vadd.f32 %v4993_v12, %v6230_v5 }
 0x286   : > { %v6411_v4 = vpop.f32.mrf.mxu1  ;;  %v2750_v61 = vpop.f32.mrf.mxu0 }
 0x287   : > { %7208 = vst [vmem:[#allocation29_spill] sm:$0xff] %v6409_v48  ;;  %v6414_v58 = vadd.f32 %v2750_v61, %v6236_v10 }
 0x288   : > { %v6416_v50 = vpop.f32.mrf.mxu1  ;;  %v4996_v8 = vpop.f32.mrf.mxu0  ;;  %5043 = vmatmul.mubr.bf16.gmra.mxu0 %v6174_v52  ;;  %5055 = vmatmul.mubr.bf16.gmra.mxu1 %v6254_v18 }
 0x289   : > { %7209 = vst [vmem:[#allocation30_spill] sm:$0xff] %v6414_v58  ;;  %v6421_v1 = vadd.f32 %v4996_v8, %v6240_v14  ;;  %5058 = vmatprep.mubr.bf16.mxu1 %v6276_v43 }
 0x28a   : > { %v6424_v5 = vpop.f32.mrf.mxu1  ;;  %v2763_v54 = vpop.f32.mrf.mxu0 }
 0x28b   : > { %7210 = vst [vmem:[#allocation31_spill] sm:$0xff] %v6421_v1  ;;  %v6427_v12 = vadd.f32 %v2763_v54, %v6248_v16 }
 0x28c   : > { %v6429_v10 = vpop.f32.mrf.mxu1  ;;  %v4997_v61 = vpop.f32.mrf.mxu0 }
 0x28d   : > { %7211 = vst [vmem:[#allocation32_spill] sm:$0xff] %v6427_v12  ;;  %v6432_v58 = vadd.f32 %v4997_v61, %v6252_v17 }
 0x28e   : > { %v6434_v52 = vpop.f32.mrf.mxu1  ;;  %v2766_v18 = vpop.f32.mrf.mxu0 }
 0x28f   : > { %7212 = vst [vmem:[#allocation33_spill] sm:$0xff] %v6432_v58  ;;  %v6437_v14 = vadd.f32 %v2766_v18, %v6258_v19 }
 0x290   : > { %v6439_v8 = vpop.f32.mrf.mxu1  ;;  %v5000_v43 = vpop.f32.mrf.mxu0  ;;  %5059 = vmatmul.mubr.bf16.gmra.mxu1 %v6298_v36 }
 0x291   : > { %7213 = vst [vmem:[#allocation34_spill] sm:$0xff] %v6437_v14  ;;  %v6443_v16 = vadd.f32 %v5000_v43, %v6262_v59  ;;  %5062 = vmatprep.mubr.bf16.mxu1 %v6320_v28 }
 0x292   : > { %v6446_v54 = vpop.f32.mrf.mxu1  ;;  %v2779_v17 = vpop.f32.mrf.mxu0 }
 0x293   : > { %v6449_v61 = vadd.f32 %v2779_v17, %v6270_v24 }
 0x294   : > { %v6451_v58 = vpop.f32.mrf.mxu1  ;;  %v5001_v19 = vpop.f32.mrf.mxu0 }
 0x295   : > { %v6454_v18 = vadd.f32 %v5001_v19, %v6274_v57 }
 0x296   : > { %v6456_v14 = vpop.f32.mrf.mxu1  ;;  %v2782_v36 = vpop.f32.mrf.mxu0 }
 0x297   : > { %v6459_v59 = vadd.f32 %v2782_v36, %v6280_v44 }
 0x298   : > { %v6461_v43 = vpop.f32.mrf.mxu1  ;;  %v5004_v28 = vpop.f32.mrf.mxu0  ;;  %5063 = vmatmul.mubr.bf16.gmra.mxu1 %v6342_v21 }
 0x299   : > { %7214 = vst [vmem:[#allocation35_spill] sm:$0xff] %v6459_v59  ;;  %v6465_v24 = vadd.f32 %v5004_v28, %v6284_v26 }
 0x29a   : > { %v6467_v17 = vpop.f32.mrf.mxu1  ;;  %v2795_v12 = vpop.f32.mrf.mxu0 }
 0x29b   : > { %7215 = vst [vmem:[#allocation36_spill] sm:$0xff] %v6465_v24  ;;  %v6470_v57 = vadd.f32 %v2795_v12, %v6292_v23 }
 0x29c   : > { %v6472_v19 = vpop.f32.mrf.mxu1  ;;  %v5005_v1 = vpop.f32.mrf.mxu0 }
 0x29d   : > { %7216 = vst [vmem:[#allocation37_spill] sm:$0xff] %v6470_v57  ;;  %v6475_v44 = vadd.f32 %v5005_v1, %v6296_v29 }
 0x29e   : > { %v6477_v36 = vpop.f32.mrf.mxu1  ;;  %v2798_v48 = vpop.f32.mrf.mxu0 }
 0x29f   : > { %7217 = vst [vmem:[#allocation38_spill] sm:$0xff] %v6475_v44  ;;  %v6480_v21 = vadd.f32 %v2798_v48, %v6302_v41 }
 0x2a0   : > { %v6482_v26 = vpop.f32.mrf.mxu1  ;;  %v5008_v28 = vpop.f32.mrf.mxu0 }
 0x2a1   : > { %7218 = vst [vmem:[#allocation39_spill] sm:$0xff] %v6480_v21  ;;  %v6485_v38 = vadd.f32 %v5008_v28, %v6306_v42 }
 0x2a2   : > { %v6487_v23 = vpop.f32.mrf.mxu1  ;;  %v2811_v12 = vpop.f32.mrf.mxu0 }
 0x2a3   : > { %7219 = vst [vmem:[#allocation40_spill] sm:$0xff] %v6485_v38  ;;  %v6490_v57 = vadd.f32 %v2811_v12, %v6314_v47 }
 0x2a4   : > { %v6492_v29 = vpop.f32.mrf.mxu1  ;;  %v5009_v1 = vpop.f32.mrf.mxu0 }
 0x2a5   : > { %7220 = vst [vmem:[#allocation41_spill] sm:$0xff] %v6490_v57  ;;  %v6495_v44 = vadd.f32 %v5009_v1, %v6318_v39 }
 0x2a6   : > { %v6497_v41 = vpop.f32.mrf.mxu1  ;;  %v2814_v48 = vpop.f32.mrf.mxu0 }
 0x2a7   : > { %7221 = vst [vmem:[#allocation42_spill] sm:$0xff] %v6495_v44  ;;  %v6500_v21 = vadd.f32 %v2814_v48, %v6324_v27  ;;  %v5329_v27 = vld [vmem:[%s7178_s6 + $0x38] sm:$0xff]  }
 0x2a8   : > { %v6502_v42 = vpop.f32.mrf.mxu1  ;;  %v5012_v28 = vpop.f32.mrf.mxu0  ;;  %5066 = vmatprep.subr.bf16.mxu1 %v5329_v27 }
 0x2a9   : > { %7222 = vst [vmem:[#allocation43_spill] sm:$0xff] %v6500_v21  ;;  %v6505_v38 = vadd.f32 %v5012_v28, %v6328_v6  ;;  %5067 = vmatpush3.bf16.msra.mxu1 %v5329_v27 }
 0x2aa   : > { %v6507_v47 = vpop.f32.mrf.mxu1  ;;  %v2827_v12 = vpop.f32.mrf.mxu0 }
 0x2ab   : > { %7223 = vst [vmem:[#allocation44_spill] sm:$0xff] %v6505_v38  ;;  %v6510_v57 = vadd.f32 %v2827_v12, %v6336_v46 }
 0x2ac   : > { %v6512_v39 = vpop.f32.mrf.mxu1  ;;  %v5013_v1 = vpop.f32.mrf.mxu0 }
 0x2ad   : > { %7224 = vst [vmem:[#allocation45_spill] sm:$0xff] %v6510_v57  ;;  %v6515_v44 = vadd.f32 %v5013_v1, %v6340_v30  ;;  %v5330_v30 = vld [vmem:[%s7178_s6 + $0x30] sm:$0xff]  }
 0x2ae   : > { %v6520_v48 = vpop.f32.mrf.mxu1  ;;  %v2830_v6 = vpop.f32.mrf.mxu0  ;;  %5068 = vmatprep.subr.bf16.mxu1 %v5330_v30 }
 0x2af   : > { %7225 = vst [vmem:[#allocation46_spill] sm:$0xff] %v6515_v44  ;;  %v6523_v28 = vadd.f32 %v2830_v6, %v6346_v22  ;;  %5069 = vmatpush3.bf16.msra.mxu1 %v5330_v30 }
 0x2b0   : > { %v6525_v38 = vpop.f32.mrf.mxu1  ;;  %v5016_v46 = vpop.f32.mrf.mxu0 }
 0x2b1   : > { %7226 = vst [vmem:[#allocation47_spill] sm:$0xff] %v6523_v28  ;;  %v6528_v12 = vadd.f32 %v5016_v46, %v6350_v20 }
 0x2b2   : > { %v6533_v1 = vpop.f32.mrf.mxu1  ;;  %v2843_v44 = vpop.f32.mrf.mxu0 }
 0x2b3   : > { %7227 = vst [vmem:[#allocation48_spill] sm:$0xff] %v6528_v12  ;;  %v6536_v57 = vadd.f32 %v2843_v44, %v6358_v25  ;;  %v5331_v12 = vld [vmem:[%s7178_s6 + $0x28] sm:$0xff]  }
 0x2b4   : > { %v6538_v22 = vpop.f32.mrf.mxu1  ;;  %v5017_v6 = vpop.f32.mrf.mxu0  ;;  %5070 = vmatprep.subr.bf16.mxu1 %v5331_v12 }
 0x2b5   : > { %7228 = vst [vmem:[#allocation49_spill] sm:$0xff] %v6536_v57  ;;  %v6541_v27 = vadd.f32 %v5017_v6, %v6362_v55  ;;  %5071 = vmatpush3.bf16.msra.mxu1 %v5331_v12  ;;  %v5332_v55 = vld [vmem:[%s7178_s6 + $0x20] sm:$0xff]  }
 0x2b6   : > { %v6543_v20 = vpop.f32.mrf.mxu1  ;;  %v2846_v46 = vpop.f32.mrf.mxu0  ;;  %5072 = vmatprep.subr.bf16.mxu1 %v5332_v55 }
 0x2b7   : > { %7229 = vst [vmem:[#allocation50_spill] sm:$0xff] %v6541_v27  ;;  %v6549_v28 = vadd.f32 %v2846_v46, %v6366_v33 }
 0x2b8   : > { %v2538_v25 = vpop.f32.mrf.mxu1  ;;  %v3277_v44 = vpop.f32.mrf.mxu0 }
 0x2b9   : > { %7230 = vst [vmem:[#allocation51_spill] sm:$0xff] %v6549_v28  ;;  %v2858_v57 = vadd.f32 %v2538_v25, %v6194_v37  ;;  %5073 = vmatpush3.bf16.msra.mxu1 %v5332_v55 }
 0x2ba   : > { %v2540_v30 = vpop.f32.mrf.mxu1  ;;  %v3279_v21 = vpop.f32.mrf.mxu0 }
 0x2bb   : > { %v6555_v6 = vadd.f32 %v3277_v44, %v2858_v57  ;;  %v2890_v27 = vadd.f32 %v2540_v30, %v6202_v7  ;;  %v5333_v57 = vld [vmem:[%s7178_s6 + $0x18] sm:$0xff]  }
 0x2bc   : > { %v2542_v24 = vpop.f32.mrf.mxu1  ;;  %v3281_v31 = vpop.f32.mrf.mxu0  ;;  %5074 = vmatprep.subr.bf16.mxu1 %v5333_v57 }
 0x2bd   : > { %v6558_v33 = vadd.f32 %v3279_v21, %v2890_v27  ;;  %v2859_v46 = vadd.f32 %v2542_v24, %v6206_v51  ;;  %v7181_v30 = vrot.slane %v6555_v6, 7  ;;  %5075 = vmatpush3.bf16.msra.mxu1 %v5333_v57 }
 0x2be   : > { %v2544_v37 = vpop.f32.mrf.mxu1  ;;  %v3283_v12 = vpop.f32.mrf.mxu0 }
 0x2bf   : > { %v3598_v25 = vadd.f32 %v3281_v31, %v2859_v46  ;;  %v2891_v28 = vadd.f32 %v2544_v37, %v6212_v60 }
 0x2c0   : > { %v2548_v7 = vpop.f32.mrf.mxu1  ;;  %v3287_v44 = vpop.f32.mrf.mxu0 }
 0x2c1   : > { %v3694_v21 = vrot.slane %v3598_v25, 7  ;;  %v3630_v27 = vadd.f32 %v3283_v12, %v2891_v28  ;;  %v2860_v51 = vadd.f32 %v2548_v7, %v6216_v3  ;;  %v5334_v3 = vld [vmem:[%s7178_s6 + $0x10] sm:$0xff]  }
 0x2c2   : > { %v2550_v24 = vpop.f32.mrf.mxu1  ;;  %v3289_v55 = vpop.f32.mrf.mxu0  ;;  %5076 = vmatprep.subr.bf16.mxu1 %v5334_v3 }
 0x2c3   : > { %v3758_v60 = vsel %vm3727_vm0, %v7181_v30, %v3694_v21  ;;  %v3599_v31 = vadd.f32 %v3287_v44, %v2860_v51  ;;  %v2892_v46 = vadd.f32 %v2550_v24, %v6224_v0  ;;  %5077 = vmatpush3.bf16.msra.mxu1 %v5334_v3 }
 0x2c4   : > { %v6573_v37 = vadd.f32 %v3758_v60, %v3630_v27  ;;  %v2552_v59 = vpop.f32.mrf.mxu1  ;;  %v3291_v34 = vpop.f32.mrf.mxu0 }
 0x2c5   : > { %v3695_v28 = vrot.slane %v3599_v31, 7  ;;  %v3631_v12 = vadd.f32 %v3289_v55, %v2892_v46  ;;  %v2861_v25 = vadd.f32 %v2552_v59, %v6228_v13  ;;  %v5335_v13 = vld [vmem:[%s7178_s6 + $0x8] sm:$0xff]  }
 0x2c6   : > { %7231 = vst [vmem:[#allocation52_spill] sm:$0xff] %v6573_v37  ;;  %v2554_v57 = vpop.f32.mrf.mxu1  ;;  %v3293_v7 = vpop.f32.mrf.mxu0  ;;  %5078 = vmatprep.subr.bf16.mxu1 %v5335_v13 }
 0x2c7   : > { %v3757_v44 = vsel %vm3727_vm0, %v3694_v21, %v3695_v28  ;;  %v3600_v51 = vadd.f32 %v3291_v34, %v2861_v25  ;;  %v2893_v0 = vadd.f32 %v2554_v57, %v6234_v9  ;;  %5079 = vmatpush3.bf16.msra.mxu1 %v5335_v13  ;;  %v7234_v57 = vld [vmem:[#allocation3_spill] sm:$0xff] }
 0x2c8   : > { %v6582_v27 = vadd.f32 %v3757_v44, %v3631_v12  ;;  %v2558_v24 = vpop.f32.mrf.mxu1  ;;  %v3297_v60 = vpop.f32.mrf.mxu0  ;;  %v5336_v13 = vld [vmem:[%s7178_s6] sm:$0xff]  }
 0x2c9   : > { %v3696_v30 = vrot.slane %v3600_v51, 7  ;;  %v3632_v37 = vadd.f32 %v3293_v7, %v2893_v0  ;;  %v2862_v55 = vadd.f32 %v2558_v24, %v6238_v11  ;;  %5080 = vmatprep.subr.bf16.mxu1 %v5336_v13 }
 0x2ca   : > { %7232 = vst [vmem:[#allocation53_spill] sm:$0xff] %v6582_v27  ;;  %v2560_v59 = vpop.f32.mrf.mxu1  ;;  %v3299_v31 = vpop.f32.mrf.mxu0  ;;  %v7241_v27 = vld [vmem:[#allocation8_spill] sm:$0xff] }
 0x2cb   : > { %v3756_v34 = vsel %vm3727_vm0, %v3695_v28, %v3696_v30  ;;  %v3601_v21 = vadd.f32 %v3297_v60, %v2862_v55  ;;  %v2894_v9 = vadd.f32 %v2560_v59, %v6246_v15  ;;  %v7235_v28 = vld [vmem:[#allocation4_spill] sm:$0xff]  ;;  %5081 = vmatpush3.bf16.msra.mxu1 %v5336_v13 }
 0x2cc   : > { %v6591_v46 = vadd.f32 %v3756_v34, %v3632_v37  ;;  %v2562_v3 = vpop.f32.mrf.mxu1  ;;  %v3301_v12 = vpop.f32.mrf.mxu0  ;;  %v7237_v34 = vld [vmem:[#allocation5_spill] sm:$0xff] }
 0x2cd   : > { %v3697_v25 = vrot.slane %v3601_v21, 7  ;;  %v3633_v11 = vadd.f32 %v3299_v31, %v2894_v9  ;;  %v2863_v7 = vadd.f32 %v2562_v3, %v7234_v57  ;;  %v7238_v57 = vld [vmem:[#allocation6_spill] sm:$0xff] }
 0x2ce   : > { %7233 = vst [vmem:[#allocation54_spill] sm:$0xff] %v6591_v46  ;;  %v2564_v44 = vpop.f32.mrf.mxu1  ;;  %v3303_v51 = vpop.f32.mrf.mxu0 }
 0x2cf   : > { %v3755_v0 = vsel %vm3727_vm0, %v3696_v30, %v3697_v25  ;;  %v3602_v24 = vadd.f32 %v3301_v12, %v2863_v7  ;;  %v2895_v60 = vadd.f32 %v2564_v44, %v7235_v28 }
 0x2d0   : > { %v6597_v55 = vadd.f32 %v3755_v0, %v3633_v11  ;;  %v2568_v15 = vpop.f32.mrf.mxu1  ;;  %v3307_v37 = vpop.f32.mrf.mxu0 }
 0x2d1   : > { %v3698_v59 = vrot.slane %v3602_v24, 7  ;;  %v3634_v31 = vadd.f32 %v3303_v51, %v2895_v60  ;;  %v2864_v21 = vadd.f32 %v2568_v15, %v7237_v34  ;;  %v7240_v24 = vld [vmem:[#allocation7_spill] sm:$0xff] }
 0x2d2   : > { %7236 = vst [vmem:[#allocation3_spill] sm:$0xff] %v6597_v55  ;;  %v2570_v9 = vpop.f32.mrf.mxu1  ;;  %v3309_v3 = vpop.f32.mrf.mxu0 }
 0x2d3   : > { %v3754_v30 = vsel %vm3727_vm0, %v3697_v25, %v3698_v59  ;;  %v3603_v12 = vadd.f32 %v3307_v37, %v2864_v21  ;;  %v2896_v11 = vadd.f32 %v2570_v9, %v7238_v57 }
 0x2d4   : > { %v6606_v7 = vadd.f32 %v3754_v30, %v3634_v31  ;;  %v2572_v44 = vpop.f32.mrf.mxu1  ;;  %v3311_v0 = vpop.f32.mrf.mxu0  ;;  %v7243_v30 = vld [vmem:[#allocation9_spill] sm:$0xff] }
 0x2d5   : > { %v3699_v28 = vrot.slane %v3603_v12, 7  ;;  %v3635_v55 = vadd.f32 %v3309_v3, %v2896_v11  ;;  %v2865_v51 = vadd.f32 %v2572_v44, %v7240_v24  ;;  %v7244_v24 = vld [vmem:[#allocation10_spill] sm:$0xff] }
 0x2d6   : > { %7239 = vst [vmem:[#allocation4_spill] sm:$0xff] %v6606_v7  ;;  %v2574_v60 = vpop.f32.mrf.mxu1  ;;  %v3313_v15 = vpop.f32.mrf.mxu0 }
 0x2d7   : > { %v3753_v34 = vsel %vm3727_vm0, %v3698_v59, %v3699_v28  ;;  %v3604_v46 = vadd.f32 %v3311_v0, %v2865_v51  ;;  %v2897_v25 = vadd.f32 %v2574_v60, %v7241_v27  ;;  %v7246_v60 = vld [vmem:[#allocation11_spill] sm:$0xff] }
 0x2d8   : > { %v6612_v37 = vadd.f32 %v3753_v34, %v3635_v55  ;;  %v2578_v21 = vpop.f32.mrf.mxu1  ;;  %v3317_v13 = vpop.f32.mrf.mxu0 }
 0x2d9   : > { %v3700_v31 = vrot.slane %v3604_v46, 7  ;;  %v3636_v9 = vadd.f32 %v3313_v15, %v2897_v25  ;;  %v2866_v57 = vadd.f32 %v2578_v21, %v7243_v30  ;;  %v7247_v30 = vld [vmem:[#allocation12_spill] sm:$0xff] }
 0x2da   : > { %7242 = vst [vmem:[#allocation5_spill] sm:$0xff] %v6612_v37  ;;  %v2580_v12 = vpop.f32.mrf.mxu1  ;;  %v3319_v3 = vpop.f32.mrf.mxu0 }
 0x2db   : > { %v3752_v11 = vsel %vm3727_vm0, %v3699_v28, %v3700_v31  ;;  %v3605_v44 = vadd.f32 %v3317_v13, %v2866_v57  ;;  %v2898_v7 = vadd.f32 %v2580_v12, %v7244_v24 }
 0x2dc   : > { %v6618_v59 = vadd.f32 %v3752_v11, %v3636_v9  ;;  %v2582_v0 = vpop.f32.mrf.mxu1  ;;  %v3321_v27 = vpop.f32.mrf.mxu0  ;;  %v7249_v11 = vld [vmem:[#allocation13_spill] sm:$0xff] }
 0x2dd   : > { %v3701_v55 = vrot.slane %v3605_v44, 7  ;;  %v3637_v51 = vadd.f32 %v3319_v3, %v2898_v7  ;;  %v2867_v34 = vadd.f32 %v2582_v0, %v7246_v60  ;;  %v7250_v60 = vld [vmem:[#allocation14_spill] sm:$0xff] }
 0x2de   : > { %7245 = vst [vmem:[#allocation6_spill] sm:$0xff] %v6618_v59  ;;  %v2584_v46 = vpop.f32.mrf.mxu1  ;;  %v3323_v15 = vpop.f32.mrf.mxu0 }
 0x2df   : > { %v3751_v25 = vsel %vm3727_vm0, %v3700_v31, %v3701_v55  ;;  %v3606_v21 = vadd.f32 %v3321_v27, %v2867_v34  ;;  %v2899_v37 = vadd.f32 %v2584_v46, %v7247_v30 }
 0x2e0   : > { %v6624_v28 = vadd.f32 %v3751_v25, %v3637_v51  ;;  %v2588_v13 = vpop.f32.mrf.mxu1  ;;  %v3327_v57 = vpop.f32.mrf.mxu0  ;;  %v7252_v25 = vld [vmem:[#allocation15_spill] sm:$0xff] }
 0x2e1   : > { %v3702_v9 = vrot.slane %v3606_v21, 7  ;;  %v3638_v12 = vadd.f32 %v3323_v15, %v2899_v37  ;;  %v2868_v24 = vadd.f32 %v2588_v13, %v7249_v11  ;;  %v7253_v11 = vld [vmem:[#allocation16_spill] sm:$0xff] }
 0x2e2   : > { %7248 = vst [vmem:[#allocation7_spill] sm:$0xff] %v6624_v28  ;;  %v2590_v44 = vpop.f32.mrf.mxu1  ;;  %v3329_v7 = vpop.f32.mrf.mxu0 }
 0x2e3   : > { %v3750_v3 = vsel %vm3727_vm0, %v3701_v55, %v3702_v9  ;;  %v3607_v0 = vadd.f32 %v3327_v57, %v2868_v24  ;;  %v2900_v59 = vadd.f32 %v2590_v44, %v7250_v60 }
 0x2e4   : > { %v6630_v31 = vadd.f32 %v3750_v3, %v3638_v12  ;;  %v2592_v27 = vpop.f32.mrf.mxu1  ;;  %v3331_v34 = vpop.f32.mrf.mxu0  ;;  %v7255_v3 = vld [vmem:[#allocation17_spill] sm:$0xff] }
 0x2e5   : > { %v3703_v51 = vrot.slane %v3607_v0, 7  ;;  %v3639_v46 = vadd.f32 %v3329_v7, %v2900_v59  ;;  %v2869_v30 = vadd.f32 %v2592_v27, %v7252_v25  ;;  %v7256_v25 = vld [vmem:[#allocation18_spill] sm:$0xff] }
 0x2e6   : > { %7251 = vst [vmem:[#allocation8_spill] sm:$0xff] %v6630_v31  ;;  %v2594_v21 = vpop.f32.mrf.mxu1  ;;  %v3333_v37 = vpop.f32.mrf.mxu0 }
 0x2e7   : > { %v3749_v15 = vsel %vm3727_vm0, %v3702_v9, %v3703_v51  ;;  %v3608_v13 = vadd.f32 %v3331_v34, %v2869_v30  ;;  %v2901_v28 = vadd.f32 %v2594_v21, %v7253_v11 }
 0x2e8   : > { %v6636_v55 = vadd.f32 %v3749_v15, %v3639_v46  ;;  %v2598_v57 = vpop.f32.mrf.mxu1  ;;  %v3337_v24 = vpop.f32.mrf.mxu0  ;;  %v7258_v15 = vld [vmem:[#allocation19_spill] sm:$0xff] }
 0x2e9   : > { %v3704_v12 = vrot.slane %v3608_v13, 7  ;;  %v3640_v44 = vadd.f32 %v3333_v37, %v2901_v28  ;;  %v2870_v60 = vadd.f32 %v2598_v57, %v7255_v3  ;;  %v7259_v3 = vld [vmem:[#allocation20_spill] sm:$0xff] }
 0x2ea   : > { %7254 = vst [vmem:[#allocation9_spill] sm:$0xff] %v6636_v55  ;;  %v2600_v0 = vpop.f32.mrf.mxu1  ;;  %v3339_v59 = vpop.f32.mrf.mxu0 }
 0x2eb   : > { %v3748_v7 = vsel %vm3727_vm0, %v3703_v51, %v3704_v12  ;;  %v3609_v27 = vadd.f32 %v3337_v24, %v2870_v60  ;;  %v2902_v31 = vadd.f32 %v2600_v0, %v7256_v25 }
 0x2ec   : > { %v6642_v9 = vadd.f32 %v3748_v7, %v3640_v44  ;;  %v2602_v34 = vpop.f32.mrf.mxu1  ;;  %v3341_v30 = vpop.f32.mrf.mxu0  ;;  %v7261_v7 = vld [vmem:[#allocation21_spill] sm:$0xff] }
 0x2ed   : > { %v3705_v46 = vrot.slane %v3609_v27, 7  ;;  %v3641_v21 = vadd.f32 %v3339_v59, %v2902_v31  ;;  %v2871_v11 = vadd.f32 %v2602_v34, %v7258_v15  ;;  %v7262_v15 = vld [vmem:[#allocation22_spill] sm:$0xff] }
 0x2ee   : > { %7257 = vst [vmem:[#allocation10_spill] sm:$0xff] %v6642_v9  ;;  %v2604_v13 = vpop.f32.mrf.mxu1  ;;  %v3343_v28 = vpop.f32.mrf.mxu0 }
 0x2ef   : > { %v3747_v37 = vsel %vm3727_vm0, %v3704_v12, %v3705_v46  ;;  %v3610_v57 = vadd.f32 %v3341_v30, %v2871_v11  ;;  %v2903_v55 = vadd.f32 %v2604_v13, %v7259_v3 }
 0x2f0   : > { %v6648_v51 = vadd.f32 %v3747_v37, %v3641_v21  ;;  %v2608_v24 = vpop.f32.mrf.mxu1  ;;  %v3347_v60 = vpop.f32.mrf.mxu0  ;;  %v7263_v37 = vld [vmem:[#allocation23_spill] sm:$0xff] }
 0x2f1   : > { %v3706_v44 = vrot.slane %v3610_v57, 7  ;;  %v3642_v0 = vadd.f32 %v3343_v28, %v2903_v55  ;;  %v2872_v25 = vadd.f32 %v2608_v24, %v7261_v7  ;;  %v7264_v7 = vld [vmem:[#allocation24_spill] sm:$0xff] }
 0x2f2   : > { %7260 = vst [vmem:[#allocation11_spill] sm:$0xff] %v6648_v51  ;;  %v2610_v27 = vpop.f32.mrf.mxu1  ;;  %v3349_v31 = vpop.f32.mrf.mxu0 }
 0x2f3   : > { %v3746_v59 = vsel %vm3727_vm0, %v3705_v46, %v3706_v44  ;;  %v3611_v34 = vadd.f32 %v3347_v60, %v2872_v25  ;;  %v2904_v9 = vadd.f32 %v2610_v27, %v7262_v15 }
 0x2f4   : > { %v6654_v12 = vadd.f32 %v3746_v59, %v3642_v0  ;;  %v2612_v30 = vpop.f32.mrf.mxu1  ;;  %v3351_v11 = vpop.f32.mrf.mxu0  ;;  %v7265_v59 = vld [vmem:[#allocation25_spill] sm:$0xff] }
 0x2f5   : > { %v3707_v21 = vrot.slane %v3611_v34, 7  ;;  %v3643_v13 = vadd.f32 %v3349_v31, %v2904_v9  ;;  %v2873_v3 = vadd.f32 %v2612_v30, %v7263_v37 }
 0x2f6   : > { %v2614_v57 = vpop.f32.mrf.mxu1  ;;  %v3353_v55 = vpop.f32.mrf.mxu0 }
 0x2f7   : > { %v3745_v28 = vsel %vm3727_vm0, %v3706_v44, %v3707_v21  ;;  %v3612_v24 = vadd.f32 %v3351_v11, %v2873_v3  ;;  %v2905_v51 = vadd.f32 %v2614_v57, %v7264_v7 }
 0x2f8   : > { %v6660_v46 = vadd.f32 %v3745_v28, %v3643_v13  ;;  %v2618_v60 = vpop.f32.mrf.mxu1  ;;  %v3357_v25 = vpop.f32.mrf.mxu0 }
 0x2f9   : > { %v3708_v0 = vrot.slane %v3612_v24, 7  ;;  %v3644_v27 = vadd.f32 %v3353_v55, %v2905_v51  ;;  %v2874_v15 = vadd.f32 %v2618_v60, %v7265_v59 }
 0x2fa   : > { %v2620_v34 = vpop.f32.mrf.mxu1  ;;  %v3359_v9 = vpop.f32.mrf.mxu0 }
 0x2fb   : > { %v3744_v31 = vsel %vm3727_vm0, %v3707_v21, %v3708_v0  ;;  %v3613_v30 = vadd.f32 %v3357_v25, %v2874_v15  ;;  %v2906_v37 = vadd.f32 %v2620_v34, %v6377_v53 }
 0x2fc   : > { %v6666_v44 = vadd.f32 %v3744_v31, %v3644_v27  ;;  %v2622_v11 = vpop.f32.mrf.mxu1  ;;  %v3361_v3 = vpop.f32.mrf.mxu0 }
 0x2fd   : > { %v3709_v13 = vrot.slane %v3613_v30, 7  ;;  %v3645_v57 = vadd.f32 %v3359_v9, %v2906_v37  ;;  %v2875_v28 = vadd.f32 %v2622_v11, %v6382_v2 }
 0x2fe   : > { %v2624_v24 = vpop.f32.mrf.mxu1  ;;  %v3363_v51 = vpop.f32.mrf.mxu0 }
 0x2ff   : > { %v3743_v55 = vsel %vm3727_vm0, %v3708_v0, %v3709_v13  ;;  %v3614_v7 = vadd.f32 %v3361_v3, %v2875_v28  ;;  %v2907_v60 = vadd.f32 %v2624_v24, %v6387_v63 }
 0x300   : > { %v6672_v21 = vadd.f32 %v3743_v55, %v3645_v57  ;;  %v2628_v25 = vpop.f32.mrf.mxu1  ;;  %v3367_v53 = vpop.f32.mrf.mxu0 }
 0x301   : > { %v3710_v27 = vrot.slane %v3614_v7, 7  ;;  %v3646_v59 = vadd.f32 %v3363_v51, %v2907_v60  ;;  %v2876_v15 = vadd.f32 %v2628_v25, %v6392_v45 }
 0x302   : > { %v2630_v34 = vpop.f32.mrf.mxu1  ;;  %v3369_v9 = vpop.f32.mrf.mxu0 }
 0x303   : > { %v3742_v2 = vsel %vm3727_vm0, %v3709_v13, %v3710_v27  ;;  %v3615_v31 = vadd.f32 %v3367_v53, %v2876_v15  ;;  %v2908_v30 = vadd.f32 %v2630_v34, %v6401_v32 }
 0x304   : > { %v6678_v0 = vadd.f32 %v3742_v2, %v3646_v59  ;;  %v2632_v37 = vpop.f32.mrf.mxu1  ;;  %v3371_v63 = vpop.f32.mrf.mxu0 }
 0x305   : > { %v3711_v11 = vrot.slane %v3615_v31, 7  ;;  %v3647_v3 = vadd.f32 %v3369_v9, %v2908_v30  ;;  %v2877_v57 = vadd.f32 %v2632_v37, %v6406_v49 }
 0x306   : > { %v2634_v28 = vpop.f32.mrf.mxu1  ;;  %v3373_v24 = vpop.f32.mrf.mxu0 }
 0x307   : > { %v3741_v45 = vsel %vm3727_vm0, %v3710_v27, %v3711_v11  ;;  %v3616_v51 = vadd.f32 %v3371_v63, %v2877_v57  ;;  %v2909_v55 = vadd.f32 %v2634_v28, %v6411_v4 }
 0x308   : > { %v6684_v13 = vadd.f32 %v3741_v45, %v3647_v3  ;;  %v2638_v7 = vpop.f32.mrf.mxu1  ;;  %v3377_v32 = vpop.f32.mrf.mxu0 }
 0x309   : > { %v3712_v60 = vrot.slane %v3616_v51, 7  ;;  %v3648_v25 = vadd.f32 %v3373_v24, %v2909_v55  ;;  %v2878_v53 = vadd.f32 %v2638_v7, %v6416_v50 }
 0x30a   : > { %v2640_v59 = vpop.f32.mrf.mxu1  ;;  %v3379_v15 = vpop.f32.mrf.mxu0 }
 0x30b   : > { %v3740_v49 = vsel %vm3727_vm0, %v3711_v11, %v3712_v60  ;;  %v3617_v34 = vadd.f32 %v3377_v32, %v2878_v53  ;;  %v2910_v9 = vadd.f32 %v2640_v59, %v6424_v5 }
 0x30c   : > { %v6690_v27 = vadd.f32 %v3740_v49, %v3648_v25  ;;  %v2642_v2 = vpop.f32.mrf.mxu1  ;;  %v3381_v4 = vpop.f32.mrf.mxu0 }
 0x30d   : > { %v3713_v31 = vrot.slane %v3617_v34, 7  ;;  %v3649_v30 = vadd.f32 %v3379_v15, %v2910_v9  ;;  %v2879_v37 = vadd.f32 %v2642_v2, %v6429_v10 }
 0x30e   : > { %v2644_v63 = vpop.f32.mrf.mxu1  ;;  %v3383_v3 = vpop.f32.mrf.mxu0 }
 0x30f   : > { %v3739_v50 = vsel %vm3727_vm0, %v3712_v60, %v3713_v31  ;;  %v3618_v57 = vadd.f32 %v3381_v4, %v2879_v37  ;;  %v2911_v28 = vadd.f32 %v2644_v63, %v6434_v52 }
 0x310   : > { %v6696_v11 = vadd.f32 %v3739_v50, %v3649_v30  ;;  %v2648_v24 = vpop.f32.mrf.mxu1  ;;  %v3387_v5 = vpop.f32.mrf.mxu0 }
 0x311   : > { %v3714_v45 = vrot.slane %v3618_v57, 7  ;;  %v3650_v51 = vadd.f32 %v3383_v3, %v2911_v28  ;;  %v2880_v55 = vadd.f32 %v2648_v24, %v6439_v8 }
 0x312   : > { %v2650_v7 = vpop.f32.mrf.mxu1  ;;  %v3389_v32 = vpop.f32.mrf.mxu0 }
 0x313   : > { %v3738_v10 = vsel %vm3727_vm0, %v3713_v31, %v3714_v45  ;;  %v3619_v25 = vadd.f32 %v3387_v5, %v2880_v55  ;;  %v2912_v53 = vadd.f32 %v2650_v7, %v6446_v54 }
 0x314   : > { %v6702_v60 = vadd.f32 %v3738_v10, %v3650_v51  ;;  %v2652_v59 = vpop.f32.mrf.mxu1  ;;  %v3391_v52 = vpop.f32.mrf.mxu0 }
 0x315   : > { %v3715_v15 = vrot.slane %v3619_v25, 7  ;;  %v3651_v49 = vadd.f32 %v3389_v32, %v2912_v53  ;;  %v2881_v34 = vadd.f32 %v2652_v59, %v6451_v58 }
 0x316   : > { %v2654_v9 = vpop.f32.mrf.mxu1  ;;  %v3393_v2 = vpop.f32.mrf.mxu0 }
 0x317   : > { %v3737_v8 = vsel %vm3727_vm0, %v3714_v45, %v3715_v15  ;;  %v3620_v4 = vadd.f32 %v3391_v52, %v2881_v34  ;;  %v2913_v30 = vadd.f32 %v2654_v9, %v6456_v14 }
 0x318   : > { %v6708_v31 = vadd.f32 %v3737_v8, %v3651_v49  ;;  %v2658_v37 = vpop.f32.mrf.mxu1  ;;  %v3397_v54 = vpop.f32.mrf.mxu0 }
 0x319   : > { %v3716_v63 = vrot.slane %v3620_v4, 7  ;;  %v3652_v3 = vadd.f32 %v3393_v2, %v2913_v30  ;;  %v2882_v50 = vadd.f32 %v2658_v37, %v6461_v43 }
 0x31a   : > { %v2660_v57 = vpop.f32.mrf.mxu1  ;;  %v3399_v28 = vpop.f32.mrf.mxu0 }
 0x31b   : > { %v3736_v58 = vsel %vm3727_vm0, %v3715_v15, %v3716_v63  ;;  %v3621_v24 = vadd.f32 %v3397_v54, %v2882_v50  ;;  %v2914_v5 = vadd.f32 %v2660_v57, %v6467_v17 }
 0x31c   : > { %v6714_v45 = vadd.f32 %v3736_v58, %v3652_v3  ;;  %v2662_v51 = vpop.f32.mrf.mxu1  ;;  %v3401_v14 = vpop.f32.mrf.mxu0 }
 0x31d   : > { %v3717_v55 = vrot.slane %v3621_v24, 7  ;;  %v3653_v7 = vadd.f32 %v3399_v28, %v2914_v5  ;;  %v2883_v32 = vadd.f32 %v2662_v51, %v6472_v19 }
 0x31e   : > { %v2664_v10 = vpop.f32.mrf.mxu1  ;;  %v3403_v25 = vpop.f32.mrf.mxu0 }
 0x31f   : > { %v3735_v43 = vsel %vm3727_vm0, %v3716_v63, %v3717_v55  ;;  %v3622_v53 = vadd.f32 %v3401_v14, %v2883_v32  ;;  %v2915_v59 = vadd.f32 %v2664_v10, %v6477_v36 }
 0x320   : > { %v6720_v52 = vadd.f32 %v3735_v43, %v3653_v7  ;;  %v2668_v15 = vpop.f32.mrf.mxu1  ;;  %v3407_v17 = vpop.f32.mrf.mxu0 }
 0x321   : > { %v3718_v49 = vrot.slane %v3622_v53, 7  ;;  %v3654_v34 = vadd.f32 %v3403_v25, %v2915_v59  ;;  %v2884_v9 = vadd.f32 %v2668_v15, %v6482_v26 }
 0x322   : > { %v2670_v2 = vpop.f32.mrf.mxu1  ;;  %v3409_v8 = vpop.f32.mrf.mxu0 }
 0x323   : > { %v3734_v19 = vsel %vm3727_vm0, %v3717_v55, %v3718_v49  ;;  %v3623_v4 = vadd.f32 %v3407_v17, %v2884_v9  ;;  %v2916_v30 = vadd.f32 %v2670_v2, %v6487_v23 }
 0x324   : > { %v6726_v37 = vadd.f32 %v3734_v19, %v3654_v34  ;;  %v2672_v54 = vpop.f32.mrf.mxu1  ;;  %v3411_v36 = vpop.f32.mrf.mxu0 }
 0x325   : > { %v3719_v63 = vrot.slane %v3623_v4, 7  ;;  %v3655_v3 = vadd.f32 %v3409_v8, %v2916_v30  ;;  %v2885_v50 = vadd.f32 %v2672_v54, %v6492_v29 }
 0x326   : > { %v2674_v57 = vpop.f32.mrf.mxu1  ;;  %v3413_v28 = vpop.f32.mrf.mxu0 }
 0x327   : > { %v3733_v26 = vsel %vm3727_vm0, %v3718_v49, %v3719_v63  ;;  %v3624_v58 = vadd.f32 %v3411_v36, %v2885_v50  ;;  %v2917_v24 = vadd.f32 %v2674_v57, %v6497_v41 }
 0x328   : > { %v6732_v5 = vadd.f32 %v3733_v26, %v3655_v3  ;;  %v2678_v51 = vpop.f32.mrf.mxu1  ;;  %v3417_v23 = vpop.f32.mrf.mxu0 }
 0x329   : > { %v3720_v14 = vrot.slane %v3624_v58, 7  ;;  %v3656_v55 = vadd.f32 %v3413_v28, %v2917_v24  ;;  %v2886_v7 = vadd.f32 %v2678_v51, %v6502_v42 }
 0x32a   : > { %v2680_v32 = vpop.f32.mrf.mxu1  ;;  %v3419_v10 = vpop.f32.mrf.mxu0 }
 0x32b   : > { %v3732_v29 = vsel %vm3727_vm0, %v3719_v63, %v3720_v14  ;;  %v3625_v25 = vadd.f32 %v3417_v23, %v2886_v7  ;;  %v2918_v43 = vadd.f32 %v2680_v32, %v6507_v47 }
 0x32c   : > { %v6738_v53 = vadd.f32 %v3732_v29, %v3656_v55  ;;  %v2682_v59 = vpop.f32.mrf.mxu1  ;;  %v3421_v41 = vpop.f32.mrf.mxu0 }
 0x32d   : > { %v3721_v15 = vrot.slane %v3625_v25, 7  ;;  %v3657_v17 = vadd.f32 %v3419_v10, %v2918_v43  ;;  %v2887_v49 = vadd.f32 %v2682_v59, %v6512_v39 }
 0x32e   : > { %v2684_v34 = vpop.f32.mrf.mxu1  ;;  %v3423_v9 = vpop.f32.mrf.mxu0 }
 0x32f   : > { %v3731_v42 = vsel %vm3727_vm0, %v3720_v14, %v3721_v15  ;;  %v3626_v2 = vadd.f32 %v3421_v41, %v2887_v49  ;;  %v2919_v8 = vadd.f32 %v2684_v34, %v6520_v48 }
 0x330   : > { %v6744_v19 = vadd.f32 %v3731_v42, %v3657_v17  ;;  %v2688_v4 = vpop.f32.mrf.mxu1  ;;  %v3427_v47 = vpop.f32.mrf.mxu0 }
 0x331   : > { %v3722_v30 = vrot.slane %v3626_v2, 7  ;;  %v3658_v54 = vadd.f32 %v3423_v9, %v2919_v8  ;;  %v2888_v36 = vadd.f32 %v2688_v4, %v6525_v38 }
 0x332   : > { %v2690_v63 = vpop.f32.mrf.mxu1  ;;  %v3429_v3 = vpop.f32.mrf.mxu0 }
 0x333   : > { %v3730_v39 = vsel %vm3727_vm0, %v3721_v15, %v3722_v30  ;;  %v3627_v50 = vadd.f32 %v3427_v47, %v2888_v36  ;;  %v2920_v57 = vadd.f32 %v2690_v63, %v6533_v1  ;;  %v7266_v15 = vrot.slane %v6555_v6, 7  ;;  %v7267_v36 = vld [vmem:[#allocation26_spill] sm:$0xff]  ;;  %v7268_v63 = vld [vmem:[#allocation35_spill] sm:$0xff] }
 0x334   : > { %v6750_v28 = vadd.f32 %v3730_v39, %v3658_v54  ;;  %v2692_v26 = vpop.f32.mrf.mxu1  ;;  %v3431_v48 = vpop.f32.mrf.mxu0 }
 0x335   : > { %v3723_v58 = vrot.slane %v3627_v50, 7  ;;  %v3659_v24 = vadd.f32 %v3429_v3, %v2920_v57  ;;  %v2889_v51 = vadd.f32 %v2692_v26, %v6538_v22  ;;  %v6787_v57 = vld [vmem:[%s7177_s5] ss:$0 sm:$0xff] }
 0x336   : > { %v2694_v23 = vpop.f32.mrf.mxu1  ;;  %v3433_v14 = vpop.f32.mrf.mxu0 }
 0x337   : > { %v3729_v38 = vsel %vm3727_vm0, %v3722_v30, %v3723_v58  ;;  %v3628_v55 = vadd.f32 %v3431_v48, %v2889_v51  ;;  %v2921_v7 = vadd.f32 %v2694_v23, %v6543_v20 }
 0x338   : > { %v6756_v32 = vadd.f32 %v3729_v38, %v3659_v24  ;;  %v5036_v10 = vpop.f32.mrf.mxu0  ;;  %v5048_v1 = vpop.f32.mrf.mxu1  ;;  %v7269_v24 = vld [vmem:[#allocation53_spill] sm:$0xff] }
 0x339   : > { %v3724_v29 = vrot.slane %v3628_v55, 7  ;;  %v3660_v25 = vadd.f32 %v3433_v14, %v2921_v7  ;;  %v3663_v43 = vadd.f32 %v5036_v10, %v6373_v35  ;;  %v3675_v59 = vadd.f32 %v5048_v1, %v6443_v16  ;;  %v7270_v14 = vld [vmem:[#allocation27_spill] sm:$0xff]  ;;  %v7271_v55 = vld [vmem:[#allocation36_spill] sm:$0xff] }
 0x33a   : > { %v3470_v41 = vpop.f32.mrf.mxu0  ;;  %v3518_v22 = vpop.f32.mrf.mxu1 }
 0x33b   : > { %v3759_v17 = vsel %vm3727_vm0, %v3724_v29, %v7266_v15  ;;  %v3728_v20 = vsel %vm3727_vm0, %v3723_v58, %v3724_v29  ;;  %v6770_v9 = vadd.f32 %v3470_v41, %v6380_v56  ;;  %v6773_v35 = vadd.f32 %v3518_v22, %v6449_v61  ;;  %v7272_v15 = vld [vmem:[#allocation52_spill] sm:$0xff] }
 0x33c   : > { %v3760_v49 = vadd.f32 %v3759_v17, %v6558_v33  ;;  %v6767_v34 = vadd.f32 %v3728_v20, %v3660_v25  ;;  %v5037_v16 = vpop.f32.mrf.mxu0  ;;  %v5049_v42 = vpop.f32.mrf.mxu1  ;;  %v3794_v8 = vrot.slane %v3663_v43, 1  ;;  %v3806_v4 = vrot.slane %v3675_v59, 1 }
 0x33d   : > { %v3664_v6 = vadd.f32 %v5037_v16, %v6385_v40  ;;  %v3676_v2 = vadd.f32 %v5049_v42, %v6454_v18  ;;  %v3792_v61 = vrot.slane %v6770_v9, 1  ;;  %v3804_v39 = vrot.slane %v6773_v35, 1  ;;  %v7273_v42 = vld [vmem:[#allocation11_spill] sm:$0xff] }
 0x33e   : > { %v3473_v47 = vpop.f32.mrf.mxu0  ;;  %v3521_v33 = vpop.f32.mrf.mxu1 }
 0x33f   : > { %v3795_v30 = vrot.slane %v3664_v6, 1  ;;  %v3807_v54 = vrot.slane %v3676_v2, 1  ;;  %v3662_v56 = vadd.f32 %v3473_v47, %v7267_v36  ;;  %v3674_v3 = vadd.f32 %v3521_v33, %v7268_v63  ;;  %v7274_v36 = vld [vmem:[#allocation28_spill] sm:$0xff]  ;;  %v7275_v63 = vld [vmem:[#allocation37_spill] sm:$0xff] }
 0x340   : > { %v5040_v50 = vpop.f32.mrf.mxu0  ;;  %v5052_v40 = vpop.f32.mrf.mxu1 }
 0x341   : > { %v3853_v18 = vsel %vm3824_vm1, %v3794_v8, %v3795_v30  ;;  %v3841_v26 = vsel %vm3824_vm1, %v3806_v4, %v3807_v54  ;;  %v3793_v48 = vrot.slane %v3662_v56, 1  ;;  %v3805_v58 = vrot.slane %v3674_v3, 1 }
 0x342   : > { %v3859_v51 = vadd.f32 %v3853_v18, %v7269_v24  ;;  %v3871_v23 = vadd.f32 %v3841_v26, %v6660_v46  ;;  %v3667_v38 = vadd.f32 %v5040_v50, %v7270_v14  ;;  %v3679_v7 = vadd.f32 %v5052_v40, %v7271_v55  ;;  %v3486_v10 = vpop.f32.mrf.mxu0  ;;  %v3534_v1 = vpop.f32.mrf.mxu1  ;;  %v7276_v40 = vld [vmem:[#allocation29_spill] sm:$0xff]  ;;  %v7277_v26 = vld [vmem:[#allocation38_spill] sm:$0xff]  ;;  %v7279_v24 = vld [vmem:[#allocation39_spill] sm:$0xff] }
 0x343   : > { %v3854_v29 = vsel %vm3824_vm1, %v3793_v48, %v3794_v8  ;;  %v3855_v25 = vsel %vm3824_vm1, %v3792_v61, %v3793_v48  ;;  %v3842_v43 = vsel %vm3824_vm1, %v3805_v58, %v3806_v4  ;;  %v3843_v46 = vsel %vm3824_vm1, %v3804_v39, %v3805_v58 }
 0x344   : > { %v6808_v59 = vadd.f32 %v6787_v57, %v3859_v51  ;;  %v6811_v41 = vadd.f32 %v6787_v57, %v3871_v23  ;;  %v3857_v22 = vadd.f32 %v3855_v25, %v3760_v49  ;;  %v3858_v17 = vadd.f32 %v3854_v29, %v7272_v15  ;;  %v5041_v20 = vpop.f32.mrf.mxu0  ;;  %v5053_v16 = vpop.f32.mrf.mxu1  ;;  %v7280_v15 = vld [vmem:[#allocation31_spill] sm:$0xff] }
 0x345   : > { %v6815_v6 = vadd.f32 %v3843_v46, %v7273_v42  ;;  %v6818_v2 = vadd.f32 %v3842_v43, %v6654_v12  ;;  %v3798_v8 = vrot.slane %v3667_v38, 1  ;;  %v3810_v4 = vrot.slane %v3679_v7, 1  ;;  %v7278_v12 = vld [vmem:[#allocation30_spill] sm:$0xff] }
 0x346   : > { %v3930_v47 = vmax.f32 %v6808_v59, 0.0  ;;  %v3665_v56 = vadd.f32 %v3486_v10, %v7274_v36  ;;  %v3677_v49 = vadd.f32 %v3534_v1, %v7275_v63  ;;  %v3489_v3 = vpop.f32.mrf.mxu0  ;;  %v3537_v50 = vpop.f32.mrf.mxu1  ;;  %v6825_v18 = vadd.f32 %v5041_v20, %v7276_v40  ;;  %v7282_v36 = vld [vmem:[#allocation54_spill] sm:$0xff] }
 0x347   : > { %v6828_v48 = vadd.f32 %v5053_v16, %v7277_v26  ;;  %v3666_v58 = vadd.f32 %v3489_v3, %v7278_v12  ;;  %v3678_v51 = vadd.f32 %v3537_v50, %v7279_v24  ;;  %v3896_v7 = vadd.f32 %v6787_v57, %v3857_v22  ;;  %v7281_v16 = vld [vmem:[#allocation40_spill] sm:$0xff]  ;;  %v7283_v3 = vld [vmem:[#allocation5_spill] sm:$0xff] }
 0x348   : > { %v3796_v23 = vrot.slane %v3665_v56, 1  ;;  %v3808_v14 = vrot.slane %v3677_v49, 1  ;;  %v5044_v38 = vpop.f32.mrf.mxu0  ;;  %v5056_v55 = vpop.f32.mrf.mxu1  ;;  %v3897_v10 = vadd.f32 %v6787_v57, %v3858_v17  ;;  %v3799_v1 = vrot.slane %v6825_v18, 1 }
 0x349   : > { %v3811_v29 = vrot.slane %v6828_v48, 1  ;;  %v3797_v25 = vrot.slane %v3666_v58, 1  ;;  %v3809_v43 = vrot.slane %v3678_v51, 1  ;;  %v6841_v20 = vadd.f32 %v5044_v38, %v7280_v15  ;;  %v7284_v58 = vld [vmem:[#allocation3_spill] sm:$0xff]  ;;  %v7285_v51 = vld [vmem:[#allocation4_spill] sm:$0xff] }
 0x34a   : > { %v3852_v46 = vsel %vm3824_vm1, %v3795_v30, %v3796_v23  ;;  %v3840_v59 = vsel %vm3824_vm1, %v3807_v54, %v3808_v14  ;;  %v6844_v42 = vadd.f32 %v5056_v55, %v7281_v16  ;;  %v3502_v22 = vpop.f32.mrf.mxu0  ;;  %v3550_v17 = vpop.f32.mrf.mxu1  ;;  %v3849_v49 = vsel %vm3824_vm1, %v3798_v8, %v3799_v1 }
 0x34b   : > { %v3860_v56 = vadd.f32 %v3852_v46, %v7282_v36  ;;  %v3872_v63 = vadd.f32 %v3840_v59, %v6666_v44  ;;  %v3837_v30 = vsel %vm3824_vm1, %v3810_v4, %v3811_v29  ;;  %v3863_v54 = vadd.f32 %v3849_v49, %v7283_v3 }
 0x34c   : > { %v3875_v50 = vadd.f32 %v3837_v30, %v6684_v13  ;;  %v3850_v40 = vsel %vm3824_vm1, %v3797_v25, %v3798_v8  ;;  %v3851_v18 = vsel %vm3824_vm1, %v3796_v23, %v3797_v25  ;;  %v5045_v26 = vpop.f32.mrf.mxu0  ;;  %v5057_v48 = vpop.f32.mrf.mxu1  ;;  %v3838_v23 = vsel %vm3824_vm1, %v3809_v43, %v3810_v4  ;;  %v7286_v30 = vld [vmem:[#allocation32_spill] sm:$0xff] }
 0x34d   : > { %v3899_v44 = vadd.f32 %v6787_v57, %v3860_v56  ;;  %v6860_v12 = vadd.f32 %v6787_v57, %v3872_v63  ;;  %v6863_v24 = vadd.f32 %v3851_v18, %v7284_v58  ;;  %v6866_v38 = vadd.f32 %v3850_v40, %v7285_v51  ;;  %v7289_v18 = vld [vmem:[#allocation42_spill] sm:$0xff] }
 0x34e   : > { %v6869_v13 = vadd.f32 %v6787_v57, %v3863_v54  ;;  %v6872_v8 = vadd.f32 %v6787_v57, %v3875_v50  ;;  %v3839_v55 = vsel %vm3824_vm1, %v3808_v14, %v3809_v43  ;;  %v3553_v25 = vpop.f32.mrf.mxu1  ;;  %v6883_v16 = vadd.f32 %v3838_v23, %v6678_v0  ;;  %v3505_v36 = vpop.f32.mrf.mxu0  ;;  %v7287_v54 = vld [vmem:[#allocation41_spill] sm:$0xff]  ;;  %v7290_v51 = vld [vmem:[#allocation34_spill] sm:$0xff] }
 0x34f   : > { %v3931_v46 = vmax.f32 %v3899_v44, 0.0  ;;  %v6880_v15 = vadd.f32 %v3839_v55, %v6672_v21  ;;  %v3802_v4 = vrot.slane %v6841_v20, 1  ;;  %v3814_v49 = vrot.slane %v6844_v42, 1  ;;  %v7288_v21 = vld [vmem:[#allocation33_spill] sm:$0xff]  ;;  %v7291_v42 = vld [vmem:[#allocation43_spill] sm:$0xff] }
 0x350   : > { %v3934_v56 = vmax.f32 %v6869_v13, 0.0  ;;  %v5060_v14 = vpop.f32.mrf.mxu1  ;;  %v3669_v3 = vadd.f32 %v3502_v22, %v7286_v30  ;;  %v3681_v50 = vadd.f32 %v3550_v17, %v7287_v54  ;;  %v3672_v40 = vadd.f32 %v5045_v26, %v7288_v21  ;;  %v7292_v17 = vld [vmem:[#allocation44_spill] sm:$0xff]  ;;  %v7295_v21 = vld [vmem:[#allocation10_spill] sm:$0xff] }
 0x351   : > { %v3961_v43 = vpack.c.bf16 %v3931_v46, %v3930_v47  ;;  %v6893_v0 = vadd.f32 %v5057_v48, %v7289_v18  ;;  %v3928_v44 = vmax.f32 %v3896_v7, 0.0  ;;  %v3929_v58 = vmax.f32 %v3897_v10, 0.0 }
 0x352   : > { %v3670_v23 = vadd.f32 %v3505_v36, %v7290_v51  ;;  %v3566_v55 = vpop.f32.mrf.mxu1  ;;  %v3800_v63 = vrot.slane %v3669_v3, 1  ;;  %v3812_v20 = vrot.slane %v3681_v50, 1  ;;  %v3803_v59 = vrot.slane %v3672_v40, 1  ;;  %v7293_v36 = vld [vmem:[#allocation6_spill] sm:$0xff] }
 0x353   : > { %v3682_v33 = vadd.f32 %v3553_v25, %v7291_v42  ;;  %v3815_v47 = vrot.slane %v6893_v0, 1  ;;  %v3960_v22 = vpack.c.bf16 %v3929_v58, %v3928_v44  ;;  %v3687_v30 = vadd.f32 %v5060_v14, %v7292_v17  ;;  %v7294_v14 = vld [vmem:[#allocation9_spill] sm:$0xff]  ;;  %v7297_v42 = vld [vmem:[#allocation8_spill] sm:$0xff] }
 0x354   : > { %v3801_v46 = vrot.slane %v3670_v23, 1  ;;  %v5061_v26 = vpop.f32.mrf.mxu1  ;;  %v3848_v48 = vsel %vm3824_vm1, %v3799_v1, %v3800_v63  ;;  %v3836_v7 = vsel %vm3824_vm1, %v3811_v29, %v3812_v20  ;;  %v3844_v10 = vsel %vm3824_vm1, %v3803_v59, %v3804_v39 }
 0x355   : > { %v3845_v25 = vsel %vm3824_vm1, %v3802_v4, %v3803_v59  ;;  %v3864_v3 = vadd.f32 %v3848_v48, %v7293_v36  ;;  %v3876_v54 = vadd.f32 %v3836_v7, %v6690_v27  ;;  %v3868_v40 = vadd.f32 %v3844_v10, %v7295_v21  ;;  %5082 = vmatprep.mubr.bf16.mxu1 %v3960_v22  ;;  %v7298_v36 = vld [vmem:[#allocation45_spill] sm:$0xff] }
 0x356   : > { %v3867_v50 = vadd.f32 %v3845_v25, %v7294_v14  ;;  %v3569_v1 = vpop.f32.mrf.mxu1  ;;  %v3833_v29 = vsel %vm3824_vm1, %v3814_v49, %v3815_v47  ;;  %v3846_v35 = vsel %vm3824_vm1, %v3801_v46, %v3802_v4  ;;  %v3847_v39 = vsel %vm3824_vm1, %v3800_v63, %v3801_v46  ;;  %5083 = vmatmul.mubr.bf16.vlgmr.msra.gmra.mxu1 %v3961_v43  ;;  %v7296_v4 = vld [vmem:[#allocation7_spill] sm:$0xff] }
 0x357   : > { %v3813_v59 = vrot.slane %v3682_v33, 1  ;;  %v3903_v18 = vadd.f32 %v6787_v57, %v3864_v3  ;;  %v6921_v27 = vadd.f32 %v6787_v57, %v3876_v54  ;;  %v6927_v44 = vadd.f32 %v6787_v57, %v3868_v40  ;;  %v7299_v54 = vld [vmem:[#allocation46_spill] sm:$0xff] }
 0x358   : > { %v6924_v0 = vadd.f32 %v6787_v57, %v3867_v50  ;;  %v5064_v58 = vpop.f32.mrf.mxu1  ;;  %v3879_v51 = vadd.f32 %v3833_v29, %v6708_v31  ;;  %v3865_v23 = vadd.f32 %v3847_v39, %v7296_v4  ;;  %v3866_v63 = vadd.f32 %v3846_v35, %v7297_v42 }
 0x359   : > { %v3834_v33 = vsel %vm3824_vm1, %v3813_v59, %v3814_v49  ;;  %v3935_v43 = vmax.f32 %v3903_v18, 0.0  ;;  %v3947_v22 = vmax.f32 %v6921_v27, 0.0  ;;  %v3939_v17 = vmax.f32 %v6927_v44, 0.0 }
 0x35a   : > { %v3938_v46 = vmax.f32 %v6924_v0, 0.0  ;;  %v3582_v48 = vpop.f32.mrf.mxu1  ;;  %v6938_v7 = vadd.f32 %v6787_v57, %v3879_v51  ;;  %v3835_v31 = vsel %vm3824_vm1, %v3812_v20, %v3813_v59  ;;  %v6943_v10 = vadd.f32 %v3834_v33, %v6702_v60  ;;  %v7300_v20 = vld [vmem:[#allocation47_spill] sm:$0xff]  ;;  %v7301_v60 = vld [vmem:[#allocation48_spill] sm:$0xff] }
 0x35b   : > { %v3818_v25 = vrot.slane %v3687_v30, 1  ;;  %v6946_v49 = vadd.f32 %v3835_v31, %v6696_v11  ;;  %v3685_v3 = vadd.f32 %v3566_v55, %v7298_v36  ;;  %v3688_v14 = vadd.f32 %v5061_v26, %v7299_v54 }
 0x35c   : > { %v3900_v50 = vadd.f32 %v6787_v57, %v6863_v24  ;;  %v3950_v21 = vmax.f32 %v6938_v7, 0.0  ;;  %v3901_v40 = vadd.f32 %v6787_v57, %v6866_v38  ;;  %v3686_v29 = vadd.f32 %v3569_v1, %v7300_v20  ;;  %v5065_v30 = vpop.f32.mrf.mxu1  ;;  %v7302_v24 = vld [vmem:[#allocation49_spill] sm:$0xff]  ;;  %v7303_v1 = vld [vmem:[#allocation50_spill] sm:$0xff] }
 0x35d   : > { %v3691_v35 = vadd.f32 %v5064_v58, %v7301_v60  ;;  %v3816_v39 = vrot.slane %v3685_v3, 1  ;;  %v3819_v11 = vrot.slane %v3688_v14, 1  ;;  %v3963_v55 = vpack.c.bf16 %v3935_v43, %v3934_v56  ;;  %v7304_v60 = vld [vmem:[#allocation51_spill] sm:$0xff] }
 0x35e   : > { %v3932_v59 = vmax.f32 %v3900_v50, 0.0  ;;  %v3933_v26 = vmax.f32 %v3901_v40, 0.0  ;;  %v3817_v18 = vrot.slane %v3686_v29, 1  ;;  %v3689_v44 = vadd.f32 %v3582_v48, %v7302_v24 }
 0x35f   : > { %v3822_v0 = vrot.slane %v3691_v35, 1  ;;  %v3832_v51 = vsel %vm3824_vm1, %v3815_v47, %v3816_v39  ;;  %v3829_v38 = vsel %vm3824_vm1, %v3818_v25, %v3819_v11  ;;  %v3692_v58 = vadd.f32 %v5065_v30, %v7303_v1 }
 0x360   : > { %v3904_v4 = vadd.f32 %v6787_v57, %v3865_v23  ;;  %v3880_v42 = vadd.f32 %v3832_v51, %v6714_v45  ;;  %v3883_v13 = vadd.f32 %v3829_v38, %v6732_v5  ;;  %v3962_v56 = vpack.c.bf16 %v3933_v26, %v3932_v59  ;;  %v3585_v23 = vpop.f32.mrf.mxu1 }
 0x361   : > { %v3830_v33 = vsel %vm3824_vm1, %v3817_v18, %v3818_v25  ;;  %v3831_v43 = vsel %vm3824_vm1, %v3816_v39, %v3817_v18  ;;  %v3820_v48 = vrot.slane %v3689_v44, 1  ;;  %v3823_v31 = vrot.slane %v3692_v58, 1 }
 0x362   : > { %v3882_v47 = vadd.f32 %v3830_v33, %v6726_v37  ;;  %v3919_v36 = vadd.f32 %v6787_v57, %v3880_v42  ;;  %v3922_v3 = vadd.f32 %v6787_v57, %v3883_v13  ;;  %5086 = vmatprep.mubr.bf16.mxu1 %v3962_v56  ;;  %v3881_v45 = vadd.f32 %v3831_v43, %v6720_v52 }
 0x363   : > { %v3905_v5 = vadd.f32 %v6787_v57, %v3866_v63  ;;  %5087 = vmatmul.mubr.bf16.gmra.mxu1 %v3963_v55  ;;  %v3828_v25 = vsel %vm3824_vm1, %v3819_v11, %v3820_v48  ;;  %v3825_v54 = vsel %vm3824_vm1, %v3822_v0, %v3823_v31  ;;  %v3856_v37 = vsel %vm3824_vm1, %v3823_v31, %v3792_v61 }
 0x364   : > { %v3936_v14 = vmax.f32 %v3904_v4, 0.0  ;;  %v3951_v50 = vmax.f32 %v3919_v36, 0.0  ;;  %v3954_v40 = vmax.f32 %v3922_v3, 0.0  ;;  %v3884_v52 = vadd.f32 %v3828_v25, %v6738_v53  ;;  %v4709_v3 = vld [vmem:[%s5483_s19 + $0x30] sm:$0xff] }
 0x365   : > { %v3887_v63 = vadd.f32 %v3825_v54, %v6756_v32  ;;  %v3888_v20 = vadd.f32 %v3856_v37, %v6767_v34  ;;  %v3937_v29 = vmax.f32 %v3905_v5, 0.0  ;;  %v3690_v35 = vadd.f32 %v3585_v23, %v7304_v60  ;;  %v4707_v23 = vld [vmem:[%s5483_s19 + $0x20] sm:$0xff] }
 0x366   : > { %v3965_v30 = vpack.c.bf16 %v3939_v17, %v3938_v46  ;;  %v3923_v39 = vadd.f32 %v6787_v57, %v3884_v52  ;;  %v3908_v61 = vadd.f32 %v6787_v57, %v6815_v6  ;;  %v3909_v11 = vadd.f32 %v6787_v57, %v6818_v2 }
 0x367   : > { %v3926_v9 = vadd.f32 %v6787_v57, %v3887_v63  ;;  %v3927_v53 = vadd.f32 %v6787_v57, %v3888_v20  ;;  %v3964_v59 = vpack.c.bf16 %v3937_v29, %v3936_v14  ;;  %v3821_v32 = vrot.slane %v3690_v35, 1  ;;  %v4710_v14 = vld [vmem:[%s5483_s19 + $0x38] sm:$0xff]  ;;  %v4708_v20 = vld [vmem:[%s5483_s19 + $0x28] sm:$0xff] }
 0x368   : > { %v7305_v34 = vmax.f32 %v6811_v41, 0.0  ;;  %v7306_v55 = vmax.f32 %v6860_v12, 0.0  ;;  %v3955_v46 = vmax.f32 %v3923_v39, 0.0  ;;  %v3940_v18 = vmax.f32 %v3908_v61, 0.0 }
 0x369   : > { %v3958_v17 = vmax.f32 %v3926_v9, 0.0  ;;  %v3941_v24 = vmax.f32 %v3909_v11, 0.0  ;;  %v3959_v44 = vmax.f32 %v3927_v53, 0.0  ;;  %5090 = vmatprep.mubr.bf16.mxu1 %v3964_v59  ;;  %v3826_v6 = vsel %vm3824_vm1, %v3821_v32, %v3822_v0  ;;  %v4713_v11 = vld [vmem:[%s5483_s19 + $0x50] sm:$0xff] }
 0x36a   : > { %v3967_v26 = vpack.c.bf16 %v7306_v55, %v7305_v34  ;;  %v3827_v2 = vsel %vm3824_vm1, %v3820_v48, %v3821_v32  ;;  %v3912_v51 = vadd.f32 %v6787_v57, %v6880_v15  ;;  %v3886_v12 = vadd.f32 %v3826_v6, %v6750_v28  ;;  %v4711_v32 = vld [vmem:[%s5483_s19 + $0x40] sm:$0xff]  ;;  %v4712_v6 = vld [vmem:[%s5483_s19 + $0x48] sm:$0xff] }
 0x36b   : > { %v3885_v41 = vadd.f32 %v3827_v2, %v6744_v19  ;;  %v3966_v38 = vpack.c.bf16 %v3941_v24, %v3940_v18  ;;  %v3913_v1 = vadd.f32 %v6787_v57, %v6883_v16  ;;  %5091 = vmatmul.mubr.bf16.gmra.mxu1 %v3965_v30  ;;  %v7307_v4 = vmax.f32 %v6872_v8, 0.0 }
 0x36c   : > { %v3944_v58 = vmax.f32 %v3912_v51, 0.0  ;;  %v3916_v62 = vadd.f32 %v6787_v57, %v6946_v49  ;;  %v3917_v15 = vadd.f32 %v6787_v57, %v6943_v10  ;;  %v3971_v28 = vpack.c.bf16 %v3951_v50, %v3950_v21 }
 0x36d   : > { %v3969_v0 = vpack.c.bf16 %v3947_v22, %v7307_v4  ;;  %5094 = vmatprep.mubr.bf16.mxu1 %v3966_v38  ;;  %v3945_v19 = vmax.f32 %v3913_v1, 0.0  ;;  %v3920_v16 = vadd.f32 %v6787_v57, %v3881_v45  ;;  %v3921_v42 = vadd.f32 %v6787_v57, %v3882_v47  ;;  %v4717_v38 = vld [vmem:[%s5483_s19 + $0x70] sm:$0xff] }
 0x36e   : > { %v3948_v13 = vmax.f32 %v3916_v62, 0.0  ;;  %v3949_v8 = vmax.f32 %v3917_v15, 0.0  ;;  %v3973_v56 = vpack.c.bf16 %v3955_v46, %v3954_v40  ;;  %v3924_v27 = vadd.f32 %v6787_v57, %v3885_v41  ;;  %v4714_v46 = vld [vmem:[%s5483_s19 + $0x58] sm:$0xff]  ;;  %v4715_v62 = vld [vmem:[%s5483_s19 + $0x60] sm:$0xff] }
 0x36f   : > { %v3968_v22 = vpack.c.bf16 %v3945_v19, %v3944_v58  ;;  %v3952_v33 = vmax.f32 %v3920_v16, 0.0  ;;  %v3953_v49 = vmax.f32 %v3921_v42, 0.0  ;;  %v3925_v43 = vadd.f32 %v6787_v57, %v3886_v12  ;;  %v7027_v57 = vld [vmem:[%s7179_s7] ss:$0 sm:$0xff]  ;;  %v4718_v42 = vld [vmem:[%s5483_s19 + $0x78] sm:$0xff] }
 0x370   : > { %v3970_v10 = vpack.c.bf16 %v3949_v8, %v3948_v13  ;;  %v3956_v48 = vmax.f32 %v3924_v27, 0.0  ;;  %v3975_v31 = vpack.c.bf16 %v3959_v44, %v3958_v17 }
 0x371   : > { %v3972_v7 = vpack.c.bf16 %v3953_v49, %v3952_v33  ;;  %v3957_v21 = vmax.f32 %v3925_v43, 0.0 }
 0x373   : > { %v3974_v36 = vpack.c.bf16 %v3957_v21, %v3956_v48  ;;  %5095 = vmatmul.mubr.bf16.gmra.mxu1 %v3967_v26  ;;  %v4721_v48 = vld [vmem:[%s5483_s19 + $0x90] sm:$0xff] }
 0x374   : > { %5098 = vmatprep.mubr.bf16.mxu1 %v3968_v22  ;;  %v4716_v22 = vld [vmem:[%s5483_s19 + $0x68] sm:$0xff] }
 0x37b   : > { %5099 = vmatmul.mubr.bf16.gmra.mxu1 %v3969_v0 }
 0x37c   : > { %5102 = vmatprep.mubr.bf16.mxu1 %v3970_v10 }
 0x383   : > { %5103 = vmatmul.mubr.bf16.gmra.mxu1 %v3971_v28 }
 0x384   : > { %5106 = vmatprep.mubr.bf16.mxu1 %v3972_v7 }
 0x38b   : > { %5107 = vmatmul.mubr.bf16.gmra.mxu1 %v3973_v56 }
 0x38c   : > { %5110 = vmatprep.mubr.bf16.mxu1 %v3974_v36 }
 0x393   : > { %5111 = vmatmul.mubr.bf16.gmra.mxu1 %v3975_v31 }
 0x416   : > { %v5084_v47 = vpop.f32.mrf.mxu1 }
 0x417   : > { %v4090_v45 = vadd.f32 %v5084_v47, %v7027_v57  ;;  %v4719_v47 = vld [vmem:[%s5483_s19 + $0x80] sm:$0xff] }
 0x418   : > { %v4081_v5 = vpop.f32.mrf.mxu1 }
 0x419   : > { %v4245_v25 = vadd.f32 %v4709_v3, %v4090_v45  ;;  %v4082_v54 = vadd.f32 %v7027_v57, %v4081_v5 }
 0x41a   : > { %v5085_v37 = vpop.f32.mrf.mxu1 }
 0x41b   : > { %v4277_v50 = vmax.f32 %v4245_v25, 0.0  ;;  %v4243_v40 = vadd.f32 %v4707_v23, %v4082_v54  ;;  %v4093_v52 = vadd.f32 %v5085_v37, %v7027_v57  ;;  %v4722_v25 = vld [vmem:[%s5483_s19 + $0x98] sm:$0xff] }
 0x41c   : > { %v4084_v63 = vpop.f32.mrf.mxu1 }
 0x41d   : > { %4310 = vst.msk [vmem:[%s5488_s21 + $0x10] sm:$0xff] %vm4307_vm2, %v4277_v50  ;;  %v4275_v29 = vmax.f32 %v4243_v40, 0.0  ;;  %v4246_v60 = vadd.f32 %v4710_v14, %v4093_v52  ;;  %v4085_v35 = vadd.f32 %v7027_v57, %v4084_v63  ;;  %v4720_v40 = vld [vmem:[%s5483_s19 + $0x88] sm:$0xff] }
 0x41f   : > { %4308 = vst.msk [vmem:[%s5488_s21] sm:$0xff] %vm4307_vm2, %v4275_v29  ;;  %v4278_v30 = vmax.f32 %v4246_v60, 0.0  ;;  %v4244_v39 = vadd.f32 %v4708_v20, %v4085_v35  ;;  %v4725_v60 = vld [vmem:[%s5483_s19 + $0xb0] sm:$0xff] }
 0x421   : > { %4311 = vst.msk [vmem:[%s5488_s21 + $0x18] sm:$0xff] %vm4307_vm2, %v4278_v30  ;;  %v4276_v9 = vmax.f32 %v4244_v39, 0.0 }
 0x423   : > { %4309 = vst.msk [vmem:[%s5488_s21 + $0x8] sm:$0xff] %vm4307_vm2, %v4276_v9  ;;  %v5088_v61 = vpop.f32.mrf.mxu1 }
 0x424   : > { %v4106_v53 = vadd.f32 %v5088_v61, %v7027_v57  ;;  %v4723_v61 = vld [vmem:[%s5483_s19 + $0xa0] sm:$0xff] }
 0x425   : > { %v4097_v59 = vpop.f32.mrf.mxu1 }
 0x426   : > { %v4249_v34 = vadd.f32 %v4713_v11, %v4106_v53  ;;  %v4098_v55 = vadd.f32 %v7027_v57, %v4097_v59 }
 0x427   : > { %v5089_v26 = vpop.f32.mrf.mxu1 }
 0x428   : > { %v4281_v17 = vmax.f32 %v4249_v34, 0.0  ;;  %v4247_v18 = vadd.f32 %v4711_v32, %v4098_v55  ;;  %v4109_v24 = vadd.f32 %v5089_v26, %v7027_v57  ;;  %v4726_v34 = vld [vmem:[%s5483_s19 + $0xb8] sm:$0xff] }
 0x429   : > { %v4100_v44 = vpop.f32.mrf.mxu1 }
 0x42a   : > { %4314 = vst.msk [vmem:[%s5488_s21 + $0x30] sm:$0xff] %vm4307_vm2, %v4281_v17  ;;  %v4279_v2 = vmax.f32 %v4247_v18, 0.0  ;;  %v4250_v51 = vadd.f32 %v4714_v46, %v4109_v24  ;;  %v4101_v41 = vadd.f32 %v7027_v57, %v4100_v44  ;;  %v4724_v18 = vld [vmem:[%s5483_s19 + $0xa8] sm:$0xff] }
 0x42b   : > { %v5092_v12 = vpop.f32.mrf.mxu1 }
 0x42c   : > { %4312 = vst.msk [vmem:[%s5488_s21 + $0x20] sm:$0xff] %vm4307_vm2, %v4279_v2  ;;  %v4282_v1 = vmax.f32 %v4250_v51, 0.0  ;;  %v4248_v58 = vadd.f32 %v4712_v6, %v4101_v41  ;;  %v4122_v4 = vadd.f32 %v5092_v12, %v7027_v57  ;;  %v4729_v51 = vld [vmem:[%s5483_s19 + $0xd0] sm:$0xff] }
 0x42d   : > { %v4113_v0 = vpop.f32.mrf.mxu1 }
 0x42e   : > { %4315 = vst.msk [vmem:[%s5488_s21 + $0x38] sm:$0xff] %vm4307_vm2, %v4282_v1  ;;  %v4280_v15 = vmax.f32 %v4248_v58, 0.0  ;;  %v4253_v19 = vadd.f32 %v4717_v38, %v4122_v4  ;;  %v4114_v28 = vadd.f32 %v7027_v57, %v4113_v0  ;;  %v4727_v58 = vld [vmem:[%s5483_s19 + $0xc0] sm:$0xff] }
 0x42f   : > { %v5093_v16 = vpop.f32.mrf.mxu1 }
 0x430   : > { %4313 = vst.msk [vmem:[%s5488_s21 + $0x28] sm:$0xff] %vm4307_vm2, %v4280_v15  ;;  %v4285_v13 = vmax.f32 %v4253_v19, 0.0  ;;  %v4251_v8 = vadd.f32 %v4715_v62, %v4114_v28  ;;  %v4125_v56 = vadd.f32 %v5093_v16, %v7027_v57  ;;  %v4730_v19 = vld [vmem:[%s5483_s19 + $0xd8] sm:$0xff] }
 0x431   : > { %v4116_v27 = vpop.f32.mrf.mxu1 }
 0x432   : > { %4318 = vst.msk [vmem:[%s5488_s21 + $0x50] sm:$0xff] %vm4307_vm2, %v4285_v13  ;;  %v4283_v33 = vmax.f32 %v4251_v8, 0.0  ;;  %v4254_v49 = vadd.f32 %v4718_v42, %v4125_v56  ;;  %v4117_v43 = vadd.f32 %v7027_v57, %v4116_v27  ;;  %v4728_v8 = vld [vmem:[%s5483_s19 + $0xc8] sm:$0xff] }
 0x433   : > { %v5096_v10 = vpop.f32.mrf.mxu1 }
 0x434   : > { %4316 = vst.msk [vmem:[%s5488_s21 + $0x40] sm:$0xff] %vm4307_vm2, %v4283_v33  ;;  %v4286_v31 = vmax.f32 %v4254_v49, 0.0  ;;  %v4252_v7 = vadd.f32 %v4716_v22, %v4117_v43  ;;  %v4138_v21 = vadd.f32 %v5096_v10, %v7027_v57  ;;  %v4733_v49 = vld [vmem:[%s5483_s19 + $0xf0] sm:$0xff] }
 0x435   : > { %v4129_v36 = vpop.f32.mrf.mxu1 }
 0x436   : > { %4319 = vst.msk [vmem:[%s5488_s21 + $0x58] sm:$0xff] %vm4307_vm2, %v4286_v31  ;;  %v4284_v3 = vmax.f32 %v4252_v7, 0.0  ;;  %v4257_v45 = vadd.f32 %v4721_v48, %v4138_v21  ;;  %v4130_v5 = vadd.f32 %v7027_v57, %v4129_v36  ;;  %v4731_v7 = vld [vmem:[%s5483_s19 + $0xe0] sm:$0xff] }
 0x437   : > { %v5097_v23 = vpop.f32.mrf.mxu1 }
 0x438   : > { %4317 = vst.msk [vmem:[%s5488_s21 + $0x48] sm:$0xff] %vm4307_vm2, %v4284_v3  ;;  %v4289_v54 = vmax.f32 %v4257_v45, 0.0  ;;  %v4255_v37 = vadd.f32 %v4719_v47, %v4130_v5  ;;  %v4141_v14 = vadd.f32 %v5097_v23, %v7027_v57  ;;  %v4734_v45 = vld [vmem:[%s5483_s19 + $0xf8] sm:$0xff] }
 0x439   : > { %v4132_v50 = vpop.f32.mrf.mxu1 }
 0x43a   : > { %4322 = vst.msk [vmem:[%s5488_s21 + $0x70] sm:$0xff] %vm4307_vm2, %v4289_v54  ;;  %v4287_v52 = vmax.f32 %v4255_v37, 0.0  ;;  %v4258_v63 = vadd.f32 %v4722_v25, %v4141_v14  ;;  %v4133_v20 = vadd.f32 %v7027_v57, %v4132_v50  ;;  %v4732_v37 = vld [vmem:[%s5483_s19 + $0xe8] sm:$0xff] }
 0x43b   : > { %v5100_v29 = vpop.f32.mrf.mxu1 }
 0x43c   : > { %4320 = vst.msk [vmem:[%s5488_s21 + $0x60] sm:$0xff] %vm4307_vm2, %v4287_v52  ;;  %v4290_v35 = vmax.f32 %v4258_v63, 0.0  ;;  %v4256_v30 = vadd.f32 %v4720_v40, %v4133_v20  ;;  %v4154_v39 = vadd.f32 %v5100_v29, %v7027_v57  ;;  %v4737_v63 = vld [vmem:[%s5483_s19 + $0x110] sm:$0xff] }
 0x43d   : > { %v4145_v9 = vpop.f32.mrf.mxu1 }
 0x43e   : > { %4323 = vst.msk [vmem:[%s5488_s21 + $0x78] sm:$0xff] %vm4307_vm2, %v4290_v35  ;;  %v4288_v11 = vmax.f32 %v4256_v30, 0.0  ;;  %v4261_v53 = vadd.f32 %v4725_v60, %v4154_v39  ;;  %v4146_v59 = vadd.f32 %v7027_v57, %v4145_v9  ;;  %v4735_v30 = vld [vmem:[%s5483_s19 + $0x100] sm:$0xff] }
 0x43f   : > { %v5101_v32 = vpop.f32.mrf.mxu1 }
 0x440   : > { %4321 = vst.msk [vmem:[%s5488_s21 + $0x68] sm:$0xff] %vm4307_vm2, %v4288_v11  ;;  %v4293_v55 = vmax.f32 %v4261_v53, 0.0  ;;  %v4259_v26 = vadd.f32 %v4723_v61, %v4146_v59  ;;  %v4157_v46 = vadd.f32 %v5101_v32, %v7027_v57  ;;  %v4738_v53 = vld [vmem:[%s5483_s19 + $0x118] sm:$0xff] }
 0x441   : > { %v4148_v17 = vpop.f32.mrf.mxu1 }
 0x442   : > { %4326 = vst.msk [vmem:[%s5488_s21 + $0x90] sm:$0xff] %vm4307_vm2, %v4293_v55  ;;  %v4291_v24 = vmax.f32 %v4259_v26, 0.0  ;;  %v4262_v44 = vadd.f32 %v4726_v34, %v4157_v46  ;;  %v4149_v6 = vadd.f32 %v7027_v57, %v4148_v17  ;;  %v4736_v26 = vld [vmem:[%s5483_s19 + $0x108] sm:$0xff] }
 0x443   : > { %v5104_v2 = vpop.f32.mrf.mxu1 }
 0x444   : > { %4324 = vst.msk [vmem:[%s5488_s21 + $0x80] sm:$0xff] %vm4307_vm2, %v4291_v24  ;;  %v4294_v41 = vmax.f32 %v4262_v44, 0.0  ;;  %v4260_v12 = vadd.f32 %v4724_v18, %v4149_v6  ;;  %v4170_v38 = vadd.f32 %v5104_v2, %v7027_v57 }
 0x445   : > { %v4161_v1 = vpop.f32.mrf.mxu1 }
 0x446   : > { %4327 = vst.msk [vmem:[%s5488_s21 + $0x98] sm:$0xff] %vm4307_vm2, %v4294_v41  ;;  %v4292_v4 = vmax.f32 %v4260_v12, 0.0  ;;  %v4265_v0 = vadd.f32 %v4729_v51, %v4170_v38  ;;  %v4162_v62 = vadd.f32 %v7027_v57, %v4161_v1 }
 0x447   : > { %v5105_v15 = vpop.f32.mrf.mxu1 }
 0x448   : > { %4325 = vst.msk [vmem:[%s5488_s21 + $0x88] sm:$0xff] %vm4307_vm2, %v4292_v4  ;;  %v4297_v28 = vmax.f32 %v4265_v0, 0.0  ;;  %v4263_v16 = vadd.f32 %v4727_v58, %v4162_v62  ;;  %v4173_v42 = vadd.f32 %v5105_v15, %v7027_v57 }
 0x449   : > { %v4164_v13 = vpop.f32.mrf.mxu1 }
 0x44a   : > { %4330 = vst.msk [vmem:[%s5488_s21 + $0xb0] sm:$0xff] %vm4307_vm2, %v4297_v28  ;;  %v4295_v56 = vmax.f32 %v4263_v16, 0.0  ;;  %v4266_v27 = vadd.f32 %v4730_v19, %v4173_v42  ;;  %v4165_v22 = vadd.f32 %v7027_v57, %v4164_v13 }
 0x44b   : > { %v5108_v33 = vpop.f32.mrf.mxu1 }
 0x44c   : > { %4328 = vst.msk [vmem:[%s5488_s21 + $0xa0] sm:$0xff] %vm4307_vm2, %v4295_v56  ;;  %v4298_v43 = vmax.f32 %v4266_v27, 0.0  ;;  %v4264_v10 = vadd.f32 %v4728_v8, %v4165_v22  ;;  %v4186_v48 = vadd.f32 %v5108_v33, %v7027_v57 }
 0x44d   : > { %v4177_v31 = vpop.f32.mrf.mxu1 }
 0x44e   : > { %4331 = vst.msk [vmem:[%s5488_s21 + $0xb8] sm:$0xff] %vm4307_vm2, %v4298_v43  ;;  %v4296_v21 = vmax.f32 %v4264_v10, 0.0  ;;  %v4269_v36 = vadd.f32 %v4733_v49, %v4186_v48  ;;  %v4178_v47 = vadd.f32 %v7027_v57, %v4177_v31 }
 0x44f   : > { %v5109_v3 = vpop.f32.mrf.mxu1 }
 0x450   : > { %4329 = vst.msk [vmem:[%s5488_s21 + $0xa8] sm:$0xff] %vm4307_vm2, %v4296_v21  ;;  %v4301_v5 = vmax.f32 %v4269_v36, 0.0  ;;  %v4267_v23 = vadd.f32 %v4731_v7, %v4178_v47  ;;  %v4189_v25 = vadd.f32 %v5109_v3, %v7027_v57 }
 0x451   : > { %v4180_v54 = vpop.f32.mrf.mxu1 }
 0x452   : > { %4334 = vst.msk [vmem:[%s5488_s21 + $0xd0] sm:$0xff] %vm4307_vm2, %v4301_v5  ;;  %v4299_v14 = vmax.f32 %v4267_v23, 0.0  ;;  %v4270_v50 = vadd.f32 %v4734_v45, %v4189_v25  ;;  %v4181_v40 = vadd.f32 %v7027_v57, %v4180_v54 }
 0x453   : > { %v5112_v52 = vpop.f32.mrf.mxu1 }
 0x454   : > { %4332 = vst.msk [vmem:[%s5488_s21 + $0xc0] sm:$0xff] %vm4307_vm2, %v4299_v14  ;;  %v4302_v20 = vmax.f32 %v4270_v50, 0.0  ;;  %v4268_v29 = vadd.f32 %v4732_v37, %v4181_v40  ;;  %v4202_v60 = vadd.f32 %v5112_v52, %v7027_v57 }
 0x455   : > { %v4193_v35 = vpop.f32.mrf.mxu1 }
 0x456   : > { %4335 = vst.msk [vmem:[%s5488_s21 + $0xd8] sm:$0xff] %vm4307_vm2, %v4302_v20  ;;  %v4300_v39 = vmax.f32 %v4268_v29, 0.0  ;;  %v4273_v9 = vadd.f32 %v4737_v63, %v4202_v60  ;;  %v4194_v61 = vadd.f32 %v7027_v57, %v4193_v35 }
 0x457   : > { %v5113_v11 = vpop.f32.mrf.mxu1 }
 0x458   : > { %4333 = vst.msk [vmem:[%s5488_s21 + $0xc8] sm:$0xff] %vm4307_vm2, %v4300_v39  ;;  %v4305_v59 = vmax.f32 %v4273_v9, 0.0  ;;  %v4271_v32 = vadd.f32 %v4735_v30, %v4194_v61  ;;  %v4205_v34 = vadd.f32 %v5113_v11, %v7027_v57 }
 0x459   : > { %v4196_v55 = vpop.f32.mrf.mxu1 }
 0x45a   : > { %4338 = vst.msk [vmem:[%s5488_s21 + $0xf0] sm:$0xff] %vm4307_vm2, %v4305_v59  ;;  %v4303_v46 = vmax.f32 %v4271_v32, 0.0  ;;  %v4274_v17 = vadd.f32 %v4738_v53, %v4205_v34  ;;  %v4197_v18 = vadd.f32 %v7027_v57, %v4196_v55 }
 0x45c   : > { %4336 = vst.msk [vmem:[%s5488_s21 + $0xe0] sm:$0xff] %vm4307_vm2, %v4303_v46  ;;  %v4306_v24 = vmax.f32 %v4274_v17, 0.0  ;;  %v4272_v44 = vadd.f32 %v4736_v26, %v4197_v18 }
 0x45e   : > { %4339 = vst.msk [vmem:[%s5488_s21 + $0xf8] sm:$0xff] %vm4307_vm2, %v4306_v24  ;;  %v4304_v6 = vmax.f32 %v4272_v44, 0.0 }
 0x460   : > { %4337 = vst.msk [vmem:[%s5488_s21 + $0xe8] sm:$0xff] %vm4307_vm2, %v4304_v6 }
 0x461 PF: > { %s18_s9 = sadd.s32 1, %s5375_s9   ;;  %s7308_s27 = smov %s5367_s29 }
 0x462   : > { %p15_p9 = scmp.ge.s32.totalorder %s18_s9, 6   ;;  %s7309_s28 = smov %s5371_s30 }
 0x463   : > { %s7310_s29 = smov %s7313_s10  ;;  %s7311_s30 = smov %s7317_s11 }
 0x464   :  { %17 = sbr.rel (!%p15_p9) target bundleno = 3 (0x3), region = 94 }

</bundles_post_ra>
